<compile_context>
chip_gen: v5e
topology: v5e:2x2
jax: 0.10.0
libtpu: 0.0.40
codegen_flags: <defaults>
</compile_context>

<pallas_src>
import functools

import jax
import jax.numpy as jnp
import numpy as np
from jax import lax
from jax.experimental import pallas as pl
from jax.experimental.pallas import tpu as pltpu

BN_EPS = 1e-5
LANES = 128


# ---------------------------------------------------------------------------
# Single Pallas pass: conv as 9 accumulated matmuls + per-image BN partials
# ---------------------------------------------------------------------------
def _conv_stats_kernel(x_ref, w_ref, conv_ref, sum_ref, sumsq_ref, *, H, W):
    # x_ref:     (1, L, C)    bf16  flattened padded NHWC image, L = (H+3)*(W+2)
    # w_ref:     (9, C, Gp)   bf16  tap-major 3x3 weights, Gp = 128-padded out ch
    # conv_ref:  (1, HWp, Gp) bf16  conv output incl. junk width cols, HWp=H*(W+2)
    # sum_ref:   (1, 1, Gp)   f32   per-image sum   (taken from the f32 acc)
    # sumsq_ref: (1, 1, Gp)   f32   per-image sumsq (taken from the f32 acc)
    Wp = W + 2
    HWp = H * Wp
    Gp = conv_ref.shape[2]

    # 9 accumulated MXU matmuls (bf16 x bf16 -> f32), one per (kh, kw) tap.
    # Each tap is a contiguous static row window of the flattened padded image.
    # TODO(synk): 6 of the 9 windows start at sublane-unaligned offsets; if the
    # bundle dump shows realign copies, load the 3 kh-aligned windows once and
    # use pltpu.roll for the kw = 1, 2 shifts (review opt #4).
    acc = jnp.zeros((HWp, Gp), jnp.float32)
    for kh in range(3):
        for kw in range(3):
            shift = kh * Wp + kw
            xs = x_ref[0, shift:shift + HWp, :]                # (HWp, C) bf16
            acc = acc + jnp.dot(xs, w_ref[kh * 3 + kw],
                                preferred_element_type=jnp.float32)

    # Zero the junk columns (j == W, W+1 of each padded row) so they neither
    # pollute the BN statistics nor carry garbage to HBM.
    row = lax.broadcasted_iota(jnp.int32, (HWp, 1), 0)
    valid = (row % Wp) < W
    acc = jnp.where(valid, acc, 0.0)

    # Store the intermediate in bf16 (halves its HBM footprint); statistics are
    # computed from the f32 accumulator so BN is unaffected.
    conv_ref[0] = acc.astype(conv_ref.dtype)

    # Per-image partial stats -> batch grid axis stays "parallel" (v7x megacore).
    # TODO(synk): switch to shifted sums / two-pass variance if E[x^2]-E[x]^2
    # cancellation becomes visible at scale.
    sum_ref[0] = jnp.sum(acc, axis=0, keepdims=True)
    sumsq_ref[0] = jnp.sum(acc * acc, axis=0, keepdims=True)


# ---------------------------------------------------------------------------
# Wrapper: layout glue, the pallas_call, BN fold + fused XLA epilogue, concat
# ---------------------------------------------------------------------------
@jax.jit
def dense_layer_forward(x_nchw, conv_weight, gamma, beta):
    """x_nchw: (N, C, H, W) f32; conv_weight: (G, C, 3, 3); gamma/beta: (G,)."""
    N, C, H, W = x_nchw.shape
    G = conv_weight.shape[0]
    Gp = ((G + LANES - 1) // LANES) * LANES
    Wp = W + 2
    HWp = H * Wp
    Hp = H + 3          # one extra padded row keeps the (kh=2, kw=2) tap of the
                        # last output row in-bounds after flattening
    L = Hp * Wp

    # NHWC; cast to bf16 *before* padding and use a single merged pad (opt #7).
    x_nhwc = x_nchw.transpose(0, 2, 3, 1).astype(jnp.bfloat16)        # (N,H,W,C)
    x_flat = jnp.pad(x_nhwc, ((0, 0), (1, 2), (1, 1), (0, 0))).reshape(N, L, C)

    # (G, C, 3, 3) -> tap-major (9, C, Gp), zero-padded output channels, bf16.
    # TODO(synk): for growth rate 32, pack 4 adjacent width positions into the
    # lane dim (block-diagonal kron(I4, W_tap) weights) so only real output
    # lanes are moved/computed downstream (review opt #3).
    w_taps = conv_weight.transpose(2, 3, 1, 0).reshape(9, C, G)
    w_taps = jnp.pad(w_taps, ((0, 0), (0, 0), (0, Gp - G))).astype(jnp.bfloat16)

    # ---- single Pallas pass: conv + per-image partial BN sums ---------------
    # TODO(synk): single-buffer the constant weight block via
    # pipeline_mode=pl.Buffered(1) once verified on the target jax build
    # (saves ~4 MiB VMEM at C~1664; review opt #5).
    # TODO(synk): batch several images per grid step for the 14x14 / 7x7 stages
    # and row-tile (with a 2-row halo) the 56x56 stage (review opt #6).
    conv_q, psum, psumsq = pl.pallas_call(
        functools.partial(_conv_stats_kernel, H=H, W=W),
        grid=(N,),
        in_specs=[
            pl.BlockSpec((1, L, C), lambda n: (n, 0, 0)),
            pl.BlockSpec((9, C, Gp), lambda n: (0, 0, 0)),
        ],
        out_specs=(
            pl.BlockSpec((1, HWp, Gp), lambda n: (n, 0, 0)),
            pl.BlockSpec((1, 1, Gp), lambda n: (n, 0, 0)),
            pl.BlockSpec((1, 1, Gp), lambda n: (n, 0, 0)),
        ),
        out_shape=(
            jax.ShapeDtypeStruct((N, HWp, Gp), jnp.bfloat16),
            jax.ShapeDtypeStruct((N, 1, Gp), jnp.float32),
            jax.ShapeDtypeStruct((N, 1, Gp), jnp.float32),
        ),
        compiler_params=pltpu.CompilerParams(
            dimension_semantics=("parallel",),
            # Worst-case DenseNet-169 blocks (~28 MiB with double buffers) fit;
            # 48 MiB leaves slack on v5e/v6e (128 MiB VMEM) and stays under
            # v7x's 64 MiB physical capacity.
            vmem_limit_bytes=48 * 1024 * 1024),
        cost_estimate=pl.CostEstimate(
            flops=2 * N * HWp * 9 * C * Gp,
            transcendentals=0,
            bytes_accessed=(N * L * C * 2 + 9 * C * Gp * 2
                            + N * HWp * Gp * 2 + 2 * N * Gp * 4)),
    )(x_flat, w_taps)

    # ---- fold training-mode biased batch stats + gamma/beta into scale/shift
    cnt = float(N * H * W)
    s1 = jnp.sum(psum, axis=0)[0, :G]                                   # (G,)
    s2 = jnp.sum(psumsq, axis=0)[0, :G]                                 # (G,)
    mean = s1 / cnt
    var = jnp.maximum(s2 / cnt - mean * mean, 0.0)
    scale = gamma.astype(jnp.float32) * lax.rsqrt(var + BN_EPS)
    shift = beta.astype(jnp.float32) - mean * scale

    # ---- BN + ReLU folded into the XLA slice/transpose/concat epilogue ------
    # (one fused read of the bf16 intermediate; no second Pallas pass, no extra
    # HBM round-trip — review opt #1.)
    conv_g = conv_q.reshape(N, H, Wp, Gp)[:, :, :W, :G].astype(jnp.float32)
    out = jnp.maximum(conv_g * scale + shift, 0.0)                      # (N,H,W,G)
    out_nchw = out.transpose(0, 3, 1, 2)
    # TODO(synk): keep activations NHWC across the dense block so the
    # NCHW<->NHWC transposes and this concat stop costing an extra HBM pass.
    return jnp.concatenate([x_nchw, out_nchw], axis=1)


# ---------------------------------------------------------------------------
# Deterministic parameter init (matches nn.Conv2d + xavier_uniform_(gain=relu))
# ---------------------------------------------------------------------------
def init_params(key, in_channels, growth_rate):
    fan_in = in_channels * 3 * 3
    fan_out = growth_rate * 3 * 3
    gain = np.sqrt(2.0)  # init.calculate_gain('relu')
    bound = gain * np.sqrt(6.0 / (fan_in + fan_out))
    conv_w = jax.random.uniform(
        key, (growth_rate, in_channels, 3, 3),
        minval=-bound, maxval=bound, dtype=jnp.float32)
    gamma = jnp.ones((growth_rate,), jnp.float32)   # BatchNorm2d default weight
    beta = jnp.zeros((growth_rate,), jnp.float32)   # BatchNorm2d default bias
    return conv_w, gamma, beta


# ---------------------------------------------------------------------------
# Pure-JAX reference (sanity check)
# ---------------------------------------------------------------------------
def reference_forward(x, conv_w, gamma, beta, *, round_conv_to_bf16=False):
    conv = lax.conv_general_dilated(
        x, conv_w, window_strides=(1, 1), padding=((1, 1), (1, 1)),
        dimension_numbers=("NCHW", "OIHW", "NCHW"),
        precision=lax.Precision.HIGHEST)
    mean = jnp.mean(conv, axis=(0, 2, 3), keepdims=True)
    var = jnp.mean((conv - mean) ** 2, axis=(0, 2, 3), keepdims=True)
    conv_q = conv
    if round_conv_to_bf16:
        # Mirror the kernel: stats from the f32 conv, normalization applied to
        # the bf16-rounded intermediate.
        conv_q = conv.astype(jnp.bfloat16).astype(jnp.float32)
    bn = (conv_q - mean) * lax.rsqrt(var + BN_EPS)
    bn = bn * gamma.reshape(1, -1, 1, 1) + beta.reshape(1, -1, 1, 1)
    out = jnp.maximum(bn, 0.0)
    return jnp.concatenate([x, out], axis=1)


if __name__ == "__main__":
    key = jax.random.PRNGKey(0)
    k_x, k_w = jax.random.split(key)

    N, C_IN, H, W = 2, 4, 16, 16
    GROWTH = 8

    x = jax.random.normal(k_x, (N, C_IN, H, W), dtype=jnp.float32)
    conv_w, gamma, beta = init_params(k_w, C_IN, GROWTH)

    y = dense_layer_forward(x, conv_w, gamma, beta)
    y = jax.block_until_ready(y)
    assert y.shape == (N, C_IN + GROWTH, H, W), y.shape

    # Loose check vs the pure-f32 reference (kernel uses bf16 MXU operands and
    # a bf16 conv intermediate).
    y_ref = reference_forward(x, conv_w, gamma, beta)
    np.testing.assert_allclose(np.asarray(y), np.asarray(y_ref),
                               rtol=5e-2, atol=5e-2)

    # Tighter check vs a precision-matched reference (bf16-rounded operands and
    # bf16-rounded conv intermediate, f32 batch stats), comparing only the new
    # channels (the x passthrough is exact).
    x_m = x.astype(jnp.bfloat16).astype(jnp.float32)
    w_m = conv_w.astype(jnp.bfloat16).astype(jnp.float32)
    y_ref_m = reference_forward(x_m, w_m, gamma, beta, round_conv_to_bf16=True)
    np.testing.assert_allclose(np.asarray(y[:, C_IN:]),
                               np.asarray(y_ref_m[:, C_IN:]),
                               rtol=1e-2, atol=1e-2)

    print("KERNEL_OK")
</pallas_src>

<mosaic_0001>
module attributes {stable_mosaic.version = 11 : i64} {
  func.func @_conv_stats_kernel(%arg0: i32, %arg1: memref<1x342x4xbf16, #tpu.memory_space<vmem>>, %arg2: memref<9x4x128xbf16, #tpu.memory_space<vmem>>, %arg3: memref<1x288x128xbf16, #tpu.memory_space<vmem>>, %arg4: memref<1x1x128xf32, #tpu.memory_space<vmem>>, %arg5: memref<1x1x128xf32, #tpu.memory_space<vmem>>) attributes {dimension_semantics = [#tpu.dimension_semantics<parallel>], iteration_bounds = array<i64: 2>, scalar_prefetch = 0 : i64, scratch_operands = 0 : i64, tpu.core_type = #tpu.core_type<tc>, window_params = [{transform_indices = @transform_0, window_bounds = array<i64: 1, 342, 4>}, {pipeline_mode = #tpu.pipeline_mode<synchronous>, transform_indices = @transform_1, window_bounds = array<i64: 9, 4, 128>}, {transform_indices = @transform_2, window_bounds = array<i64: 1, 288, 128>}, {transform_indices = @transform_3, window_bounds = array<i64: 1, 1, 128>}, {transform_indices = @transform_4, window_bounds = array<i64: 1, 1, 128>}]} {
    %cst = arith.constant 0.000000e+00 : f32
    %0 = vector.broadcast %cst : f32 to vector<288x128xf32>
    %c0 = arith.constant 0 : index
    %c0_0 = arith.constant 0 : index
    %c0_1 = arith.constant 0 : index
    %1 = vector.load %arg1[%c0, %c0_0, %c0_1] : memref<1x342x4xbf16, #tpu.memory_space<vmem>>, vector<1x288x4xbf16>
    %2 = vector.shape_cast %1 : vector<1x288x4xbf16> to vector<288x4xbf16>
    %c0_2 = arith.constant 0 : index
    %c0_3 = arith.constant 0 : index
    %c0_4 = arith.constant 0 : index
    %3 = vector.load %arg2[%c0_2, %c0_3, %c0_4] : memref<9x4x128xbf16, #tpu.memory_space<vmem>>, vector<1x4x128xbf16>
    %4 = vector.shape_cast %3 : vector<1x4x128xbf16> to vector<4x128xbf16>
    %cst_5 = arith.constant dense<0.000000e+00> : vector<288x128xf32>
    %5 = tpu.matmul %2, %4, %cst_5 {dimension_numbers = #tpu.dot_dimension_numbers<[1], [0], [0], [1], [0, 0, 1, 1], [], []>} : vector<288x4xbf16>, vector<4x128xbf16>, vector<288x128xf32> -> vector<288x128xf32>
    %6 = arith.addf %0, %5 : vector<288x128xf32>
    %c0_6 = arith.constant 0 : index
    %c1 = arith.constant 1 : index
    %c0_7 = arith.constant 0 : index
    %7 = vector.load %arg1[%c0_6, %c1, %c0_7] : memref<1x342x4xbf16, #tpu.memory_space<vmem>>, vector<1x288x4xbf16>
    %8 = vector.shape_cast %7 : vector<1x288x4xbf16> to vector<288x4xbf16>
    %c1_8 = arith.constant 1 : index
    %c0_9 = arith.constant 0 : index
    %c0_10 = arith.constant 0 : index
    %9 = vector.load %arg2[%c1_8, %c0_9, %c0_10] : memref<9x4x128xbf16, #tpu.memory_space<vmem>>, vector<1x4x128xbf16>
    %10 = vector.shape_cast %9 : vector<1x4x128xbf16> to vector<4x128xbf16>
    %cst_11 = arith.constant dense<0.000000e+00> : vector<288x128xf32>
    %11 = tpu.matmul %8, %10, %cst_11 {dimension_numbers = #tpu.dot_dimension_numbers<[1], [0], [0], [1], [0, 0, 1, 1], [], []>} : vector<288x4xbf16>, vector<4x128xbf16>, vector<288x128xf32> -> vector<288x128xf32>
    %12 = arith.addf %6, %11 : vector<288x128xf32>
    %c0_12 = arith.constant 0 : index
    %c2 = arith.constant 2 : index
    %c0_13 = arith.constant 0 : index
    %13 = vector.load %arg1[%c0_12, %c2, %c0_13] : memref<1x342x4xbf16, #tpu.memory_space<vmem>>, vector<1x288x4xbf16>
    %14 = vector.shape_cast %13 : vector<1x288x4xbf16> to vector<288x4xbf16>
    %c2_14 = arith.constant 2 : index
    %c0_15 = arith.constant 0 : index
    %c0_16 = arith.constant 0 : index
    %15 = vector.load %arg2[%c2_14, %c0_15, %c0_16] : memref<9x4x128xbf16, #tpu.memory_space<vmem>>, vector<1x4x128xbf16>
    %16 = vector.shape_cast %15 : vector<1x4x128xbf16> to vector<4x128xbf16>
    %cst_17 = arith.constant dense<0.000000e+00> : vector<288x128xf32>
    %17 = tpu.matmul %14, %16, %cst_17 {dimension_numbers = #tpu.dot_dimension_numbers<[1], [0], [0], [1], [0, 0, 1, 1], [], []>} : vector<288x4xbf16>, vector<4x128xbf16>, vector<288x128xf32> -> vector<288x128xf32>
    %18 = arith.addf %12, %17 : vector<288x128xf32>
    %c0_18 = arith.constant 0 : index
    %c18 = arith.constant 18 : index
    %c0_19 = arith.constant 0 : index
    %19 = vector.load %arg1[%c0_18, %c18, %c0_19] : memref<1x342x4xbf16, #tpu.memory_space<vmem>>, vector<1x288x4xbf16>
    %20 = vector.shape_cast %19 : vector<1x288x4xbf16> to vector<288x4xbf16>
    %c3 = arith.constant 3 : index
    %c0_20 = arith.constant 0 : index
    %c0_21 = arith.constant 0 : index
    %21 = vector.load %arg2[%c3, %c0_20, %c0_21] : memref<9x4x128xbf16, #tpu.memory_space<vmem>>, vector<1x4x128xbf16>
    %22 = vector.shape_cast %21 : vector<1x4x128xbf16> to vector<4x128xbf16>
    %cst_22 = arith.constant dense<0.000000e+00> : vector<288x128xf32>
    %23 = tpu.matmul %20, %22, %cst_22 {dimension_numbers = #tpu.dot_dimension_numbers<[1], [0], [0], [1], [0, 0, 1, 1], [], []>} : vector<288x4xbf16>, vector<4x128xbf16>, vector<288x128xf32> -> vector<288x128xf32>
    %24 = arith.addf %18, %23 : vector<288x128xf32>
    %c0_23 = arith.constant 0 : index
    %c19 = arith.constant 19 : index
    %c0_24 = arith.constant 0 : index
    %25 = vector.load %arg1[%c0_23, %c19, %c0_24] : memref<1x342x4xbf16, #tpu.memory_space<vmem>>, vector<1x288x4xbf16>
    %26 = vector.shape_cast %25 : vector<1x288x4xbf16> to vector<288x4xbf16>
    %c4 = arith.constant 4 : index
    %c0_25 = arith.constant 0 : index
    %c0_26 = arith.constant 0 : index
    %27 = vector.load %arg2[%c4, %c0_25, %c0_26] : memref<9x4x128xbf16, #tpu.memory_space<vmem>>, vector<1x4x128xbf16>
    %28 = vector.shape_cast %27 : vector<1x4x128xbf16> to vector<4x128xbf16>
    %cst_27 = arith.constant dense<0.000000e+00> : vector<288x128xf32>
    %29 = tpu.matmul %26, %28, %cst_27 {dimension_numbers = #tpu.dot_dimension_numbers<[1], [0], [0], [1], [0, 0, 1, 1], [], []>} : vector<288x4xbf16>, vector<4x128xbf16>, vector<288x128xf32> -> vector<288x128xf32>
    %30 = arith.addf %24, %29 : vector<288x128xf32>
    %c0_28 = arith.constant 0 : index
    %c20 = arith.constant 20 : index
    %c0_29 = arith.constant 0 : index
    %31 = vector.load %arg1[%c0_28, %c20, %c0_29] : memref<1x342x4xbf16, #tpu.memory_space<vmem>>, vector<1x288x4xbf16>
    %32 = vector.shape_cast %31 : vector<1x288x4xbf16> to vector<288x4xbf16>
    %c5 = arith.constant 5 : index
    %c0_30 = arith.constant 0 : index
    %c0_31 = arith.constant 0 : index
    %33 = vector.load %arg2[%c5, %c0_30, %c0_31] : memref<9x4x128xbf16, #tpu.memory_space<vmem>>, vector<1x4x128xbf16>
    %34 = vector.shape_cast %33 : vector<1x4x128xbf16> to vector<4x128xbf16>
    %cst_32 = arith.constant dense<0.000000e+00> : vector<288x128xf32>
    %35 = tpu.matmul %32, %34, %cst_32 {dimension_numbers = #tpu.dot_dimension_numbers<[1], [0], [0], [1], [0, 0, 1, 1], [], []>} : vector<288x4xbf16>, vector<4x128xbf16>, vector<288x128xf32> -> vector<288x128xf32>
    %36 = arith.addf %30, %35 : vector<288x128xf32>
    %c0_33 = arith.constant 0 : index
    %c36 = arith.constant 36 : index
    %c0_34 = arith.constant 0 : index
    %37 = vector.load %arg1[%c0_33, %c36, %c0_34] : memref<1x342x4xbf16, #tpu.memory_space<vmem>>, vector<1x288x4xbf16>
    %38 = vector.shape_cast %37 : vector<1x288x4xbf16> to vector<288x4xbf16>
    %c6 = arith.constant 6 : index
    %c0_35 = arith.constant 0 : index
    %c0_36 = arith.constant 0 : index
    %39 = vector.load %arg2[%c6, %c0_35, %c0_36] : memref<9x4x128xbf16, #tpu.memory_space<vmem>>, vector<1x4x128xbf16>
    %40 = vector.shape_cast %39 : vector<1x4x128xbf16> to vector<4x128xbf16>
    %cst_37 = arith.constant dense<0.000000e+00> : vector<288x128xf32>
    %41 = tpu.matmul %38, %40, %cst_37 {dimension_numbers = #tpu.dot_dimension_numbers<[1], [0], [0], [1], [0, 0, 1, 1], [], []>} : vector<288x4xbf16>, vector<4x128xbf16>, vector<288x128xf32> -> vector<288x128xf32>
    %42 = arith.addf %36, %41 : vector<288x128xf32>
    %c0_38 = arith.constant 0 : index
    %c37 = arith.constant 37 : index
    %c0_39 = arith.constant 0 : index
    %43 = vector.load %arg1[%c0_38, %c37, %c0_39] : memref<1x342x4xbf16, #tpu.memory_space<vmem>>, vector<1x288x4xbf16>
    %44 = vector.shape_cast %43 : vector<1x288x4xbf16> to vector<288x4xbf16>
    %c7 = arith.constant 7 : index
    %c0_40 = arith.constant 0 : index
    %c0_41 = arith.constant 0 : index
    %45 = vector.load %arg2[%c7, %c0_40, %c0_41] : memref<9x4x128xbf16, #tpu.memory_space<vmem>>, vector<1x4x128xbf16>
    %46 = vector.shape_cast %45 : vector<1x4x128xbf16> to vector<4x128xbf16>
    %cst_42 = arith.constant dense<0.000000e+00> : vector<288x128xf32>
    %47 = tpu.matmul %44, %46, %cst_42 {dimension_numbers = #tpu.dot_dimension_numbers<[1], [0], [0], [1], [0, 0, 1, 1], [], []>} : vector<288x4xbf16>, vector<4x128xbf16>, vector<288x128xf32> -> vector<288x128xf32>
    %48 = arith.addf %42, %47 : vector<288x128xf32>
    %c0_43 = arith.constant 0 : index
    %c38 = arith.constant 38 : index
    %c0_44 = arith.constant 0 : index
    %49 = vector.load %arg1[%c0_43, %c38, %c0_44] : memref<1x342x4xbf16, #tpu.memory_space<vmem>>, vector<1x288x4xbf16>
    %50 = vector.shape_cast %49 : vector<1x288x4xbf16> to vector<288x4xbf16>
    %c8 = arith.constant 8 : index
    %c0_45 = arith.constant 0 : index
    %c0_46 = arith.constant 0 : index
    %51 = vector.load %arg2[%c8, %c0_45, %c0_46] : memref<9x4x128xbf16, #tpu.memory_space<vmem>>, vector<1x4x128xbf16>
    %52 = vector.shape_cast %51 : vector<1x4x128xbf16> to vector<4x128xbf16>
    %cst_47 = arith.constant dense<0.000000e+00> : vector<288x128xf32>
    %53 = tpu.matmul %50, %52, %cst_47 {dimension_numbers = #tpu.dot_dimension_numbers<[1], [0], [0], [1], [0, 0, 1, 1], [], []>} : vector<288x4xbf16>, vector<4x128xbf16>, vector<288x128xf32> -> vector<288x128xf32>
    %54 = arith.addf %48, %53 : vector<288x128xf32>
    %55 = tpu.iota {dimensions = array<i32: 0>} : vector<288x1xi32>
    %c18_i32 = arith.constant 18 : i32
    %c0_i32 = arith.constant 0 : i32
    %56 = arith.cmpi eq, %c18_i32, %c0_i32 : i32
    %c1_i32 = arith.constant 1 : i32
    %57 = arith.select %56, %c1_i32, %c18_i32 : i32
    %58 = vector.broadcast %57 : i32 to vector<288x1xi32>
    %59 = arith.remsi %55, %58 : vector<288x1xi32>
    %c0_i32_48 = arith.constant 0 : i32
    %60 = vector.broadcast %c0_i32_48 : i32 to vector<288x1xi32>
    %61 = arith.cmpi ne, %59, %60 : vector<288x1xi32>
    %c0_i32_49 = arith.constant 0 : i32
    %62 = vector.broadcast %c0_i32_49 : i32 to vector<288x1xi32>
    %63 = arith.cmpi slt, %59, %62 : vector<288x1xi32>
    %c0_i32_50 = arith.constant 0 : i32
    %64 = arith.cmpi slt, %57, %c0_i32_50 : i32
    %65 = vector.broadcast %64 : i1 to vector<288x1xi1>
    %66 = vector.broadcast %65 : vector<288x1xi1> to vector<288x1xi1>
    %67 = arith.xori %63, %66 : vector<288x1xi1>
    %68 = arith.andi %67, %61 : vector<288x1xi1>
    %69 = vector.broadcast %57 : i32 to vector<288x1xi32>
    %70 = arith.addi %59, %69 : vector<288x1xi32>
    %71 = arith.select %68, %70, %59 : vector<288x1xi1>, vector<288x1xi32>
    %c16_i32 = arith.constant 16 : i32
    %72 = vector.broadcast %c16_i32 : i32 to vector<288x1xi32>
    %73 = arith.cmpi slt, %71, %72 : vector<288x1xi32>
    %cst_51 = arith.constant 0.000000e+00 : f32
    %74 = vector.shape_cast %73 : vector<288x1xi1> to vector<288x1xi1>
    %75 = vector.broadcast %74 : vector<288x1xi1> to vector<288x128xi1>
    %76 = vector.broadcast %cst_51 : f32 to vector<288x128xf32>
    %77 = arith.select %75, %54, %76 : vector<288x128xi1>, vector<288x128xf32>
    %78 = arith.truncf %77 : vector<288x128xf32> to vector<288x128xbf16>
    %c0_52 = arith.constant 0 : index
    %c0_53 = arith.constant 0 : index
    %c0_54 = arith.constant 0 : index
    %79 = vector.load %arg3[%c0_52, %c0_53, %c0_54] : memref<1x288x128xbf16, #tpu.memory_space<vmem>>, vector<1x288x128xbf16>
    %80 = vector.shape_cast %79 : vector<1x288x128xbf16> to vector<288x128xbf16>
    %81 = vector.shape_cast %78 : vector<288x128xbf16> to vector<1x288x128xbf16>
    tpu.vector_store %arg3[%c0_52, %c0_53, %c0_54], %81 {strides = array<i32>} : memref<1x288x128xbf16, #tpu.memory_space<vmem>>, vector<1x288x128xbf16>,
    %cst_55 = arith.constant dense<0.000000e+00> : vector<128xf32>
    %82 = vector.multi_reduction <add>, %77, %cst_55 [0] : vector<288x128xf32> to vector<128xf32>
    %83 = vector.shape_cast %82 : vector<128xf32> to vector<1x128xf32>
    %c0_56 = arith.constant 0 : index
    %c0_57 = arith.constant 0 : index
    %c0_58 = arith.constant 0 : index
    %84 = vector.load %arg4[%c0_56, %c0_57, %c0_58] : memref<1x1x128xf32, #tpu.memory_space<vmem>>, vector<1x1x128xf32>
    %85 = vector.shape_cast %84 : vector<1x1x128xf32> to vector<1x128xf32>
    %86 = vector.shape_cast %83 : vector<1x128xf32> to vector<1x1x128xf32>
    tpu.vector_store %arg4[%c0_56, %c0_57, %c0_58], %86 {strides = array<i32>} : memref<1x1x128xf32, #tpu.memory_space<vmem>>, vector<1x1x128xf32>,
    %87 = arith.mulf %77, %77 : vector<288x128xf32>
    %cst_59 = arith.constant dense<0.000000e+00> : vector<128xf32>
    %88 = vector.multi_reduction <add>, %87, %cst_59 [0] : vector<288x128xf32> to vector<128xf32>
    %89 = vector.shape_cast %88 : vector<128xf32> to vector<1x128xf32>
    %c0_60 = arith.constant 0 : index
    %c0_61 = arith.constant 0 : index
    %c0_62 = arith.constant 0 : index
    %90 = vector.load %arg5[%c0_60, %c0_61, %c0_62] : memref<1x1x128xf32, #tpu.memory_space<vmem>>, vector<1x1x128xf32>
    %91 = vector.shape_cast %90 : vector<1x1x128xf32> to vector<1x128xf32>
    %92 = vector.shape_cast %89 : vector<1x128xf32> to vector<1x1x128xf32>
    tpu.vector_store %arg5[%c0_60, %c0_61, %c0_62], %92 {strides = array<i32>} : memref<1x1x128xf32, #tpu.memory_space<vmem>>, vector<1x1x128xf32>,
    return
  }
  func.func @transform_0(%arg0: i32) -> (i32, i32, i32) {
    %c0_i32 = arith.constant 0 : i32
    %c0_i32_0 = arith.constant 0 : i32
    %c0_i32_1 = arith.constant 0 : i32
    return %arg0, %c0_i32, %c0_i32_0 : i32, i32, i32
  }
  func.func @transform_1(%arg0: i32) -> (i32, i32, i32) {
    %c0_i32 = arith.constant 0 : i32
    %c0_i32_0 = arith.constant 0 : i32
    %c0_i32_1 = arith.constant 0 : i32
    %c0_i32_2 = arith.constant 0 : i32
    return %c0_i32, %c0_i32_0, %c0_i32_1 : i32, i32, i32
  }
  func.func @transform_2(%arg0: i32) -> (i32, i32, i32) {
    %c0_i32 = arith.constant 0 : i32
    %c0_i32_0 = arith.constant 0 : i32
    %c0_i32_1 = arith.constant 0 : i32
    return %arg0, %c0_i32, %c0_i32_0 : i32, i32, i32
  }
  func.func @transform_3(%arg0: i32) -> (i32, i32, i32) {
    %c0_i32 = arith.constant 0 : i32
    %c0_i32_0 = arith.constant 0 : i32
    %c0_i32_1 = arith.constant 0 : i32
    return %arg0, %c0_i32, %c0_i32_0 : i32, i32, i32
  }
  func.func @transform_4(%arg0: i32) -> (i32, i32, i32) {
    %c0_i32 = arith.constant 0 : i32
    %c0_i32_0 = arith.constant 0 : i32
    %c0_i32_1 = arith.constant 0 : i32
    return %arg0, %c0_i32, %c0_i32_0 : i32, i32, i32
  }
}

</mosaic_0001>

<bundles_post_ra>
// kernel: dense_layer_forward.1
= control target key start
LH: loop header
LB: loop body
LE: loop exit
PB: predicated region body
PF: predicated region fallthrough
CT: control target
= control target key end

     0   :  { %s5280_s15 = smov 0   ;;  %s7170_s0 = inlined_call_operand.vmem [shape: bf16[2,342,4], index: 0, kind: input, shape index: {}]   ;;  %s7171_s1 = inlined_call_operand.vmem [shape: bf16[9,4,128], index: 1, kind: input, shape index: {}]   ;;  %s7172_s2 = inlined_call_operand.vmem [shape: bf16[2,288,128], index: 2, kind: output, shape index: {0}]   ;;  %s7173_s3 = inlined_call_operand.vmem [shape: f32[2,1,128], index: 3, kind: output, shape index: {1}]   ;;  %s7174_s4 = inlined_call_operand.vmem [shape: f32[2,1,128], index: 4, kind: output, shape index: {2}]  }
   0x1 LB: > { %s4664_s16 = sadd.s32 4294967295, %s5252_s15   ;;  %p4668_p0 = scmp.ge.s32.totalorder %s5252_s15, 1  ;;  %s5252_s15 = sphi %s5280_s15, %s15_s15  }
   0x2   : > { %p167_p1 = scmp.lt.s32.totalorder %s5252_s15, 3 }
   0x4   : > { %p168_p2 = pnand %p4668_p0, %p167_p1 }
   0x6   : > { %171 = sbr.rel (%p168_p2) target bundleno = 872 (0x368), region = 28 }
   0xb   : > { %v4671_v0 = vld [vmem:[%s7171_s1 + $0x2] sm:$0x3]  ;;  %vm553_vm0 = vcmask 1041408   ;;  %p199_p3 = scmp.lt.s32.totalorder %s4664_s16, 1  ;;  %v4776_v2 = vld [vmem:[%s7171_s1 + $0x4] sm:$0x3] }
   0xc   : > { %v555_v1 = vsel %vm553_vm0, %v4671_v0, 0  ;;  %v252_v3 = vld [vmem:[%s7171_s1] sm:$0x3]  ;;  %v893_v4 = vsel %vm553_vm0, %v4776_v2, 0  ;;  %v4882_v6 = vld [vmem:[%s7171_s1 + $0x8] sm:$0x3] }
   0xd   : > { %5212 = vmatpush.bf16.msra.mxu1 %v555_v1  ;;  %5213 = vmatpush.bf16.msra.mxu2 %v555_v1  ;;  %s7318_s16 = smov (!%p199_p3, %s4664_s16), 1  ;;  %v693_v5 = vsel %vm553_vm0, %v252_v3, 0  ;;  %v1623_v7 = vsel %vm553_vm0, %v4882_v6, 0  ;;  %vm349_vm1 = vsmask.f32 7424  ;;  %vm498_vm2 = vcmask 31744  }
   0xe   : > { %564 = vmatpush.bf16.msra.mxu0 %v555_v1  ;;  %s5215_s25 = smul.u32 172, %s7318_s16  ;;  %5214 = vmatpush.bf16.msra.mxu3 %v555_v1  ;;  %v4795_v45 = vld [vmem:[%s7171_s1 + $0x6] sm:$0x3]  ;;  %vm800_vm3 = vcmask 1046528   ;;  %vm1397_vm4 = vsmask.f32 6400  ;;  %s211_s21 = scalar_lea.vmem %s7173_s3, %s7318_s16 }
   0xf   : > { %v1254_v53 = vsel %vm553_vm0, %v4795_v45, 0  ;;  %vm2363_vm5 = vsmask.f32 5376  ;;  %vm1766_vm6 = vcmask 1045504   ;;  %vm2732_vm7 = vcmask 1044480   ;;  %s5216_s13 = smul.u32 144, %s7318_s16  ;;  %s214_s24 = scalar_lea.vmem %s7174_s4, %s7318_s16 }
  0x10   : > { %s5310_s28 = scalar_lea.vmem %s7170_s0, %s5215_s25 }
  0x11   : > { %902 = vmatpush.bf16.msrb.mxu2 %v893_v4  ;;  %702 = vmatpush.bf16.msrb.mxu1 %v693_v5  ;;  %v5313_v8 = vld [vmem:[%s5310_s28 + $0x28] sm:$0xff]  ;;  %v5316_v9 = vld [vmem:[%s5310_s28 + $0x30] sm:$0xff]  ;;  %v5322_v11 = vld [vmem:[%s5310_s28 + $0x58] sm:$0xff]  ;;  %s6420_s18 = scalar_lea.vmem %s7172_s2, %s5216_s13 }
  0x12   : > { %1632 = vmatpush.bf16.msrb.mxu0 %v1623_v7  ;;  %v5319_v10 = vld [vmem:[%s5310_s28 + $0x50] sm:$0xff]  ;;  %v5325_v12 = vld [vmem:[%s5310_s28] sm:$0xff]   ;;  %v5328_v13 = vld [vmem:[%s5310_s28 + $0x8] sm:$0xff]  ;;  %v390_v14 = vshll.u32 %v5313_v8, 16  ;;  %v394_v15 = vshrl.u32 %v5313_v8, 16  ;;  %v398_v16 = vshll.u32 %v5316_v9, 16  ;;  %1263 = vmatpush.bf16.msrb.mxu3 %v1254_v53 }
  0x13   : > { %v430_v17 = vshll.u32 %v5319_v10, 16  ;;  %v434_v18 = vshrl.u32 %v5319_v10, 16  ;;  %v438_v19 = vshll.u32 %v5322_v11, 16  ;;  %v351_v20 = vshrl.u32 %v5325_v12, 16  ;;  %v5346_v31 = vld [vmem:[%s5310_s28 + $0x78] sm:$0xff]  ;;  %v5062_v32 = vld [vmem:[%s5310_s28 + $0x80] sm:$0xff] }
  0x14   : > { %v353_v21 = vshll.u32 %v5325_v12, 16  ;;  %v5338_v22 = vrot.slane %v390_v14, 1  ;;  %v400_v23 = vrot.slane %v398_v16, 1  ;;  %v358_v25 = vshll.u32 %v5328_v13, 16  ;;  %v5355_v37 = vld [vmem:[%s5310_s28 + $0x38] sm:$0xff]  ;;  %v5359_v38 = vld [vmem:[%s5310_s28 + $0x60] sm:$0xff] }
  0x15   : > { %v5340_v24 = vrot.slane %v430_v17, 1  ;;  %v440_v26 = vrot.slane %v438_v19, 1  ;;  %v470_v39 = vshll.u32 %v5346_v31, 16  ;;  %v474_v40 = vshrl.u32 %v5346_v31, 16  ;;  %v5364_v42 = vld [vmem:[%s5310_s28 + $0x10] sm:$0xff]  ;;  %v5063_v59 = vld [vmem:[%s5310_s28 + $0x88] sm:$0xff] }
  0x16   : > { %v355_v27 = vrot.slane %v353_v21, 1  ;;  %v396_v28 = vor.u32 %v394_v15, %v5338_v22  ;;  %v360_v30 = vrot.slane %v358_v25, 1  ;;  %v478_v41 = vshll.u32 %v5062_v32, 16  ;;  %v5383_v60 = vld [vmem:[%s5310_s28 + $0x48] sm:$0xff]  ;;  %v5392_v5 = vld [vmem:[%s5310_s28 + $0x40] sm:$0xff]  ;;  %v5400_v17 = vld [vmem:[%s5310_s28 + $0x18] sm:$0xff] }
  0x17   : > { %v436_v29 = vor.u32 %v434_v18, %v5340_v24  ;;  %v5366_v43 = vrot.slane %v470_v39, 1  ;;  %v402_v46 = vshrl.u32 %v5316_v9, 16  ;;  %v406_v47 = vshll.u32 %v5355_v37, 16  ;;  %v5395_v6 = vld [vmem:[%s5310_s28 + $0x68] sm:$0xff]  ;;  %v253_v18 = vld [vmem:[%s5310_s28 + $0x90] sm:$0x1] }
  0x18   : > { %v356_v33 = vor.u32 %v355_v27, %v351_v20  ;;  %v401_v34 = vsel %vm349_vm1, %v396_v28, %v400_v23  ;;  %v480_v44 = vrot.slane %v478_v41, 1  ;;  %v442_v48 = vshrl.u32 %v5322_v11, 16  ;;  %v5409_v27 = vld [vmem:[%s5310_s28 + $0x20] sm:$0xff] }
  0x19   : > { %v441_v35 = vsel %vm349_vm1, %v436_v29, %v440_v26  ;;  %4745 = vmatmul.msk.bf16.vlgmr.msra.gmra.mxu1 %vm498_vm2, %v401_v34  ;;  %v446_v49 = vshll.u32 %v5359_v38, 16  ;;  %v476_v50 = vor.u32 %v474_v40, %v5366_v43  ;;  %v362_v51 = vshrl.u32 %v5328_v13, 16 }
  0x1a   : > { %4750 = vmatmul.msk.bf16.vlgmr.msra.gmra.mxu2 %vm498_vm2, %v441_v35  ;;  %v361_v36 = vsel %vm349_vm1, %v356_v33, %v360_v30  ;;  %v366_v52 = vshll.u32 %v5364_v42, 16  ;;  %v404_v55 = vor.u32 %v402_v46, %v400_v23  ;;  %v408_v56 = vrot.slane %v406_v47, 1 }
  0x1b   : > { %4740 = vmatmul.msk.bf16.vlgmr.msra.gmra.mxu0 %vm498_vm2, %v361_v36  ;;  %v481_v54 = vsel %vm349_vm1, %v476_v50, %v480_v44  ;;  %v444_v57 = vor.u32 %v442_v48, %v440_v26  ;;  %v448_v58 = vrot.slane %v446_v49, 1  ;;  %v364_v61 = vor.u32 %v362_v51, %v360_v30 }
  0x1c   : > { %4755 = vmatmul.msk.bf16.vlgmr.msra.gmra.mxu3 %vm498_vm2, %v481_v54  ;;  %v368_v62 = vrot.slane %v366_v52, 1  ;;  %v409_v63 = vsel %vm349_vm1, %v404_v55, %v408_v56  ;;  %v482_v1 = vshrl.u32 %v5062_v32, 16  ;;  %v486_v2 = vshll.u32 %v5063_v59, 16  ;;  %v5430_v52 = vld [vmem:[%s5310_s28 + $0x70] sm:$0xff] }
  0x1d   : > { %v449_v0 = vsel %vm349_vm1, %v444_v57, %v448_v58  ;;  %v422_v3 = vshll.u32 %v5383_v60, 16  ;;  %v426_v16 = vshrl.u32 %v5383_v60, 16  ;;  %v410_v20 = vshrl.u32 %v5355_v37, 16 }
  0x1e   : > { %v369_v4 = vsel %vm349_vm1, %v364_v61, %v368_v62  ;;  %v484_v7 = vor.u32 %v482_v1, %v480_v44  ;;  %v488_v14 = vrot.slane %v486_v2, 1  ;;  %v414_v21 = vshll.u32 %v5392_v5, 16 }
  0x1f   : > { %v424_v15 = vrot.slane %v422_v3, 1  ;;  %v450_v23 = vshrl.u32 %v5359_v38, 16  ;;  %v454_v25 = vshll.u32 %v5395_v6, 16  ;;  %v329_v28 = vunpack.c.l.b16 %v253_v18 }
  0x20   : > { %v489_v26 = vsel %vm349_vm1, %v484_v7, %v488_v14  ;;  %v370_v30 = vshrl.u32 %v5364_v42, 16  ;;  %v374_v32 = vshll.u32 %v5400_v17, 16  ;;  %v412_v33 = vor.u32 %v410_v20, %v408_v56  ;;  %v5064_v7 = vld [vmem:[%s5310_s28 + $0x10] sm:$0xff] }
  0x21   : > { %v428_v19 = vor.u32 %v426_v16, %v424_v15  ;;  %v416_v34 = vrot.slane %v414_v21, 1  ;;  %v452_v35 = vor.u32 %v450_v23, %v448_v58  ;;  %v456_v36 = vrot.slane %v454_v25, 1  ;;  %v4920_v21 = vld [vmem:[%s7171_s1 + $0xc] sm:$0x3]  ;;  %v5007_v25 = vld [vmem:[%s7171_s1 + $0xe] sm:$0x3] }
  0x22   : > { %v382_v39 = vshll.u32 %v5409_v27, 16  ;;  %v5419_v40 = vpack.c.b16 %v329_v28, %v329_v28  ;;  %v372_v41 = vor.u32 %v370_v30, %v368_v62  ;;  %v376_v44 = vrot.slane %v374_v32, 1  ;;  %v1030_v62 = vld [vmem:[%s5310_s28 + $0x8] sm:$0xe]  ;;  %v5026_v32 = vld [vmem:[%s7171_s1 + $0x10] sm:$0x3] }
  0x23   : > { %v5413_v29 = vsel %vm349_vm1, %v428_v19, %v5340_v24  ;;  %v417_v24 = vsel %vm349_vm1, %v412_v33, %v416_v34  ;;  %v457_v45 = vsel %vm349_vm1, %v452_v35, %v456_v36  ;;  %v490_v47 = vshrl.u32 %v5063_v59, 16 }
  0x24   : > { %v384_v46 = vrot.slane %v382_v39, 1  ;;  %v494_v48 = vshll.u32 %v5419_v40, 16  ;;  %v386_v49 = vshrl.u32 %v5409_v27, 16  ;;  %v377_v50 = vsel %vm349_vm1, %v372_v41, %v376_v44  ;;  %v5065_v41 = vld [vmem:[%s5310_s28 + $0x18] sm:$0xff] }
  0x25   : > { %v492_v53 = vor.u32 %v490_v47, %v488_v14  ;;  %v418_v56 = vshrl.u32 %v5392_v5, 16  ;;  %v458_v57 = vshrl.u32 %v5395_v6, 16  ;;  %v462_v58 = vshll.u32 %v5430_v52, 16 }
  0x26   : > { %v388_v51 = vor.u32 %v386_v49, %v384_v46  ;;  %v496_v54 = vrot.slane %v494_v48, 1  ;;  %v378_v61 = vshrl.u32 %v5400_v17, 16  ;;  %v1106_v3 = vunpack.c.l.b16 %v1030_v62 }
  0x27   : > { %v460_v1 = vor.u32 %v458_v57, %v456_v36  ;;  %v464_v2 = vrot.slane %v462_v58, 1  ;;  %v1163_v20 = vrot.slane %v5064_v7, 1  ;;  %v2589_v28 = vsel %vm553_vm0, %v5007_v25, 0 }
  0x28   : > { %v393_v55 = vsel %vm349_vm1, %v388_v51, %v5338_v22  ;;  %v497_v59 = vsel %vm349_vm1, %v492_v53, %v496_v54  ;;  %2598 = vmatpush.bf16.msra.mxu3 %v2589_v28  ;;  %v2825_v33 = vsel %vm553_vm0, %v5026_v32, 0  ;;  %v1407_v48 = vshrl.u32 %v5064_v7, 16 }
  0x29   : > { %4746 = vmatmul.msk.bf16.gmra.mxu1 %vm498_vm2, %v409_v63  ;;  %v5441_v63 = vld [vmem:[%s5310_s28 + $0xc] sm:$0xf]  ;;  %v465_v16 = vsel %vm349_vm1, %v460_v1, %v464_v2  ;;  %2834 = vmatpush.bf16.msra.mxu0 %v2825_v33  ;;  %v1410_v49 = vshll.u32 %v5064_v7, 16  ;;  %v1416_v1 = vshrl.u32 %v5065_v41, 16  ;;  %v806_v28 = vrot.slane %v5400_v17, 1  ;;  %v5068_v33 = vld [vmem:[%s5310_s28 + $0x30] sm:$0xff] }
  0x2a   : > { %4751 = vmatmul.msk.bf16.gmra.mxu2 %vm498_vm2, %v449_v0  ;;  %v420_v0 = vor.u32 %v418_v56, %v416_v34  ;;  %v7175_v22 = vunpack.c.l.b16 %v5441_v63  ;;  %v466_v34 = vshrl.u32 %v5430_v52, 16  ;;  %v1409_v54 = vrot.slane %v1407_v48, 1 }
  0x2b   : > { %4741 = vmatmul.msk.bf16.gmra.mxu0 %vm498_vm2, %v369_v4  ;;  %v380_v4 = vor.u32 %v378_v61, %v376_v44  ;;  %v5192_v44 = vld [vmem:[%s5310_s28] sm:$0xf0]  ;;  %v1412_v56 = vrot.slane %v1410_v49, 2 }
  0x2c   : > { %4756 = vmatmul.msk.bf16.gmra.mxu3 %vm498_vm2, %v489_v26  ;;  %v425_v14 = vsel %vm349_vm1, %v420_v0, %v424_v15  ;;  %v1143_v18 = vpack.c.b16 %v7175_v22, %v1106_v3  ;;  %v2220_v15 = vsel %vm553_vm0, %v4920_v21, 0  ;;  %v4901_v26 = vld [vmem:[%s7171_s1 + $0xa] sm:$0x3]  ;;  %v468_v36 = vor.u32 %v466_v34, %v464_v2  ;;  %v5066_v61 = vld [vmem:[%s5310_s28 + $0x20] sm:$0xff] }
  0x2d   : > { %v385_v19 = vsel %vm349_vm1, %v380_v4, %v384_v46  ;;  %2229 = vmatpush.bf16.msra.mxu2 %v2220_v15  ;;  %v1859_v30 = vsel %vm553_vm0, %v4901_v26, 0  ;;  %v1413_v58 = vor.u32 %v1412_v56, %v1409_v54  ;;  %v1167_v0 = vrot.slane %v5066_v61, 1  ;;  %v5074_v22 = vld [vmem:[%s5310_s28 + $0x60] sm:$0xff] }
  0x2e   : > { %v1162_v23 = vrot.slane %v1143_v18, 1  ;;  %1868 = vmatpush.bf16.msra.mxu1 %v1859_v30  ;;  %v473_v39 = vsel %vm349_vm1, %v468_v36, %v5366_v43  ;;  %v1399_v46 = vshrl.u32 %v1143_v18, 16  ;;  %v1402_v47 = vshll.u32 %v1143_v18, 16 }
  0x2f   : > { %v1419_v2 = vshll.u32 %v5065_v41, 16  ;;  %v1418_v4 = vrot.slane %v1416_v1, 1  ;;  %v1425_v21 = vshrl.u32 %v5066_v61, 16  ;;  %v1171_v34 = vrot.slane %v5068_v33, 1  ;;  %v5070_v1 = vld [vmem:[%s5310_s28 + $0x40] sm:$0xff] }
  0x30   : > { %v1164_v35 = vsel %vm800_vm3, %v1162_v23, %v1163_v20  ;;  %v1401_v43 = vrot.slane %v1399_v46, 1  ;;  %v1404_v53 = vrot.slane %v1402_v47, 2  ;;  %v1428_v23 = vshll.u32 %v5066_v61, 16  ;;  %v5069_v47 = vld [vmem:[%s5310_s28 + $0x38] sm:$0xff] }
  0x31   : > { %v1421_v7 = vrot.slane %v1419_v2, 2  ;;  %v1427_v25 = vrot.slane %v1425_v21, 1 }
  0x32   : > { %v1405_v57 = vor.u32 %v1404_v53, %v1401_v43  ;;  %v1430_v26 = vrot.slane %v1428_v23, 2  ;;  %v1446_v43 = vshll.u32 %v5068_v33, 16  ;;  %v812_v23 = vrot.slane %v5316_v9, 1 }
  0x34   : > { %v1414_v62 = vsel %vm1397_vm4, %v1405_v57, %v1413_v58  ;;  %v1431_v30 = vor.u32 %v1430_v26, %v1427_v25  ;;  %v1448_v57 = vrot.slane %v1446_v43, 2 }
  0x39   : > { %4747 = vmatmul.msk.bf16.gmra.mxu1 %vm498_vm2, %v417_v24  ;;  %v1165_v24 = vrot.slane %v5065_v41, 1 }
  0x3a   : > { %4752 = vmatmul.msk.bf16.gmra.mxu2 %vm498_vm2, %v457_v45  ;;  %v5193_v45 = vld [vmem:[%s5310_s28] sm:$0xe] }
  0x3b   : > { %4742 = vmatmul.msk.bf16.gmra.mxu0 %vm498_vm2, %v377_v50  ;;  %v5194_v50 = vor.u32 %v5193_v45, %v5192_v44  ;;  %v1166_v51 = vsel %vm800_vm3, %v1163_v20, %v1165_v24  ;;  %v1168_v3 = vsel %vm800_vm3, %v1165_v24, %v1167_v0  ;;  %v808_v24 = vrot.slane %v5409_v27, 1 }
  0x3c   : > { %4757 = vmatmul.msk.bf16.gmra.mxu3 %vm498_vm2, %v497_v59 }
  0x49   : > { %4748 = vmatmul.msk.bf16.gmra.mxu1 %vm498_vm2, %v425_v14  ;;  %v804_v14 = vrot.slane %v5364_v42, 1 }
  0x4a   : > { %4753 = vmatmul.msk.bf16.gmra.mxu2 %vm498_vm2, %v465_v16  ;;  %v1422_v16 = vor.u32 %v1421_v7, %v1418_v4  ;;  %v1175_v4 = vrot.slane %v5070_v1, 1  ;;  %v1452_v7 = vshrl.u32 %v5069_v47, 16 }
  0x4b   : > { %4743 = vmatmul.msk.bf16.gmra.mxu0 %vm498_vm2, %v385_v19  ;;  %v807_v32 = vsel %vm800_vm3, %v804_v14, %v806_v28 }
  0x4c   : > { %4864 = vmatmul.msk.bf16.vlgmr.msrb.gmra.mxu3 %vm498_vm2, %v1164_v35  ;;  %v1423_v19 = vsel %vm1397_vm4, %v1413_v58, %v1422_v16  ;;  %v1454_v21 = vrot.slane %v1452_v7, 1 }
  0x59   : > { %4749 = vmatmul.msk.bf16.gmra.mxu1 %vm498_vm2, %v5413_v29  ;;  %v801_v29 = vrot.slane %v5194_v50, 1  ;;  %v1173_v50 = vrot.slane %v5069_v47, 1 }
  0x5a   : > { %4754 = vmatmul.msk.bf16.gmra.mxu2 %vm498_vm2, %v473_v39 }
  0x5b   : > { %4744 = vmatmul.msk.bf16.gmra.mxu0 %vm498_vm2, %v393_v55  ;;  %v802_v55 = vrot.slane %v5328_v13, 1  ;;  %v1174_v56 = vsel %vm800_vm3, %v1171_v34, %v1173_v50 }
  0x5c   : > { %4865 = vmatmul.msk.bf16.gmra.mxu3 %vm498_vm2, %v1166_v51  ;;  %v1443_v51 = vshrl.u32 %v5068_v33, 16 }
  0x5d   : > { %v803_v59 = vsel %vm800_vm3, %v801_v29, %v802_v55  ;;  %v805_v18 = vsel %vm800_vm3, %v802_v55, %v804_v14  ;;  %v1455_v14 = vshll.u32 %v5069_v47, 16  ;;  %v814_v47 = vrot.slane %v5355_v37, 1 }
  0x5e   : > { %v1445_v55 = vrot.slane %v1443_v51, 1 }
  0x60   : > { %v1449_v58 = vor.u32 %v1448_v57, %v1445_v55  ;;  %v5072_v55 = vld [vmem:[%s5310_s28 + $0x50] sm:$0xff] }
  0x69   : > { %4758 = vmatmul.msk.bf16.vlgmr.msrb.gmra.mxu1 %vm498_vm2, %v5325_v12  ;;  %v5067_v12 = vld [vmem:[%s5310_s28 + $0x28] sm:$0xff] }
  0x6a   : > { %4777 = vmatmul.msk.bf16.vlgmr.msrb.gmra.mxu2 %vm498_vm2, %v803_v59  ;;  %v1169_v20 = vrot.slane %v5067_v12, 1  ;;  %v1434_v35 = vshrl.u32 %v5067_v12, 16  ;;  %v1437_v36 = vshll.u32 %v5067_v12, 16 }
  0x6b   : > { %4883 = vmatmul.msk.bf16.vlgmr.msrb.gmra.mxu0 %vm498_vm2, %v1414_v62 }
  0x6c   : > { %4866 = vmatmul.msk.bf16.gmra.mxu3 %vm498_vm2, %v1168_v3  ;;  %v1170_v15 = vsel %vm800_vm3, %v1167_v0, %v1169_v20  ;;  %v1172_v39 = vsel %vm800_vm3, %v1169_v20, %v1171_v34  ;;  %v1436_v41 = vrot.slane %v1434_v35, 1  ;;  %v1439_v44 = vrot.slane %v1437_v36, 2 }
  0x6d   : > { %v1461_v35 = vshrl.u32 %v5070_v1, 16  ;;  %v1464_v36 = vshll.u32 %v5070_v1, 16 }
  0x6e   : > { %v1440_v45 = vor.u32 %v1439_v44, %v1436_v41 }
  0x70   : > { %v1441_v49 = vsel %vm1397_vm4, %v1431_v30, %v1440_v45  ;;  %v1450_v3 = vsel %vm1397_vm4, %v1440_v45, %v1449_v58 }
  0x79   : > { %4759 = vmatmul.msk.bf16.gmra.mxu1 %vm498_vm2, %v5328_v13  ;;  %v1432_v13 = vsel %vm1397_vm4, %v1422_v16, %v1431_v30 }
  0x7a   : > { %4778 = vmatmul.msk.bf16.gmra.mxu2 %vm498_vm2, %v805_v18 }
  0x7b   : > { %4884 = vmatmul.msk.bf16.gmra.mxu0 %vm498_vm2, %v1423_v19  ;;  %v1176_v19 = vsel %vm800_vm3, %v1173_v50, %v1175_v4 }
  0x7c   : > { %4867 = vmatmul.msk.bf16.gmra.mxu3 %vm498_vm2, %v1170_v15 }
  0x89   : > { %4760 = vmatmul.msk.bf16.gmra.mxu1 %vm498_vm2, %v5364_v42  ;;  %v809_v42 = vsel %vm800_vm3, %v806_v28, %v808_v24 }
  0x8a   : > { %4779 = vmatmul.msk.bf16.gmra.mxu2 %vm498_vm2, %v807_v32  ;;  %v5071_v32 = vld [vmem:[%s5310_s28 + $0x48] sm:$0xff] }
  0x8b   : > { %4885 = vmatmul.msk.bf16.gmra.mxu0 %vm498_vm2, %v1432_v13  ;;  %v1177_v34 = vrot.slane %v5071_v32, 1  ;;  %v1473_v1 = vshll.u32 %v5071_v32, 16 }
  0x8c   : > { %4868 = vmatmul.msk.bf16.gmra.mxu3 %vm498_vm2, %v1172_v39 }
  0x96   : > { %v5515_v46 = vpop.f32.mrf.mxu1 }
  0x98   : > { %v5519_v48 = vpop.f32.mrf.mxu0 }
  0x99   : > { %4761 = vmatmul.msk.bf16.gmra.mxu1 %vm498_vm2, %v5400_v17  ;;  %v810_v17 = vrot.slane %v5313_v8, 1 }
  0x9a   : > { %4780 = vmatmul.msk.bf16.gmra.mxu2 %vm498_vm2, %v809_v42  ;;  %v1463_v42 = vrot.slane %v1461_v35, 1  ;;  %v5073_v35 = vld [vmem:[%s5310_s28 + $0x58] sm:$0xff] }
  0x9b   : > { %4886 = vmatmul.msk.bf16.gmra.mxu0 %vm498_vm2, %v1441_v49  ;;  %v811_v0 = vsel %vm800_vm3, %v808_v24, %v810_v17  ;;  %v813_v30 = vsel %vm800_vm3, %v810_v17, %v812_v23  ;;  %v1178_v24 = vsel %vm800_vm3, %v1175_v4, %v1177_v34 }
  0x9c   : > { %4869 = vmatmul.msk.bf16.gmra.mxu3 %vm498_vm2, %v1174_v56  ;;  %v815_v56 = vsel %vm800_vm3, %v812_v23, %v814_v47 }
  0x9d   : > { %v5526_v53 = vpop.f32.mrf.mxu2 }
  0x9e   : > { %v5528_v54 = vpop.f32.mrf.mxu1 }
  0x9f   : > { %v5537_v61 = vpop.f32.mrf.mxu3 }
  0xa0   : > { %v5531_v29 = vpop.f32.mrf.mxu0  ;;  %7184 = vst [vmem:[#allocation2_spill] sm:$0xff] %v5537_v61 }
  0xa5   : > { %v5535_v59 = vpop.f32.mrf.mxu2 }
  0xa6   : > { %v5539_v62 = vpop.f32.mrf.mxu1 }
  0xa7   : > { %v5552_v18 = vpop.f32.mrf.mxu3 }
  0xa8   : > { %v5543_v2 = vpop.f32.mrf.mxu0  ;;  %7185 = vst [vmem:[#allocation3_spill] sm:$0xff] %v5552_v18 }
  0xa9   : > { %4762 = vmatmul.msk.bf16.gmra.mxu1 %vm498_vm2, %v5409_v27  ;;  %v1457_v27 = vrot.slane %v1455_v14, 2 }
  0xaa   : > { %4781 = vmatmul.msk.bf16.gmra.mxu2 %vm498_vm2, %v811_v0  ;;  %v1470_v0 = vshrl.u32 %v5071_v32, 16 }
  0xab   : > { %4887 = vmatmul.msk.bf16.gmra.mxu0 %vm498_vm2, %v1450_v3  ;;  %v1458_v15 = vor.u32 %v1457_v27, %v1454_v21  ;;  %v816_v27 = vrot.slane %v5392_v5, 1 }
  0xac   : > { %4870 = vmatmul.msk.bf16.gmra.mxu3 %vm498_vm2, %v1176_v19  ;;  %v1472_v21 = vrot.slane %v1470_v0, 1 }
  0xad   : > { %v5550_v16 = vpop.f32.mrf.mxu2  ;;  %v1459_v13 = vsel %vm1397_vm4, %v1449_v58, %v1458_v15  ;;  %v1179_v58 = vrot.slane %v5072_v55, 1 }
  0xae   : > { %v5554_v12 = vpop.f32.mrf.mxu1 }
  0xaf   : > { %v5563_v26 = vpop.f32.mrf.mxu3  ;;  %v1180_v14 = vsel %vm800_vm3, %v1177_v34, %v1179_v58 }
  0xb0   : > { %v5557_v20 = vpop.f32.mrf.mxu0  ;;  %7186 = vst [vmem:[#allocation4_spill] sm:$0xff] %v5563_v26 }
  0xb5   : > { %v5561_v25 = vpop.f32.mrf.mxu2 }
  0xb6   : > { %v5565_v28 = vpop.f32.mrf.mxu1 }
  0xb7   : > { %v5578_v41 = vpop.f32.mrf.mxu3 }
  0xb8   : > { %v5569_v33 = vpop.f32.mrf.mxu0  ;;  %7187 = vst [vmem:[#allocation5_spill] sm:$0xff] %v5578_v41 }
  0xb9   : > { %4763 = vmatmul.msk.bf16.gmra.mxu1 %vm498_vm2, %v5313_v8  ;;  %v1466_v8 = vrot.slane %v1464_v36, 2 }
  0xba   : > { %4782 = vmatmul.msk.bf16.gmra.mxu2 %vm498_vm2, %v813_v30 }
  0xbb   : > { %4888 = vmatmul.msk.bf16.gmra.mxu0 %vm498_vm2, %v1459_v13  ;;  %v1467_v49 = vor.u32 %v1466_v8, %v1463_v42  ;;  %v817_v13 = vsel %vm800_vm3, %v814_v47, %v816_v27  ;;  %v1479_v42 = vshrl.u32 %v5072_v55, 16  ;;  %v1482_v8 = vshll.u32 %v5072_v55, 16 }
  0xbc   : > { %4871 = vmatmul.msk.bf16.gmra.mxu3 %vm498_vm2, %v1178_v24  ;;  %v1181_v24 = vrot.slane %v5073_v35, 1 }
  0xbd   : > { %v5576_v39 = vpop.f32.mrf.mxu2  ;;  %v1468_v17 = vsel %vm1397_vm4, %v1458_v15, %v1467_v49 }
  0xbe   : > { %v5580_v44 = vpop.f32.mrf.mxu1  ;;  %v1182_v0 = vsel %vm800_vm3, %v1179_v58, %v1181_v24  ;;  %v1183_v58 = vrot.slane %v5074_v22, 1 }
  0xbf   : > { %v5589_v51 = vpop.f32.mrf.mxu3 }
  0xc0   : > { %v5583_v45 = vpop.f32.mrf.mxu0  ;;  %7188 = vst [vmem:[#allocation6_spill] sm:$0xff] %v5589_v51  ;;  %v1184_v26 = vsel %vm800_vm3, %v1181_v24, %v1183_v58  ;;  %v5075_v24 = vld [vmem:[%s5310_s28 + $0x68] sm:$0xff] }
  0xc5   : > { %v5587_v50 = vpop.f32.mrf.mxu2 }
  0xc6   : > { %v5591_v43 = vpop.f32.mrf.mxu1 }
  0xc7   : > { %v5604_v4 = vpop.f32.mrf.mxu3 }
  0xc8   : > { %v5595_v57 = vpop.f32.mrf.mxu0  ;;  %7189 = vst [vmem:[#allocation7_spill] sm:$0xff] %v5604_v4 }
  0xc9   : > { %4764 = vmatmul.msk.bf16.gmra.mxu1 %vm498_vm2, %v5316_v9  ;;  %v1475_v9 = vrot.slane %v1473_v1, 2 }
  0xca   : > { %4783 = vmatmul.msk.bf16.gmra.mxu2 %vm498_vm2, %v815_v56 }
  0xcb   : > { %4889 = vmatmul.msk.bf16.gmra.mxu0 %vm498_vm2, %v1468_v17  ;;  %v1476_v23 = vor.u32 %v1475_v9, %v1472_v21 }
  0xcc   : > { %4872 = vmatmul.msk.bf16.gmra.mxu3 %vm498_vm2, %v1180_v14  ;;  %v1484_v14 = vrot.slane %v1482_v8, 2  ;;  %v1488_v8 = vshrl.u32 %v5073_v35, 16 }
  0xcd   : > { %v5602_v3 = vpop.f32.mrf.mxu2  ;;  %v1477_v34 = vsel %vm1397_vm4, %v1467_v49, %v1476_v23  ;;  %v1481_v49 = vrot.slane %v1479_v42, 1 }
  0xce   : > { %v5606_v7 = vpop.f32.mrf.mxu1  ;;  %v1490_v61 = vrot.slane %v1488_v8, 1 }
  0xcf   : > { %v1265_v30 = vpop.f32.mrf.mxu3  ;;  %v1485_v21 = vor.u32 %v1484_v14, %v1481_v49 }
  0xd0   : > { %v5609_v19 = vpop.f32.mrf.mxu0 }
  0xd1   : > { %v1486_v51 = vsel %vm1397_vm4, %v1476_v23, %v1485_v21 }
  0xd5   : > { %v5613_v15 = vpop.f32.mrf.mxu2 }
  0xd6   : > { %v5615_v32 = vpop.f32.mrf.mxu1 }
  0xd7   : > { %v1267_v17 = vpop.f32.mrf.mxu3 }
  0xd8   : > { %v5619_v36 = vpop.f32.mrf.mxu0 }
  0xd9   : > { %4765 = vmatmul.msk.bf16.gmra.mxu1 %vm498_vm2, %v5355_v37  ;;  %v818_v37 = vrot.slane %v5383_v60, 1 }
  0xda   : > { %4784 = vmatmul.msk.bf16.gmra.mxu2 %vm498_vm2, %v817_v13 }
  0xdb   : > { %4890 = vmatmul.msk.bf16.gmra.mxu0 %vm498_vm2, %v1477_v34  ;;  %v819_v34 = vsel %vm800_vm3, %v816_v27, %v818_v37 }
  0xdc   : > { %4873 = vmatmul.msk.bf16.gmra.mxu3 %vm498_vm2, %v1182_v0  ;;  %v1491_v0 = vshll.u32 %v5073_v35, 16 }
  0xdd   : > { %v5626_v56 = vpop.f32.mrf.mxu2 }
  0xde   : > { %7190 = vst [vmem:[#allocation8_spill] sm:$0xff] %v5626_v56  ;;  %v5628_v47 = vpop.f32.mrf.mxu1 }
  0xdf   : > { %v1270_v13 = vpop.f32.mrf.mxu3 }
  0xe0   : > { %v5631_v1 = vpop.f32.mrf.mxu0 }
  0xe5   : > { %v5635_v9 = vpop.f32.mrf.mxu2 }
  0xe6   : > { %7191 = vst [vmem:[#allocation9_spill] sm:$0xff] %v5635_v9  ;;  %v704_v55 = vpop.f32.mrf.mxu1 }
  0xe7   : > { %v705_v42 = vadd.f32 %v704_v55, %v5519_v48  ;;  %v1272_v14 = vpop.f32.mrf.mxu3 }
  0xe8   : > { %v1634_v4 = vpop.f32.mrf.mxu0 }
  0xe9   : > { %4766 = vmatmul.msk.bf16.gmra.mxu1 %vm498_vm2, %v5392_v5  ;;  %v1493_v5 = vrot.slane %v1491_v0, 2  ;;  %v1500_v0 = vshll.u32 %v5074_v22, 16 }
  0xea   : > { %4785 = vmatmul.msk.bf16.gmra.mxu2 %vm498_vm2, %v819_v34 }
  0xeb   : > { %4891 = vmatmul.msk.bf16.gmra.mxu0 %vm498_vm2, %v1486_v51  ;;  %v820_v51 = vrot.slane %v5319_v10, 1  ;;  %v1494_v35 = vor.u32 %v1493_v5, %v1490_v61 }
  0xec   : > { %4874 = vmatmul.msk.bf16.gmra.mxu3 %vm498_vm2, %v1184_v26 }
  0xed   : > { %v904_v49 = vpop.f32.mrf.mxu2  ;;  %v821_v56 = vsel %vm800_vm3, %v818_v37, %v820_v51  ;;  %v1495_v8 = vsel %vm1397_vm4, %v1485_v21, %v1494_v35 }
  0xee   : > { %v994_v41 = vadd.f32 %v904_v49, %v705_v42  ;;  %v706_v27 = vpop.f32.mrf.mxu1 }
  0xef   : > { %v707_v48 = vadd.f32 %v706_v27, %v5531_v29  ;;  %v1275_v9 = vpop.f32.mrf.mxu3  ;;  %v1185_v29 = vrot.slane %v5075_v24, 1 }
  0xf0   : > { %v1355_v23 = vadd.f32 %v1265_v30, %v994_v41  ;;  %v1636_v18 = vpop.f32.mrf.mxu0 }
  0xf1   : > { %v1186_v21 = vsel %vm800_vm3, %v1183_v58, %v1185_v29  ;;  %v5076_v58 = vld [vmem:[%s5310_s28 + $0x70] sm:$0xff] }
  0xf2   : > { %v5647_v34 = vadd.f32 %v1634_v4, %v1355_v23  ;;  %v1497_v4 = vshrl.u32 %v5074_v22, 16 }
  0xf5   : > { %v906_v55 = vpop.f32.mrf.mxu2 }
  0xf6   : > { %v995_v42 = vadd.f32 %v906_v55, %v707_v48  ;;  %v709_v49 = vpop.f32.mrf.mxu1  ;;  %v1499_v48 = vrot.slane %v1497_v4, 1  ;;  %v822_v55 = vrot.slane %v5322_v11, 1 }
  0xf7   : > { %v710_v61 = vadd.f32 %v709_v49, %v5543_v2  ;;  %v1277_v27 = vpop.f32.mrf.mxu3 }
  0xf8   : > { %v1356_v41 = vadd.f32 %v1267_v17, %v995_v42  ;;  %v1639_v30 = vpop.f32.mrf.mxu0 }
  0xf9   : > { %4767 = vmatmul.msk.bf16.gmra.mxu1 %vm498_vm2, %v5383_v60 }
  0xfa   : > { %4786 = vmatmul.msk.bf16.gmra.mxu2 %vm498_vm2, %v821_v56  ;;  %v5657_v26 = vadd.f32 %v1636_v18, %v1356_v41  ;;  %v1502_v56 = vrot.slane %v1500_v0, 2 }
  0xfb   : > { %4892 = vmatmul.msk.bf16.gmra.mxu0 %vm498_vm2, %v1495_v8 }
  0xfc   : > { %4875 = vmatmul.msk.bf16.gmra.mxu3 %vm498_vm2, %v1186_v21  ;;  %v1503_v22 = vor.u32 %v1502_v56, %v1499_v48 }
  0xfd   : > { %v909_v37 = vpop.f32.mrf.mxu2 }
  0xfe   : > { %v996_v17 = vadd.f32 %v909_v37, %v710_v61  ;;  %v711_v23 = vpop.f32.mrf.mxu1  ;;  %v823_v61 = vsel %vm800_vm3, %v820_v51, %v822_v55  ;;  %v1504_v4 = vsel %vm1397_vm4, %v1494_v35, %v1503_v22 }
  0xff   : > { %v712_v2 = vadd.f32 %v711_v23, %v5557_v20  ;;  %v1280_v49 = vpop.f32.mrf.mxu3  ;;  %v1187_v20 = vrot.slane %v5076_v58, 1  ;;  %v1509_v23 = vshll.u32 %v5075_v24, 16 }
 0x100   : > { %v1357_v5 = vadd.f32 %v1270_v13, %v996_v17  ;;  %v1641_v60 = vpop.f32.mrf.mxu0  ;;  %v1506_v17 = vshrl.u32 %v5075_v24, 16 }
 0x101   : > { %v1188_v35 = vsel %vm800_vm3, %v1185_v29, %v1187_v20  ;;  %v5077_v29 = vld [vmem:[%s5310_s28 + $0x78] sm:$0xff] }
 0x102   : > { %v5663_v18 = vadd.f32 %v1639_v30, %v1357_v5  ;;  %v1508_v56 = vrot.slane %v1506_v17, 1 }
 0x105   : > { %v911_v42 = vpop.f32.mrf.mxu2 }
 0x106   : > { %v997_v41 = vadd.f32 %v911_v42, %v712_v2  ;;  %v714_v8 = vpop.f32.mrf.mxu1  ;;  %v1511_v2 = vrot.slane %v1509_v23, 2  ;;  %v824_v42 = vrot.slane %v5359_v38, 1 }
 0x107   : > { %v715_v0 = vadd.f32 %v714_v8, %v5569_v33  ;;  %v1282_v21 = vpop.f32.mrf.mxu3 }
 0x108   : > { %v1358_v13 = vadd.f32 %v1272_v14, %v997_v41  ;;  %v1644_v37 = vpop.f32.mrf.mxu0  ;;  %v1512_v24 = vor.u32 %v1511_v2, %v1508_v56 }
 0x109   : > { %4768 = vmatmul.msk.bf16.gmra.mxu1 %vm498_vm2, %v5319_v10 }
 0x10a   : > { %4787 = vmatmul.msk.bf16.gmra.mxu2 %vm498_vm2, %v823_v61  ;;  %v5673_v30 = vadd.f32 %v1641_v60, %v1358_v13  ;;  %v1513_v17 = vsel %vm1397_vm4, %v1503_v22, %v1512_v24 }
 0x10b   : > { %4893 = vmatmul.msk.bf16.gmra.mxu0 %vm498_vm2, %v1504_v4  ;;  %v825_v4 = vsel %vm800_vm3, %v822_v55, %v824_v42 }
 0x10c   : > { %4876 = vmatmul.msk.bf16.gmra.mxu3 %vm498_vm2, %v1188_v35 }
 0x10d   : > { %v914_v51 = vpop.f32.mrf.mxu2 }
 0x10e   : > { %v998_v14 = vadd.f32 %v914_v51, %v715_v0  ;;  %v716_v5 = vpop.f32.mrf.mxu1  ;;  %v1515_v51 = vshrl.u32 %v5076_v58, 16 }
 0x10f   : > { %v717_v33 = vadd.f32 %v716_v5, %v5583_v45  ;;  %v1285_v8 = vpop.f32.mrf.mxu3  ;;  %v1189_v45 = vrot.slane %v5077_v29, 1 }
 0x110   : > { %v1359_v48 = vadd.f32 %v1275_v9, %v998_v14  ;;  %v1646_v10 = vpop.f32.mrf.mxu0  ;;  %v1518_v14 = vshll.u32 %v5076_v58, 16  ;;  %v1517_v56 = vrot.slane %v1515_v51, 1 }
 0x111   : > { %v1190_v22 = vsel %vm800_vm3, %v1187_v20, %v1189_v45  ;;  %v5078_v20 = vld [vmem:[%s5310_s28 + $0x80] sm:$0xff] }
 0x112   : > { %v5679_v60 = vadd.f32 %v1644_v37, %v1359_v48  ;;  %v1520_v2 = vrot.slane %v1518_v14, 2  ;;  %v1524_v14 = vshrl.u32 %v5077_v29, 16 }
 0x114   : > { %v1521_v58 = vor.u32 %v1520_v2, %v1517_v56  ;;  %v828_v2 = vrot.slane %v5430_v52, 1 }
 0x115   : > { %v916_v41 = vpop.f32.mrf.mxu2 }
 0x116   : > { %v999_v61 = vadd.f32 %v916_v41, %v717_v33  ;;  %v719_v13 = vpop.f32.mrf.mxu1  ;;  %v826_v33 = vrot.slane %v5395_v6, 1 }
 0x117   : > { %v720_v23 = vadd.f32 %v719_v13, %v5595_v57  ;;  %v1287_v5 = vpop.f32.mrf.mxu3 }
 0x118   : > { %v1360_v9 = vadd.f32 %v1277_v27, %v999_v61  ;;  %v1649_v0 = vpop.f32.mrf.mxu0 }
 0x119   : > { %4769 = vmatmul.msk.bf16.gmra.mxu1 %vm498_vm2, %v5322_v11 }
 0x11a   : > { %4788 = vmatmul.msk.bf16.gmra.mxu2 %vm498_vm2, %v825_v4  ;;  %v5689_v37 = vadd.f32 %v1646_v10, %v1360_v9  ;;  %v827_v9 = vsel %vm800_vm3, %v824_v42, %v826_v33 }
 0x11b   : > { %4894 = vmatmul.msk.bf16.gmra.mxu0 %vm498_vm2, %v1513_v17 }
 0x11c   : > { %4877 = vmatmul.msk.bf16.gmra.mxu3 %vm498_vm2, %v1190_v22 }
 0x11d   : > { %v919_v55 = vpop.f32.mrf.mxu2 }
 0x11e   : > { %v1000_v27 = vadd.f32 %v919_v55, %v720_v23  ;;  %v721_v35 = vpop.f32.mrf.mxu1  ;;  %v1522_v23 = vsel %vm1397_vm4, %v1512_v24, %v1521_v58  ;;  %v1527_v55 = vshll.u32 %v5077_v29, 16 }
 0x11f   : > { %v722_v57 = vadd.f32 %v721_v35, %v5609_v19  ;;  %v1290_v61 = vpop.f32.mrf.mxu3  ;;  %v1191_v19 = vrot.slane %v5078_v20, 1 }
 0x120   : > { %v1361_v48 = vadd.f32 %v1280_v49, %v1000_v27  ;;  %v1651_v11 = vpop.f32.mrf.mxu0  ;;  %v1529_v56 = vrot.slane %v1527_v55, 2  ;;  %v1536_v55 = vshll.u32 %v5078_v20, 16 }
 0x121   : > { %v1192_v24 = vsel %vm800_vm3, %v1189_v45, %v1191_v19  ;;  %v5079_v45 = vld [vmem:[%s5310_s28 + $0x88] sm:$0xff] }
 0x122   : > { %v5695_v10 = vadd.f32 %v1649_v0, %v1361_v48  ;;  %v1526_v48 = vrot.slane %v1524_v14, 1  ;;  %v1533_v14 = vshrl.u32 %v5078_v20, 16 }
 0x124   : > { %v1530_v29 = vor.u32 %v1529_v56, %v1526_v48  ;;  %v830_v48 = vrot.slane %v5346_v31, 1 }
 0x125   : > { %v921_v41 = vpop.f32.mrf.mxu2 }
 0x126   : > { %v1001_v13 = vadd.f32 %v921_v41, %v722_v57  ;;  %v724_v4 = vpop.f32.mrf.mxu1 }
 0x127   : > { %v725_v51 = vadd.f32 %v724_v4, %v5619_v36  ;;  %v1292_v27 = vpop.f32.mrf.mxu3 }
 0x128   : > { %v1362_v49 = vadd.f32 %v1282_v21, %v1001_v13  ;;  %v1654_v17 = vpop.f32.mrf.mxu0 }
 0x129   : > { %4770 = vmatmul.msk.bf16.gmra.mxu1 %vm498_vm2, %v5359_v38 }
 0x12a   : > { %4789 = vmatmul.msk.bf16.gmra.mxu2 %vm498_vm2, %v827_v9  ;;  %v5705_v0 = vadd.f32 %v1651_v11, %v1362_v49  ;;  %v829_v9 = vsel %vm800_vm3, %v826_v33, %v828_v2 }
 0x12b   : > { %4895 = vmatmul.msk.bf16.gmra.mxu0 %vm498_vm2, %v1522_v23  ;;  %v1531_v23 = vsel %vm1397_vm4, %v1521_v58, %v1530_v29 }
 0x12c   : > { %4878 = vmatmul.msk.bf16.gmra.mxu3 %vm498_vm2, %v1192_v24  ;;  %v1535_v24 = vrot.slane %v1533_v14, 1 }
 0x12d   : > { %v924_v42 = vpop.f32.mrf.mxu2 }
 0x12e   : > { %v1002_v21 = vadd.f32 %v924_v42, %v725_v51  ;;  %v726_v35 = vpop.f32.mrf.mxu1 }
 0x12f   : > { %v727_v36 = vadd.f32 %v726_v35, %v5631_v1  ;;  %v1295_v41 = vpop.f32.mrf.mxu3  ;;  %v1193_v1 = vrot.slane %v5079_v45, 1 }
 0x130   : > { %v1363_v22 = vadd.f32 %v1285_v8, %v1002_v21  ;;  %v1656_v38 = vpop.f32.mrf.mxu0 }
 0x131   : > { %v1194_v58 = vsel %vm800_vm3, %v1191_v19, %v1193_v1  ;;  %v5080_v19 = vld [vmem:[%s5310_s28 + $0x90] sm:$0xff] }
 0x132   : > { %v5711_v11 = vadd.f32 %v1654_v17, %v1363_v22  ;;  %v1538_v22 = vrot.slane %v1536_v55, 2 }
 0x134   : > { %v1539_v20 = vor.u32 %v1538_v22, %v1535_v24 }
 0x135   : > { %v926_v57 = vpop.f32.mrf.mxu2 }
 0x136   : > { %v1003_v13 = vadd.f32 %v926_v57, %v727_v36  ;;  %v729_v4 = vpop.f32.mrf.mxu1 }
 0x137   : > { %v730_v51 = vadd.f32 %v729_v4, %v5515_v46  ;;  %v1297_v42 = vpop.f32.mrf.mxu3  ;;  %v831_v4 = vsel %vm800_vm3, %v828_v2, %v830_v48  ;;  %v1542_v2 = vshrl.u32 %v5079_v45, 16 }
 0x138   : > { %v1364_v8 = vadd.f32 %v1287_v5, %v1003_v13  ;;  %v1659_v49 = vpop.f32.mrf.mxu0 }
 0x139   : > { %4771 = vmatmul.msk.bf16.gmra.mxu1 %vm498_vm2, %v5395_v6 }
 0x13a   : > { %4790 = vmatmul.msk.bf16.gmra.mxu2 %vm498_vm2, %v829_v9  ;;  %v5721_v17 = vadd.f32 %v1656_v38, %v1364_v8  ;;  %v1540_v8 = vsel %vm1397_vm4, %v1530_v29, %v1539_v20 }
 0x13b   : > { %4896 = vmatmul.msk.bf16.gmra.mxu0 %vm498_vm2, %v1531_v23  ;;  %v1545_v23 = vshll.u32 %v5079_v45, 16 }
 0x13c   : > { %4879 = vmatmul.msk.bf16.gmra.mxu3 %vm498_vm2, %v1194_v58  ;;  %v1066_v58 = vld [vmem:[%s5310_s28 + $0x98] sm:$0x1] }
 0x13d   : > { %v929_v33 = vpop.f32.mrf.mxu2 }
 0x13e   : > { %v1004_v5 = vadd.f32 %v929_v33, %v730_v51  ;;  %v731_v21 = vpop.f32.mrf.mxu1 }
 0x13f   : > { %v732_v46 = vadd.f32 %v731_v21, %v5528_v54  ;;  %v1300_v36 = vpop.f32.mrf.mxu3  ;;  %v1195_v54 = vrot.slane %v5080_v19, 1  ;;  %v1547_v21 = vrot.slane %v1545_v23, 2 }
 0x140   : > { %v1365_v35 = vadd.f32 %v1290_v61, %v1004_v5  ;;  %v1661_v6 = vpop.f32.mrf.mxu0  ;;  %v1544_v5 = vrot.slane %v1542_v2, 1  ;;  %v5227_v2 = vld [vmem:[%s5310_s28 + $0x78] sm:$0xff] }
 0x142   : > { %v5727_v38 = vadd.f32 %v1659_v49, %v1365_v35 }
 0x145   : > { %v931_v56 = vpop.f32.mrf.mxu2 }
 0x146   : > { %v1005_v57 = vadd.f32 %v931_v56, %v732_v46  ;;  %v734_v13 = vpop.f32.mrf.mxu1 }
 0x147   : > { %v735_v49 = vadd.f32 %v734_v13, %v5539_v62  ;;  %v5741_v51 = vpop.f32.mrf.mxu3  ;;  %v5749_v62 = vld [vmem:[%s5310_s28 + $0x80] sm:$0xff] }
 0x148   : > { %v1366_v61 = vadd.f32 %v1292_v27, %v1005_v57  ;;  %v1664_v9 = vpop.f32.mrf.mxu0  ;;  %v832_v45 = vrot.slane %v5749_v62, 1 }
 0x149   : > { %4772 = vmatmul.msk.bf16.gmra.mxu1 %vm498_vm2, %v5430_v52  ;;  %v1196_v52 = vsel %vm800_vm3, %v1193_v1, %v1195_v54  ;;  %v1548_v1 = vor.u32 %v1547_v21, %v1544_v5  ;;  %v5773_v21 = vld [vmem:[%s5310_s28 + $0x18] sm:$0xff] }
 0x14a   : > { %4791 = vmatmul.msk.bf16.gmra.mxu2 %vm498_vm2, %v831_v4  ;;  %v5737_v31 = vadd.f32 %v1661_v6, %v1366_v61  ;;  %v1142_v6 = vunpack.c.l.b16 %v1066_v58  ;;  %v833_v57 = vsel %vm800_vm3, %v830_v48, %v832_v45 }
 0x14b   : > { %4897 = vmatmul.msk.bf16.gmra.mxu0 %vm498_vm2, %v1540_v8  ;;  %v1996_v8 = vld [vmem:[%s5310_s28 + $0x10] sm:$0xc] }
 0x14c   : > { %4880 = vmatmul.msk.bf16.gmra.mxu3 %vm498_vm2, %v1196_v52  ;;  %v1161_v13 = vpack.c.b16 %v1142_v6, %v1142_v6  ;;  %v2072_v48 = vunpack.c.l.b16 %v1996_v8 }
 0x14d   : > { %v934_v27 = vpop.f32.mrf.mxu2 }
 0x14e   : > { %v1006_v29 = vadd.f32 %v934_v27, %v735_v49  ;;  %v736_v14 = vpop.f32.mrf.mxu1  ;;  %v5759_v49 = vld [vmem:[%s5310_s28 + $0x14] sm:$0xf]  ;;  %v1197_v23 = vrot.slane %v1161_v13, 1  ;;  %v1551_v27 = vshrl.u32 %v5080_v19, 16 }
 0x14f   : > { %v737_v24 = vadd.f32 %v736_v14, %v5554_v12  ;;  %v5753_v22 = vpop.f32.mrf.mxu3 }
 0x150   : > { %v1367_v55 = vadd.f32 %v1295_v41, %v1006_v29  ;;  %v1666_v33 = vpop.f32.mrf.mxu0  ;;  %v1554_v29 = vshll.u32 %v5080_v19, 16 }
 0x152   : > { %v5746_v35 = vadd.f32 %v1664_v9, %v1367_v55  ;;  %v1549_v9 = vsel %vm1397_vm4, %v1539_v20, %v1548_v1 }
 0x155   : > { %v936_v41 = vpop.f32.mrf.mxu2 }
 0x156   : > { %v1007_v46 = vadd.f32 %v936_v41, %v737_v24  ;;  %v739_v56 = vpop.f32.mrf.mxu1  ;;  %v1553_v41 = vrot.slane %v1551_v27, 1 }
 0x157   : > { %v740_v20 = vadd.f32 %v739_v56, %v5565_v28  ;;  %v5769_v52 = vpop.f32.mrf.mxu3  ;;  %v1391_v28 = vld [vmem:[%s5310_s28 + $0x98] sm:$0x3]  ;;  %v5781_v56 = vld [vmem:[%s5310_s28 + $0x88] sm:$0xff] }
 0x158   : > { %v1368_v4 = vadd.f32 %v1297_v42, %v1007_v46  ;;  %v1669_v61 = vpop.f32.mrf.mxu0  ;;  %v7176_v42 = vunpack.c.l.b16 %v5759_v49  ;;  %v1556_v46 = vrot.slane %v1554_v29, 2  ;;  %v834_v19 = vrot.slane %v5781_v56, 1 }
 0x159   : > { %4773 = vmatmul.msk.bf16.gmra.mxu1 %vm498_vm2, %v5227_v2  ;;  %v1395_v2 = vunpack.c.l.b16 %v1391_v28 }
 0x15a   : > { %4792 = vmatmul.msk.bf16.gmra.mxu2 %vm498_vm2, %v833_v57  ;;  %v5764_v12 = vadd.f32 %v1666_v33, %v1368_v4  ;;  %v1198_v33 = vsel %vm800_vm3, %v1195_v54, %v1197_v23  ;;  %v5777_v58 = vpack.c.b16 %v7176_v42, %v2072_v48  ;;  %v2373_v4 = vshrl.u32 %v5773_v21, 16 }
 0x15b   : > { %4898 = vmatmul.msk.bf16.gmra.mxu0 %vm498_vm2, %v1549_v9  ;;  %v1557_v8 = vor.u32 %v1556_v46, %v1553_v41  ;;  %v835_v27 = vsel %vm800_vm3, %v832_v45, %v834_v19 }
 0x15c   : > { %7192 = vst [vmem:[#allocation10_spill] sm:$0xff] %v5764_v12  ;;  %4881 = vmatmul.msk.bf16.gmra.mxu3 %vm498_vm2, %v1198_v33  ;;  %v2365_v54 = vshrl.u32 %v5777_v58, 16  ;;  %v2368_v13 = vshll.u32 %v5777_v58, 16  ;;  %v5797_v12 = vpack.c.b16 %v1395_v2, %v1395_v2  ;;  %v836_v2 = vrot.slane %v5419_v40, 1 }
 0x15d   : > { %v939_v14 = vpop.f32.mrf.mxu2 }
 0x15e   : > { %v1008_v55 = vadd.f32 %v939_v14, %v740_v20  ;;  %v741_v5 = vpop.f32.mrf.mxu1  ;;  %v2367_v29 = vrot.slane %v2365_v54, 2  ;;  %v2370_v14 = vrot.slane %v2368_v13, 3  ;;  %7194 = vst [vmem:[#allocation12_spill] sm:$0xff] %v5797_v12 }
 0x15f   : > { %v742_v9 = vadd.f32 %v741_v5, %v5580_v44  ;;  %v5792_v48 = vpop.f32.mrf.mxu3 }
 0x160   : > { %v1369_v6 = vadd.f32 %v1300_v36, %v1008_v55  ;;  %v1671_v24 = vpop.f32.mrf.mxu0  ;;  %v2376_v36 = vshll.u32 %v5773_v21, 16  ;;  %v2375_v55 = vrot.slane %v2373_v4, 2  ;;  %v2371_v45 = vor.u32 %v2370_v14, %v2367_v29 }
 0x162   : > { %v5785_v57 = vadd.f32 %v1669_v61, %v1369_v6  ;;  %v2378_v33 = vrot.slane %v2376_v36, 3 }
 0x164   : > { %7193 = vst [vmem:[#allocation11_spill] sm:$0xff] %v5785_v57  ;;  %v1558_v57 = vsel %vm1397_vm4, %v1548_v1, %v1557_v8  ;;  %v2379_v5 = vor.u32 %v2378_v33, %v2375_v55  ;;  %v1563_v1 = vshll.u32 %v5797_v12, 16  ;;  %v837_v33 = vsel %vm800_vm3, %v834_v19, %v836_v2  ;;  %v5842_v2 = vld [vmem:[%s5310_s28 + $0x28] sm:$0xff] }
 0x165   : > { %v941_v23 = vpop.f32.mrf.mxu2 }
 0x166   : > { %v1009_v20 = vadd.f32 %v941_v23, %v742_v9  ;;  %v744_v61 = vpop.f32.mrf.mxu1  ;;  %v2380_v13 = vsel %vm2363_vm5, %v2371_v45, %v2379_v5 }
 0x167   : > { %v745_v41 = vadd.f32 %v744_v61, %v5591_v43  ;;  %v5808_v28 = vpop.f32.mrf.mxu3  ;;  %v1565_v43 = vrot.slane %v1563_v1, 2  ;;  %v2726_v1 = vld [vmem:[%s5310_s28 + $0x10] sm:$0x8] }
 0x168   : > { %v1370_v6 = vadd.f32 %v5741_v51, %v1009_v20  ;;  %v1674_v42 = vpop.f32.mrf.mxu0  ;;  %v1560_v51 = vshrl.u32 %v5797_v12, 16 }
 0x169   : > { %4774 = vmatmul.msk.bf16.gmra.mxu1 %vm498_vm2, %v5749_v62 }
 0x16a   : > { %4793 = vmatmul.msk.bf16.gmra.mxu2 %vm498_vm2, %v835_v27  ;;  %v5802_v44 = vadd.f32 %v1671_v24, %v1370_v6  ;;  %v5812_v24 = vld [vmem:[%s5310_s28 + $0x20] sm:$0xff]  ;;  %v1562_v36 = vrot.slane %v1560_v51, 1  ;;  %v1760_v6 = vld [vmem:[%s5310_s28 + $0x8] sm:$0xc] }
 0x16b   : > { %4899 = vmatmul.msk.bf16.gmra.mxu0 %vm498_vm2, %v1558_v57  ;;  %v2382_v23 = vshrl.u32 %v5812_v24, 16  ;;  %v2385_v20 = vshll.u32 %v5812_v24, 16 }
 0x16c   : > { %5008 = vmatmul.msk.bf16.vlgmr.msra.gmra.mxu3 %vm498_vm2, %v2380_v13  ;;  %v1566_v61 = vor.u32 %v1565_v43, %v1562_v36 }
 0x16d   : > { %v944_v46 = vpop.f32.mrf.mxu2  ;;  %v2387_v45 = vrot.slane %v2385_v20, 3  ;;  %v7196_v20 = vunpack.c.l.b16 %v5759_v49 }
 0x16e   : > { %v1010_v54 = vadd.f32 %v944_v46, %v745_v41  ;;  %v746_v62 = vpop.f32.mrf.mxu1  ;;  %v1567_v51 = vsel %vm1397_vm4, %v1557_v8, %v1566_v61  ;;  %v5229_v61 = vld [vmem:[%s5310_s28 + $0x10] sm:$0xff] }
 0x16f   : > { %v747_v27 = vadd.f32 %v746_v62, %v5606_v7  ;;  %v1764_v7 = vunpack.c.l.b16 %v1760_v6  ;;  %v2734_v6 = vrot.slane %v5773_v21, 3 }
 0x170   : > { %v1371_v57 = vadd.f32 %v5753_v22, %v1010_v54  ;;  %v1676_v4 = vpop.f32.mrf.mxu0  ;;  %v5822_v22 = vpop.f32.mrf.mxu3 }
 0x172   : > { %v5816_v9 = vadd.f32 %v1674_v42, %v1371_v57  ;;  %v2384_v42 = vrot.slane %v2382_v23, 2  ;;  %v7195_v57 = vunpack.c.l.b16 %v5441_v63  ;;  %v2128_v63 = vrot.slane %v5777_v58, 2 }
 0x174   : > { %v2388_v19 = vor.u32 %v2387_v45, %v2384_v42  ;;  %v1765_v36 = vpack.c.b16 %v7195_v57, %v1764_v7 }
 0x175   : > { %v946_v29 = vpop.f32.mrf.mxu2 }
 0x176   : > { %v1011_v14 = vadd.f32 %v946_v29, %v747_v27  ;;  %v749_v55 = vpop.f32.mrf.mxu1  ;;  %v2389_v43 = vsel %vm2363_vm5, %v2379_v5, %v2388_v19  ;;  %v1768_v29 = vrot.slane %v5229_v61, 2  ;;  %v2391_v5 = vshrl.u32 %v5842_v2, 16 }
 0x177   : > { %v750_v54 = vadd.f32 %v749_v55, %v5615_v32  ;;  %v1767_v32 = vrot.slane %v1765_v36, 2  ;;  %v2129_v55 = vrot.slane %v5773_v21, 2 }
 0x178   : > { %v1372_v40 = vadd.f32 %v5769_v52, %v1011_v14  ;;  %v1679_v41 = vpop.f32.mrf.mxu0  ;;  %v2730_v52 = vunpack.c.l.b16 %v2726_v1  ;;  %v5836_v13 = vpop.f32.mrf.mxu3  ;;  %v2393_v1 = vrot.slane %v2391_v5, 2 }
 0x179   : > { %4775 = vmatmul.msk.bf16.gmra.mxu1 %vm498_vm2, %v5781_v56  ;;  %v2130_v58 = vsel %vm1766_vm6, %v2128_v63, %v2129_v55  ;;  %v2131_v63 = vrot.slane %v5812_v24, 2 }
 0x17a   : > { %4794 = vmatmul.msk.bf16.gmra.mxu2 %vm498_vm2, %v837_v33  ;;  %v5832_v46 = vadd.f32 %v1676_v4, %v1372_v40  ;;  %v2731_v27 = vpack.c.b16 %v7196_v20, %v2730_v52  ;;  %v2394_v33 = vshll.u32 %v5842_v2, 16 }
 0x17b   : > { %4900 = vmatmul.msk.bf16.gmra.mxu0 %vm498_vm2, %v1567_v51  ;;  %v1769_v51 = vsel %vm1766_vm6, %v1767_v32, %v1768_v29  ;;  %v5230_v32 = vld [vmem:[%s5310_s28 + $0x18] sm:$0xff] }
 0x17c   : > { %5009 = vmatmul.msk.bf16.gmra.mxu3 %vm498_vm2, %v2389_v43  ;;  %v2733_v49 = vrot.slane %v2731_v27, 3  ;;  %v2396_v7 = vrot.slane %v2394_v33, 3  ;;  %v1770_v61 = vrot.slane %v5230_v32, 2 }
 0x17d   : > { %v949_v62 = vpop.f32.mrf.mxu2 }
 0x17e   : > { %v1012_v8 = vadd.f32 %v949_v62, %v750_v54  ;;  %v751_v56 = vpop.f32.mrf.mxu1  ;;  %v2397_v62 = vor.u32 %v2396_v7, %v2393_v1 }
 0x180   : > { %v1373_v4 = vadd.f32 %v5792_v48, %v1012_v8  ;;  %v1681_v23 = vpop.f32.mrf.mxu0  ;;  %v752_v48 = vadd.f32 %v751_v56, %v5628_v47  ;;  %v1320_v45 = vpop.f32.mrf.mxu3  ;;  %v2735_v47 = vsel %vm2732_vm7, %v2733_v49, %v2734_v6 }
 0x182   : > { %v5849_v14 = vadd.f32 %v1679_v41, %v1373_v4  ;;  %v5869_v4 = vld [vmem:[%s5310_s28 + $0x30] sm:$0xff] }
 0x183   : > { %v2403_v5 = vshll.u32 %v5869_v4, 16 }
 0x184   : > { %7197 = vst [vmem:[#allocation13_spill] sm:$0xff] %v5849_v14 }
 0x185   : > { %v951_v42 = vpop.f32.mrf.mxu2 }
 0x186   : > { %v1013_v40 = vadd.f32 %v951_v42, %v752_v48  ;;  %v754_v41 = vpop.f32.mrf.mxu1 }
 0x187   : > { %v755_v8 = vadd.f32 %v754_v41, %v5526_v53  ;;  %v2400_v53 = vshrl.u32 %v5869_v4, 16  ;;  %v2132_v41 = vsel %vm1766_vm6, %v2129_v55, %v2131_v63 }
 0x188   : > { %v1374_v54 = vadd.f32 %v5808_v28, %v1013_v40  ;;  %v1684_v52 = vpop.f32.mrf.mxu0  ;;  %v1322_v36 = vpop.f32.mrf.mxu3  ;;  %v2398_v28 = vsel %vm2363_vm5, %v2388_v19, %v2397_v62  ;;  %v2736_v19 = vrot.slane %v5812_v24, 3  ;;  %v1771_v40 = vsel %vm1766_vm6, %v1768_v29, %v1770_v61 }
 0x189   : > { %4902 = vmatmul.msk.bf16.vlgmr.msra.gmra.mxu1 %vm498_vm2, %v1769_v51  ;;  %v2402_v51 = vrot.slane %v2400_v53, 2 }
 0x18a   : > { %4989 = vmatmul.msk.bf16.vlgmr.msra.gmra.mxu2 %vm498_vm2, %v2130_v58  ;;  %v5863_v21 = vadd.f32 %v1681_v23, %v1374_v54  ;;  %v2405_v58 = vrot.slane %v2403_v5, 3  ;;  %v2737_v54 = vsel %vm2732_vm7, %v2734_v6, %v2736_v19 }
 0x18b   : > { %5027 = vmatmul.msk.bf16.vlgmr.msra.gmra.mxu0 %vm498_vm2, %v2735_v47 }
 0x18c   : > { %7198 = vst [vmem:[#allocation14_spill] sm:$0xff] %v5863_v21  ;;  %5010 = vmatmul.msk.bf16.gmra.mxu3 %vm498_vm2, %v2398_v28  ;;  %v2406_v24 = vor.u32 %v2405_v58, %v2402_v51  ;;  %v5231_v28 = vld [vmem:[%s5310_s28 + $0x20] sm:$0xff] }
 0x18d   : > { %v954_v57 = vpop.f32.mrf.mxu2 }
 0x18e   : > { %v1014_v56 = vadd.f32 %v954_v57, %v755_v8  ;;  %v756_v43 = vpop.f32.mrf.mxu1  ;;  %v5893_v57 = vld [vmem:[%s5310_s28 + $0x38] sm:$0xff] }
 0x18f   : > { %v757_v33 = vadd.f32 %v756_v43, %v5535_v59  ;;  %v2412_v32 = vshll.u32 %v5893_v57, 16 }
 0x190   : > { %v1375_v20 = vadd.f32 %v5822_v22, %v1014_v56  ;;  %v1686_v27 = vpop.f32.mrf.mxu0  ;;  %v1325_v49 = vpop.f32.mrf.mxu3 }
 0x192   : > { %v5873_v23 = vadd.f32 %v1684_v52, %v1375_v20  ;;  %v1772_v20 = vrot.slane %v5231_v28, 2 }
 0x194   : > { %7199 = vst [vmem:[#allocation15_spill] sm:$0xff] %v5873_v23 }
 0x195   : > { %v956_v48 = vpop.f32.mrf.mxu2 }
 0x196   : > { %v1015_v22 = vadd.f32 %v956_v48, %v757_v33  ;;  %v759_v42 = vpop.f32.mrf.mxu1 }
 0x197   : > { %v760_v29 = vadd.f32 %v759_v42, %v5550_v16  ;;  %v2409_v16 = vshrl.u32 %v5893_v57, 16 }
 0x198   : > { %v1376_v1 = vadd.f32 %v5836_v13, %v1015_v22  ;;  %v1689_v7 = vpop.f32.mrf.mxu0  ;;  %v1327_v52 = vpop.f32.mrf.mxu3  ;;  %v2407_v13 = vsel %vm2363_vm5, %v2397_v62, %v2406_v24  ;;  %v2738_v62 = vrot.slane %v5842_v2, 3  ;;  %v1773_v22 = vsel %vm1766_vm6, %v1770_v61, %v1772_v20 }
 0x199   : > { %4903 = vmatmul.msk.bf16.gmra.mxu1 %vm498_vm2, %v1771_v40  ;;  %v2411_v40 = vrot.slane %v2409_v16, 2 }
 0x19a   : > { %4990 = vmatmul.msk.bf16.gmra.mxu2 %vm498_vm2, %v2132_v41  ;;  %v5887_v59 = vadd.f32 %v1686_v27, %v1376_v1  ;;  %v2133_v27 = vrot.slane %v5842_v2, 2  ;;  %v2414_v41 = vrot.slane %v2412_v32, 3  ;;  %v2739_v1 = vsel %vm2732_vm7, %v2736_v19, %v2738_v62 }
 0x19b   : > { %5028 = vmatmul.msk.bf16.gmra.mxu0 %vm498_vm2, %v2737_v54 }
 0x19c   : > { %7200 = vst [vmem:[#allocation16_spill] sm:$0xff] %v5887_v59  ;;  %5011 = vmatmul.msk.bf16.gmra.mxu3 %vm498_vm2, %v2407_v13  ;;  %v2134_v42 = vsel %vm1766_vm6, %v2131_v63, %v2133_v27  ;;  %v2415_v2 = vor.u32 %v2414_v41, %v2411_v40  ;;  %v5232_v13 = vld [vmem:[%s5310_s28 + $0x28] sm:$0xff] }
 0x19d   : > { %v959_v55 = vpop.f32.mrf.mxu2 }
 0x19e   : > { %v1016_v47 = vadd.f32 %v959_v55, %v760_v29  ;;  %v761_v8 = vpop.f32.mrf.mxu1  ;;  %v5915_v55 = vld [vmem:[%s5310_s28 + $0x40] sm:$0xff] }
 0x19f   : > { %v762_v53 = vadd.f32 %v761_v8, %v5561_v25  ;;  %v2421_v28 = vshll.u32 %v5915_v55, 16 }
 0x1a0   : > { %v1377_v6 = vadd.f32 %v1320_v45, %v1016_v47  ;;  %v1691_v56 = vpop.f32.mrf.mxu0  ;;  %v1330_v33 = vpop.f32.mrf.mxu3 }
 0x1a2   : > { %v5896_v43 = vadd.f32 %v1689_v7, %v1377_v6  ;;  %v1774_v6 = vrot.slane %v5232_v13, 2 }
 0x1a4   : > { %7201 = vst [vmem:[#allocation17_spill] sm:$0xff] %v5896_v43 }
 0x1a5   : > { %v961_v5 = vpop.f32.mrf.mxu2 }
 0x1a6   : > { %v1017_v45 = vadd.f32 %v961_v5, %v762_v53  ;;  %v764_v48 = vpop.f32.mrf.mxu1 }
 0x1a7   : > { %v765_v61 = vadd.f32 %v764_v48, %v5576_v39  ;;  %v2418_v39 = vshrl.u32 %v5915_v55, 16 }
 0x1a8   : > { %v1378_v51 = vadd.f32 %v1322_v36, %v1017_v45  ;;  %v1694_v58 = vpop.f32.mrf.mxu0  ;;  %v1332_v7 = vpop.f32.mrf.mxu3  ;;  %v2416_v36 = vsel %vm2363_vm5, %v2406_v24, %v2415_v2  ;;  %v2740_v24 = vrot.slane %v5869_v4, 3  ;;  %v1775_v45 = vsel %vm1766_vm6, %v1772_v20, %v1774_v6 }
 0x1a9   : > { %4904 = vmatmul.msk.bf16.gmra.mxu1 %vm498_vm2, %v1773_v22  ;;  %v2420_v22 = vrot.slane %v2418_v39, 2 }
 0x1aa   : > { %4991 = vmatmul.msk.bf16.gmra.mxu2 %vm498_vm2, %v2134_v42  ;;  %v5909_v25 = vadd.f32 %v1691_v56, %v1378_v51  ;;  %v2135_v56 = vrot.slane %v5869_v4, 2  ;;  %v2423_v42 = vrot.slane %v2421_v28, 3  ;;  %v2741_v51 = vsel %vm2732_vm7, %v2738_v62, %v2740_v24 }
 0x1ab   : > { %5029 = vmatmul.msk.bf16.gmra.mxu0 %vm498_vm2, %v2739_v1 }
 0x1ac   : > { %7202 = vst [vmem:[#allocation18_spill] sm:$0xff] %v5909_v25  ;;  %5012 = vmatmul.msk.bf16.gmra.mxu3 %vm498_vm2, %v2416_v36  ;;  %v2136_v48 = vsel %vm1766_vm6, %v2133_v27, %v2135_v56  ;;  %v2424_v4 = vor.u32 %v2423_v42, %v2420_v22  ;;  %v5233_v36 = vld [vmem:[%s5310_s28 + $0x30] sm:$0xff] }
 0x1ad   : > { %v964_v63 = vpop.f32.mrf.mxu2 }
 0x1ae   : > { %v1018_v54 = vadd.f32 %v964_v63, %v765_v61  ;;  %v766_v29 = vpop.f32.mrf.mxu1  ;;  %v5937_v63 = vld [vmem:[%s5310_s28 + $0x48] sm:$0xff] }
 0x1af   : > { %v767_v16 = vadd.f32 %v766_v29, %v5587_v50  ;;  %v2430_v13 = vshll.u32 %v5937_v63, 16 }
 0x1b0   : > { %v1379_v19 = vadd.f32 %v1325_v49, %v1018_v54  ;;  %v1696_v47 = vpop.f32.mrf.mxu0  ;;  %v1335_v53 = vpop.f32.mrf.mxu3 }
 0x1b2   : > { %v5918_v8 = vadd.f32 %v1694_v58, %v1379_v19  ;;  %v1776_v19 = vrot.slane %v5233_v36, 2 }
 0x1b4   : > { %7203 = vst [vmem:[#allocation19_spill] sm:$0xff] %v5918_v8  ;;  %v7215_v8 = vrot.slane %v5915_v55, 3 }
 0x1b5   : > { %v966_v32 = vpop.f32.mrf.mxu2 }
 0x1b6   : > { %v1019_v49 = vadd.f32 %v966_v32, %v767_v16  ;;  %v769_v5 = vpop.f32.mrf.mxu1 }
 0x1b7   : > { %v770_v20 = vadd.f32 %v769_v5, %v5602_v3  ;;  %v2427_v3 = vshrl.u32 %v5937_v63, 16 }
 0x1b8   : > { %v1380_v40 = vadd.f32 %v1327_v52, %v1019_v49  ;;  %v1699_v41 = vpop.f32.mrf.mxu0  ;;  %v1337_v58 = vpop.f32.mrf.mxu3  ;;  %v2425_v52 = vsel %vm2363_vm5, %v2415_v2, %v2424_v4  ;;  %v2742_v2 = vrot.slane %v5893_v57, 3  ;;  %v1777_v49 = vsel %vm1766_vm6, %v1774_v6, %v1776_v19  ;;  %v7207_v6 = vld [vmem:[#allocation8_spill] sm:$0xff] }
 0x1b9   : > { %4905 = vmatmul.msk.bf16.gmra.mxu1 %vm498_vm2, %v1775_v45  ;;  %v2429_v45 = vrot.slane %v2427_v3, 2 }
 0x1ba   : > { %4992 = vmatmul.msk.bf16.gmra.mxu2 %vm498_vm2, %v2136_v48  ;;  %v5931_v50 = vadd.f32 %v1696_v47, %v1380_v40  ;;  %v2137_v47 = vrot.slane %v5893_v57, 2  ;;  %v2432_v48 = vrot.slane %v2430_v13, 3  ;;  %v2743_v40 = vsel %vm2732_vm7, %v2740_v24, %v2742_v2  ;;  %v5963_v24 = vld [vmem:[%s5310_s28 + $0x50] sm:$0xff]  ;;  %v7208_v13 = vld [vmem:[#allocation9_spill] sm:$0xff] }
 0x1bb   : > { %5030 = vmatmul.msk.bf16.gmra.mxu0 %vm498_vm2, %v2741_v51  ;;  %v2436_v36 = vshrl.u32 %v5963_v24, 16  ;;  %v2439_v3 = vshll.u32 %v5963_v24, 16 }
 0x1bc   : > { %7204 = vst [vmem:[#allocation20_spill] sm:$0xff] %v5931_v50  ;;  %5013 = vmatmul.msk.bf16.gmra.mxu3 %vm498_vm2, %v2425_v52  ;;  %v2138_v5 = vsel %vm1766_vm6, %v2135_v56, %v2137_v47  ;;  %v2433_v57 = vor.u32 %v2432_v48, %v2429_v45  ;;  %v5234_v52 = vld [vmem:[%s5310_s28 + $0x38] sm:$0xff] }
 0x1bd   : > { %v969_v27 = vpop.f32.mrf.mxu2 }
 0x1be   : > { %v1020_v1 = vadd.f32 %v969_v27, %v770_v20  ;;  %v771_v61 = vpop.f32.mrf.mxu1  ;;  %v2434_v27 = vsel %vm2363_vm5, %v2424_v4, %v2433_v57 }
 0x1bf   : > { %v772_v39 = vadd.f32 %v771_v61, %v5613_v15 }
 0x1c0   : > { %v1381_v62 = vadd.f32 %v1330_v33, %v1020_v1  ;;  %v1701_v54 = vpop.f32.mrf.mxu0  ;;  %v5948_v16 = vpop.f32.mrf.mxu3 }
 0x1c2   : > { %v5940_v29 = vadd.f32 %v1699_v41, %v1381_v62  ;;  %v1778_v62 = vrot.slane %v5234_v52, 2  ;;  %v5235_v52 = vld [vmem:[%s5310_s28 + $0x40] sm:$0xff] }
 0x1c4   : > { %7205 = vst [vmem:[#allocation21_spill] sm:$0xff] %v5940_v29  ;;  %v1779_v45 = vsel %vm1766_vm6, %v1776_v19, %v1778_v62 }
 0x1c5   : > { %v971_v28 = vpop.f32.mrf.mxu2 }
 0x1c6   : > { %v1021_v33 = vadd.f32 %v971_v28, %v772_v39  ;;  %v774_v32 = vpop.f32.mrf.mxu1  ;;  %v7177_v28 = vrot.slane %v5915_v55, 3 }
 0x1c7   : > { %v775_v41 = vadd.f32 %v774_v32, %v7207_v6 }
 0x1c8   : > { %v1382_v22 = vadd.f32 %v1332_v7, %v1021_v33  ;;  %v1704_v42 = vpop.f32.mrf.mxu0  ;;  %v5959_v51 = vpop.f32.mrf.mxu3 }
 0x1c9   : > { %4906 = vmatmul.msk.bf16.gmra.mxu1 %vm498_vm2, %v1777_v49  ;;  %v2962_v49 = vlaneseq }
 0x1ca   : > { %4993 = vmatmul.msk.bf16.gmra.mxu2 %vm498_vm2, %v2138_v5  ;;  %v5955_v15 = vadd.f32 %v1701_v54, %v1382_v22  ;;  %v7178_v54 = vrot.slane %v5915_v55, 2  ;;  %v2438_v22 = vrot.slane %v2436_v36, 2  ;;  %v1780_v36 = vrot.slane %v5235_v52, 2 }
 0x1cb   : > { %5031 = vmatmul.msk.bf16.gmra.mxu0 %vm498_vm2, %v2743_v40  ;;  %v2441_v40 = vrot.slane %v2439_v3, 3 }
 0x1cc   : > { %7206 = vst [vmem:[#allocation22_spill] sm:$0xff] %v5955_v15  ;;  %5014 = vmatmul.msk.bf16.gmra.mxu3 %vm498_vm2, %v2434_v27  ;;  %v2140_v48 = vsel %vm1766_vm6, %v2137_v47, %v7178_v54 }
 0x1cd   : > { %v974_v56 = vpop.f32.mrf.mxu2  ;;  %v5991_v47 = vor.u32 %v2441_v40, %v2438_v22 }
 0x1ce   : > { %v1022_v20 = vadd.f32 %v974_v56, %v775_v41  ;;  %v776_v7 = vpop.f32.mrf.mxu1  ;;  %v5985_v56 = vshrl.u32 %v2962_v49, 7 }
 0x1cf   : > { %v777_v39 = vadd.f32 %v776_v7, %v7208_v13  ;;  %v5995_v7 = vld [vmem:[%s5310_s28 + $0x58] sm:$0xff] }
 0x1d0   : > { %v1383_v1 = vadd.f32 %v1335_v53, %v1022_v20  ;;  %v1706_v61 = vpop.f32.mrf.mxu0  ;;  %v5972_v4 = vpop.f32.mrf.mxu3  ;;  %v3002_v19 = vand.u32 65535, %v5985_v56  ;;  %v7210_v20 = vld [vmem:[#allocation2_spill] sm:$0xff]  ;;  %v3003_v27 = vshrl.u32 %v5985_v56, 16  ;;  %v2445_v40 = vshrl.u32 %v5995_v7, 16 }
 0x1d1   : > { %v2448_v52 = vshll.u32 %v5995_v7, 16 }
 0x1d2   : > { %v5974_v32 = vadd.f32 %v1704_v42, %v1383_v1  ;;  %v2745_v42 = vsel %vm2732_vm7, %v2742_v2, %v7177_v28  ;;  %v3006_v1 = vmul.u32 58254, %v3002_v19  ;;  %v2447_v15 = vrot.slane %v2445_v40, 2 }
 0x1d4   : > { %7209 = vst [vmem:[#allocation8_spill] sm:$0xff] %v5974_v32  ;;  %v3009_v49 = vshll.u32 %v3006_v1, 16 }
 0x1d5   : > { %v976_v33 = vpop.f32.mrf.mxu2 }
 0x1d6   : > { %v1023_v53 = vadd.f32 %v976_v33, %v777_v39  ;;  %v779_v5 = vpop.f32.mrf.mxu1  ;;  %v3005_v33 = vmul.u32 14564, %v3002_v19 }
 0x1d8   : > { %v1384_v6 = vadd.f32 %v1337_v58, %v1023_v53  ;;  %v5980_v41 = vpop.f32.mrf.mxu0  ;;  %v780_v58 = vadd.f32 %v779_v5, %v7210_v20  ;;  %v5999_v3 = vpop.f32.mrf.mxu3  ;;  %v3007_v53 = vmul.u32 14564, %v3003_v27  ;;  %v2443_v5 = vsel %vm2363_vm5, %v2433_v57, %v5991_v47 }
 0x1d9   : > { %4907 = vmatmul.msk.bf16.gmra.mxu1 %vm498_vm2, %v1779_v45  ;;  %vm3013_vm8 = vc.u32 %v3005_v33, %v3009_v49  ;;  %v7179_v57 = vmov 0  }
 0x1da   : > { %4994 = vmatmul.msk.bf16.gmra.mxu2 %vm498_vm2, %v2140_v48  ;;  %v6001_v13 = vadd.f32 %v1706_v61, %v1384_v6  ;;  %v3011_v20 = vshll.u32 %v3007_v53, 16  ;;  %v3015_v61 = vadd.s32 %v3009_v49, %v3005_v33  ;;  %v1781_v6 = vsel %vm1766_vm6, %v1778_v62, %v1780_v36 }
 0x1db   : > { %5032 = vmatmul.msk.bf16.gmra.mxu0 %vm498_vm2, %v2745_v42  ;;  %v3008_v42 = vmul.u32 58254, %v3003_v27  ;;  %v3010_v33 = vshrl.u32 %v3006_v1, 16 }
 0x1dc   : > { %7211 = vst [vmem:[#allocation9_spill] sm:$0xff] %v6001_v13  ;;  %5015 = vmatmul.msk.bf16.gmra.mxu3 %vm498_vm2, %v2443_v5  ;;  %vm3017_vm9 = vc.u32 %v3015_v61, %v3011_v20  ;;  %v6025_v13 = vld [vmem:[%s5310_s28 + $0x48] sm:$0xff] }
 0x1dd   : > { %v979_v2 = vpop.f32.mrf.mxu2  ;;  %v3018_v62 = vsel %vm3017_vm9, 1, %v7179_v57 }
 0x1de   : > { %v1024_v39 = vadd.f32 %v979_v2, %v780_v58  ;;  %v781_v45 = vpop.f32.mrf.mxu1  ;;  %v6015_v58 = vadd.s32 8, %v5985_v56  ;;  %v7212_v2 = vld [vmem:[#allocation3_spill] sm:$0xff] }
 0x1df   : > { %v782_v27 = vadd.f32 %v781_v45, %v7212_v2  ;;  %v2450_v45 = vrot.slane %v2448_v52, 3 }
 0x1e0   : > { %v1385_v48 = vadd.f32 %v5948_v16, %v1024_v39  ;;  %v6006_v22 = vpop.f32.mrf.mxu0  ;;  %v3014_v16 = vsel %vm3013_vm8, 1, %v7179_v57  ;;  %v2746_v39 = vrot.slane %v5937_v63, 3  ;;  %v3031_v49 = vand.u32 65535, %v6015_v58  ;;  %v6022_v19 = vpop.f32.mrf.mxu3 }
 0x1e1   : > { %v3016_v28 = vadd.s32 %v3014_v16, %v3008_v42  ;;  %v3032_v54 = vshrl.u32 %v6015_v58, 16  ;;  %v3012_v42 = vshrl.u32 %v3007_v53, 16  ;;  %v7213_v16 = vrot.slane %v5937_v63, 2 }
 0x1e2   : > { %v3034_v20 = vmul.u32 14564, %v3031_v49  ;;  %v3035_v1 = vmul.u32 58254, %v3031_v49  ;;  %v7214_v57 = vrot.slane %v5915_v55, 2  ;;  %v2747_v25 = vsel %vm2732_vm7, %v7215_v8, %v2746_v39 }
 0x1e3   : > { %v3020_v2 = vadd.s32 %v3018_v62, %v3016_v28  ;;  %v3036_v32 = vmul.u32 14564, %v3032_v54  ;;  %v7182_v53 = vrot.slane %v5963_v24, 2  ;;  %v3037_v52 = vmul.u32 58254, %v3032_v54 }
 0x1e4   : > { %v2142_v50 = vsel %vm1766_vm6, %v7214_v57, %v7213_v16  ;;  %v7216_v62 = vrot.slane %v6025_v13, 2  ;;  %v7181_v55 = vrot.slane %v5963_v24, 3  ;;  %v6046_v57 = vor.u32 %v2450_v45, %v2447_v15 }
 0x1e5   : > { %v981_v5 = vpop.f32.mrf.mxu2  ;;  %v3021_v43 = vadd.s32 %v3020_v2, %v3010_v33  ;;  %v6051_v54 = vadd.s32 16, %v5985_v56  ;;  %v7217_v33 = vld [vmem:[#allocation4_spill] sm:$0xff]  ;;  %v6056_v2 = vld [vmem:[%s5310_s28 + $0x60] sm:$0xff]  ;;  %v7218_v15 = vmov 0  }
 0x1e6   : > { %v1025_v29 = vadd.f32 %v981_v5, %v782_v27  ;;  %v784_v61 = vpop.f32.mrf.mxu1  ;;  %v3038_v27 = vshll.u32 %v3035_v1, 16  ;;  %v6043_v49 = vsel %vm1766_vm6, %v1780_v36, %v7216_v62  ;;  %v7254_v12 = vrot.slane %v6056_v2, 2 }
 0x1e7   : > { %v3022_v8 = vadd.s32 %v3021_v43, %v3012_v42  ;;  %v785_v5 = vadd.f32 %v784_v61, %v7217_v33  ;;  %v6060_v43 = vadd.f32 %v5980_v41, %v1385_v48  ;;  %v3060_v42 = vand.u32 65535, %v6051_v54 }
 0x1e8   : > { %v1386_v40 = vadd.f32 %v5959_v51, %v1025_v29  ;;  %v6037_v28 = vpop.f32.mrf.mxu0  ;;  %v3040_v29 = vshll.u32 %v3036_v32, 16  ;;  %vm3042_vm10 = vc.u32 %v3034_v20, %v3038_v27  ;;  %v3044_v51 = vadd.s32 %v3038_v27, %v3034_v20  ;;  %v6063_v16 = vpop.f32.mrf.mxu3 }
 0x1e9   : > { %4908 = vmatmul.msk.bf16.gmra.mxu1 %vm498_vm2, %v1781_v6  ;;  %v3023_v36 = vshrl.u32 %v3022_v8, 4  ;;  %v3043_v45 = vsel %vm3042_vm10, 1, %v7218_v15  ;;  %7219 = vst [vmem:[#allocation2_spill] sm:$0xff] %v6060_v43  ;;  %v3039_v6 = vshrl.u32 %v3035_v1, 16  ;;  %v2457_v27 = vshll.u32 %v6056_v2, 16 }
 0x1ea   : > { %4995 = vmatmul.msk.bf16.gmra.mxu2 %vm498_vm2, %v2142_v50  ;;  %v3045_v50 = vadd.s32 %v3043_v45, %v3037_v52  ;;  %vm3046_vm11 = vc.u32 %v3044_v51, %v3040_v29  ;;  %v3041_v33 = vshrl.u32 %v3036_v32, 16  ;;  %v3061_v48 = vshrl.u32 %v6051_v54, 16 }
 0x1eb   : > { %5033 = vmatmul.msk.bf16.gmra.mxu0 %vm498_vm2, %v2747_v25  ;;  %v3024_v61 = vmul.u32 18, %v3023_v36  ;;  %v2454_v25 = vshrl.u32 %v6056_v2, 16  ;;  %v3047_v62 = vsel %vm3046_vm11, 1, %v7218_v15  ;;  %v7220_v52 = vrot.slane %v5937_v63, 2 }
 0x1ec   : > { %v3049_v41 = vadd.s32 %v3047_v62, %v3045_v50  ;;  %v2749_v51 = vsel %vm2732_vm7, %v2746_v39, %v7181_v55  ;;  %v2452_v36 = vsel %vm2363_vm5, %v5991_v47, %v6046_v57  ;;  %v3064_v62 = vmul.u32 58254, %v3060_v42 }
 0x1ed   : > { %v984_v20 = vpop.f32.mrf.mxu2  ;;  %v2144_v29 = vsel %vm1766_vm6, %v7220_v52, %v7182_v53  ;;  %v6090_v63 = vsub.s32 %v5985_v56, %v3024_v61  ;;  %v2456_v52 = vrot.slane %v2454_v25, 2  ;;  %v2459_v55 = vrot.slane %v2457_v27, 3  ;;  %5016 = vmatmul.msk.bf16.gmra.mxu3 %vm498_vm2, %v2452_v36 }
 0x1ee   : > { %v1026_v8 = vadd.f32 %v984_v20, %v785_v5  ;;  %v786_v1 = vpop.f32.mrf.mxu1  ;;  %v6081_v5 = vld [vmem:[%s5310_s28 + $0x50] sm:$0xff]  ;;  %v3050_v20 = vadd.s32 %v3049_v41, %v3039_v6  ;;  %v3063_v53 = vmul.u32 14564, %v3060_v42  ;;  %v3065_v43 = vmul.u32 14564, %v3061_v48 }
 0x1ef   : > { %v1784_v32 = vrot.slane %v6081_v5, 2  ;;  %v6097_v61 = vadd.s32 24, %v5985_v56  ;;  %v6100_v6 = vadd.f32 %v6006_v22, %v1386_v40  ;;  %vm4043_vm12 = vcmp.ne.s32.totalorder %v6090_v63, 0 }
 0x1f0   : > { %v6085_v45 = vadd.f32 %v5972_v4, %v1026_v8  ;;  %v6087_v50 = vpop.f32.mrf.mxu0  ;;  %v3051_v5 = vadd.s32 %v3050_v20, %v3041_v33  ;;  %v3067_v4 = vshll.u32 %v3064_v62, 16  ;;  %v7222_v8 = vld [vmem:[#allocation5_spill] sm:$0xff]  ;;  %vm4079_vm13 = vcmp.lt.s32.totalorder %v6090_v63, 0  ;;  %v6104_v41 = vpop.f32.mrf.mxu3 }
 0x1f1   : > { %7221 = vst [vmem:[#allocation3_spill] sm:$0xff] %v6087_v50  ;;  %v787_v59 = vadd.f32 %v786_v1, %v7222_v8  ;;  %v3066_v50 = vmul.u32 58254, %v3061_v48  ;;  %v3069_v25 = vshll.u32 %v3065_v43, 16  ;;  %v6107_v33 = vadd.s32 18, %v6090_v63  ;;  %vm6115_vm15 = vmand %vm4079_vm13, %vm4043_vm12 }
 0x1f2   : > { %7223 = vst [vmem:[#allocation4_spill] sm:$0xff] %v6100_v6  ;;  %v3052_v42 = vshrl.u32 %v3051_v5, 4  ;;  %v6109_v1 = vor.u32 %v2459_v55, %v2456_v52  ;;  %vm3071_vm14 = vc.u32 %v3063_v53, %v3067_v4  ;;  %v3073_v48 = vadd.s32 %v3067_v4, %v3063_v53  ;;  %v6131_v4 = vld [vmem:[%s5310_s28 + $0x58] sm:$0xff] }
 0x1f3   : > { %v3068_v22 = vshrl.u32 %v3064_v62, 16  ;;  %v3072_v40 = vsel %vm3071_vm14, 1, %v7218_v15  ;;  %v3089_v20 = vand.u32 65535, %v6097_v61  ;;  %v3090_v55 = vshrl.u32 %v6097_v61, 16 }
 0x1f4   : > { %v3053_v47 = vmul.u32 18, %v3052_v42  ;;  %v3074_v39 = vadd.s32 %v3072_v40, %v3066_v50  ;;  %vm3075_vm0 = vc.u32 %v3073_v48, %v3069_v25  ;;  %v7228_v62 = vrot.slane %v6025_v13, 2 }
 0x1f5   : > { %v986_v27 = vpop.f32.mrf.mxu2  ;;  %v3076_v50 = vsel %vm3075_vm0, 1, %v7218_v15  ;;  %v7229_v42 = vrot.slane %v5995_v7, 2  ;;  %v7230_v25 = vrot.slane %v5963_v24, 2  ;;  %v7231_v48 = vrot.slane %v5995_v7, 3 }
 0x1f6   : > { %v1027_v36 = vadd.f32 %v986_v27, %v787_v59  ;;  %v789_v8 = vpop.f32.mrf.mxu1  ;;  %v6128_v52 = vsel %vm1766_vm6, %v7228_v62, %v1784_v32  ;;  %v7232_v13 = vrot.slane %v5963_v24, 3  ;;  %v3070_v40 = vshrl.u32 %v3065_v43, 16 }
 0x1f7   : > { %v3078_v62 = vadd.s32 %v3076_v50, %v3074_v39  ;;  %v2461_v24 = vsel %vm2363_vm5, %v6046_v57, %v6109_v1  ;;  %v6163_v43 = vsub.s32 %v6015_v58, %v3053_v47  ;;  %v3092_v57 = vmul.u32 14564, %v3089_v20 }
 0x1f8   : > { %v6121_v53 = vadd.f32 %v5999_v3, %v1027_v36  ;;  %v6123_v59 = vpop.f32.mrf.mxu0  ;;  %v6140_v3 = vsel %vm1766_vm6, %v7230_v25, %v7229_v42  ;;  %v6147_v36 = vsel %vm2732_vm7, %v7232_v13, %v7231_v48  ;;  %v6176_v13 = vadd.f32 %v6037_v28, %v6085_v45  ;;  %v6178_v58 = vpop.f32.mrf.mxu3 }
 0x1f9   : > { %7227 = vst [vmem:[#allocation23_spill] sm:$0xff] %v6123_v59  ;;  %v7233_v59 = vld [vmem:[#allocation6_spill] sm:$0xff]  ;;  %4909 = vmatmul.msk.bf16.gmra.mxu1 %vm498_vm2, %v6043_v49  ;;  %v3079_v39 = vadd.s32 %v3078_v62, %v3068_v22  ;;  %v6166_v49 = vld [vmem:[%s5310_s28 + $0x68] sm:$0xff]  ;;  %v6183_v42 = vadd.s32 32, %v5985_v56  ;;  %vm4044_vm1 = vcmp.ne.s32.totalorder %v6163_v43, 0  ;;  %vm4080_vm3 = vcmp.lt.s32.totalorder %v6163_v43, 0 }
 0x1fa   : > { %7226 = vst [vmem:[#allocation5_spill] sm:$0xff] %v6121_v53  ;;  %v790_v27 = vadd.f32 %v789_v8, %v7233_v59  ;;  %4996 = vmatmul.msk.bf16.gmra.mxu2 %vm498_vm2, %v2144_v29  ;;  %v3093_v29 = vmul.u32 58254, %v3089_v20  ;;  %v3094_v8 = vmul.u32 14564, %v3090_v55  ;;  %v7234_v59 = vrot.slane %v6131_v4, 2  ;;  %vm6211_vm9 = vmand %vm4080_vm3, %vm4044_vm1 }
 0x1fb   : > { %5034 = vmatmul.msk.bf16.gmra.mxu0 %vm498_vm2, %v2749_v51  ;;  %7235 = vst [vmem:[#allocation6_spill] sm:$0xff] %v6176_v13  ;;  %v3080_v47 = vadd.s32 %v3079_v39, %v3070_v40  ;;  %v2463_v22 = vshrl.u32 %v6166_v49, 16  ;;  %v2466_v62 = vshll.u32 %v6166_v49, 16  ;;  %v6188_v28 = vadd.s32 18, %v6163_v43 }
 0x1fc   : > { %v6171_v50 = vsel %vm1766_vm6, %v1784_v32, %v7234_v59  ;;  %v3095_v59 = vmul.u32 58254, %v3090_v55  ;;  %v3096_v25 = vshll.u32 %v3093_v29, 16  ;;  %v3098_v48 = vshll.u32 %v3094_v8, 16 }
 0x1fd   : > { %v989_v51 = vpop.f32.mrf.mxu2  ;;  %v3081_v45 = vshrl.u32 %v3080_v47, 4  ;;  %v2465_v53 = vrot.slane %v2463_v22, 2  ;;  %v3118_v6 = vand.u32 65535, %v6183_v42  ;;  %5017 = vmatmul.msk.bf16.gmra.mxu3 %vm498_vm2, %v2461_v24  ;;  %v3097_v23 = vshrl.u32 %v3093_v29, 16 }
 0x1fe   : > { %v1028_v32 = vadd.f32 %v989_v51, %v790_v27  ;;  %v791_v20 = vpop.f32.mrf.mxu1  ;;  %vm3100_vm4 = vc.u32 %v3092_v57, %v3096_v25  ;;  %v3102_v27 = vadd.s32 %v3096_v25, %v3092_v57  ;;  %v2468_v51 = vrot.slane %v2466_v62, 3  ;;  %v7238_v57 = vld [vmem:[#allocation7_spill] sm:$0xff] }
 0x1ff   : > { %v3082_v55 = vmul.u32 18, %v3081_v45  ;;  %v3101_v13 = vsel %vm3100_vm4, 1, %v7218_v15  ;;  %v3119_v47 = vshrl.u32 %v6183_v42, 16  ;;  %v6204_v25 = vadd.s32 40, %v5985_v56 }
 0x200   : > { %v6191_v40 = vadd.f32 %v6022_v19, %v1028_v32  ;;  %v6193_v39 = vpop.f32.mrf.mxu0  ;;  %v3103_v21 = vadd.s32 %v3101_v13, %v3095_v59  ;;  %vm3104_vm8 = vc.u32 %v3102_v27, %v3098_v48  ;;  %v3099_v32 = vshrl.u32 %v3094_v8, 16  ;;  %v6219_v13 = vpop.f32.mrf.mxu3 }
 0x201   : > { %7237 = vst [vmem:[#allocation25_spill] sm:$0xff] %v6193_v39  ;;  %v6200_v19 = vsub.s32 %v6051_v54, %v3082_v55  ;;  %v3105_v22 = vsel %vm3104_vm8, 1, %v7218_v15  ;;  %v792_v62 = vadd.f32 %v791_v20, %v7238_v57  ;;  %v6215_v48 = vmul.u32 58254, %v3118_v6 }
 0x202   : > { %7236 = vst [vmem:[#allocation24_spill] sm:$0xff] %v6191_v40  ;;  %v3107_v29 = vadd.s32 %v3105_v22, %v3103_v21  ;;  %v6217_v54 = vmul.u32 14564, %v3119_v47  ;;  %v6226_v20 = vor.u32 %v2468_v51, %v2465_v53  ;;  %v3121_v55 = vmul.u32 14564, %v3118_v6 }
 0x203   : > { %vm4045_vm10 = vcmp.ne.s32.totalorder %v6200_v19, 0  ;;  %vm4081_vm11 = vcmp.lt.s32.totalorder %v6200_v19, 0  ;;  %v6224_v59 = vadd.s32 18, %v6200_v19  ;;  %v3125_v22 = vshll.u32 %v6215_v48, 16 }
 0x204   : > { %vm6228_vm12 = vmand %vm4081_vm11, %vm4045_vm10  ;;  %v3108_v21 = vadd.s32 %v3107_v29, %v3097_v23  ;;  %v4188_v39 = vsel %vm6211_vm9, %v6188_v28, %v6163_v43  ;;  %v7243_v40 = vrot.slane %v6056_v2, 2  ;;  %v7244_v53 = vrot.slane %v5995_v7, 2 }
 0x205   : > { %v991_v8 = vpop.f32.mrf.mxu2  ;;  %v7246_v23 = vrot.slane %v5995_v7, 3  ;;  %v3147_v29 = vand.u32 65535, %v6204_v25  ;;  %v3124_v24 = vmul.u32 58254, %v3119_v47  ;;  %v3127_v14 = vshll.u32 %v6217_v54, 16 }
 0x206   : > { %v1029_v45 = vadd.f32 %v991_v8, %v792_v62  ;;  %v1870_v57 = vpop.f32.mrf.mxu1  ;;  %v6242_v51 = vsel %vm1766_vm6, %v7244_v53, %v7243_v40  ;;  %v7245_v62 = vrot.slane %v6056_v2, 3  ;;  %v3109_v28 = vadd.s32 %v3108_v21, %v3099_v32  ;;  %v6264_v53 = vld [vmem:[%s5310_s28 + $0x60] sm:$0xff] }
 0x207   : > { %v2470_v7 = vsel %vm2363_vm5, %v6109_v1, %v6226_v20  ;;  %vm3129_vm13 = vc.u32 %v3121_v55, %v3125_v22  ;;  %v3131_v32 = vadd.s32 %v3125_v22, %v3121_v55  ;;  %v3148_v21 = vshrl.u32 %v6204_v25, 16  ;;  %v6288_v55 = vld [vmem:[%s5310_s28 + $0x70] sm:$0xff] }
 0x208   : > { %v6249_v6 = vsel %vm2732_vm7, %v7246_v23, %v7245_v62  ;;  %v6253_v8 = vadd.f32 %v6063_v16, %v1029_v45  ;;  %v2836_v43 = vpop.f32.mrf.mxu0  ;;  %v3126_v45 = vshrl.u32 %v6215_v48, 16  ;;  %v3110_v47 = vshrl.u32 %v3109_v28, 4  ;;  %v6294_v23 = vpop.f32.mrf.mxu3 }
 0x209   : > { %4910 = vmatmul.msk.bf16.gmra.mxu1 %vm498_vm2, %v6128_v52  ;;  %v1960_v62 = vadd.f32 %v1870_v57, %v5647_v34  ;;  %v7248_v1 = vsel %vm6115_vm15, %v6107_v33, %v6090_v63  ;;  %v3130_v48 = vsel %vm3129_vm13, 1, %v7218_v15  ;;  %v6290_v22 = vmul.u32 58254, %v3147_v29 }
 0x20a   : > { %7247 = vst [vmem:[#allocation7_spill] sm:$0xff] %v6253_v8  ;;  %4997 = vmatmul.msk.bf16.gmra.mxu2 %vm498_vm2, %v6140_v3  ;;  %vm6281_vm14 = vcmp.lt.s32.totalorder %v7248_v1, 16  ;;  %v3111_v34 = vmul.u32 18, %v3110_v47  ;;  %v3132_v57 = vadd.s32 %v3130_v48, %v3124_v24  ;;  %vm3133_vm0 = vc.u32 %v3131_v32, %v3127_v14 }
 0x20b   : > { %5035 = vmatmul.msk.bf16.gmra.mxu0 %vm498_vm2, %v6147_v36  ;;  %v6292_v36 = vmul.u32 14564, %v3148_v21  ;;  %v3134_v63 = vsel %vm3133_vm0, 1, %v7218_v15  ;;  %v2472_v33 = vshrl.u32 %v6288_v55, 16  ;;  %v2475_v28 = vshll.u32 %v6288_v55, 16 }
 0x20c   : > { %v3150_v1 = vmul.u32 14564, %v3147_v29  ;;  %v6300_v3 = vsub.s32 %v6097_v61, %v3111_v34  ;;  %v3136_v16 = vadd.s32 %v3134_v63, %v3132_v57  ;;  %v3154_v24 = vshll.u32 %v6290_v22, 16 }
 0x20d   : > { %v2231_v5 = vpop.f32.mrf.mxu2  ;;  %v7251_v47 = vrot.slane %v6264_v53, 2  ;;  %v7252_v32 = vrot.slane %v6131_v4, 2  ;;  %v7253_v8 = vrot.slane %v6166_v49, 2  ;;  %v3128_v61 = vshrl.u32 %v6217_v54, 16  ;;  %5018 = vmatmul.msk.bf16.gmra.mxu3 %vm498_vm2, %v2470_v7 }
 0x20e   : > { %v2321_v40 = vadd.f32 %v2231_v5, %v1960_v62  ;;  %v1872_v14 = vpop.f32.mrf.mxu1  ;;  %v3153_v62 = vmul.u32 58254, %v3148_v21  ;;  %v2474_v5 = vrot.slane %v2472_v33, 2  ;;  %v2477_v63 = vrot.slane %v2475_v28, 3 }
 0x20f   : > { %v6308_v48 = vsel %vm1766_vm6, %v7252_v32, %v7251_v47  ;;  %v6315_v29 = vsel %vm1766_vm6, %v7254_v12, %v7253_v8  ;;  %v3156_v4 = vshll.u32 %v6292_v36, 16  ;;  %vm6320_vm15 = vcmp.lt.s32.totalorder %v4188_v39, 16 }
 0x210   : > { %v2690_v34 = vadd.f32 %v6104_v41, %v2321_v40  ;;  %v2838_v57 = vpop.f32.mrf.mxu0  ;;  %vm4046_vm1 = vcmp.ne.s32.totalorder %v6300_v3, 0  ;;  %vm4082_vm3 = vcmp.lt.s32.totalorder %v6300_v3, 0  ;;  %v3137_v8 = vadd.s32 %v3136_v16, %v3126_v45  ;;  %v6347_v16 = vpop.f32.mrf.mxu3 }
 0x211   : > { %vm3158_vm4 = vc.u32 %v3150_v1, %v3154_v24  ;;  %v3160_v41 = vadd.s32 %v3154_v24, %v3150_v1  ;;  %v6329_v40 = vadd.s32 48, %v5985_v56  ;;  %v1961_v39 = vadd.f32 %v1872_v14, %v5657_v26  ;;  %vm6343_vm9 = vmand %vm4082_vm3, %vm4046_vm1 }
 0x212   : > { %v2926_v54 = vadd.f32 %v2836_v43, %v2690_v34  ;;  %v3138_v21 = vadd.s32 %v3137_v8, %v3128_v61  ;;  %v3155_v33 = vshrl.u32 %v6290_v22, 16  ;;  %v3159_v28 = vsel %vm3158_vm4, 1, %v7218_v15 }
 0x213   : > { %v6335_v32 = vadd.s32 18, %v6300_v3  ;;  %v6337_v12 = vor.u32 %v2477_v63, %v2474_v5  ;;  %v3161_v43 = vadd.s32 %v3159_v28, %v3153_v62  ;;  %vm3162_vm8 = vc.u32 %v3160_v41, %v3156_v4  ;;  %v6363_v41 = vld [vmem:[%s5310_s28 + $0x68] sm:$0xff] }
 0x214   : > { %v3139_v45 = vshrl.u32 %v3138_v21, 4  ;;  %v3157_v22 = vshrl.u32 %v6292_v36, 16  ;;  %v3163_v1 = vsel %vm3162_vm8, 1, %v7218_v15  ;;  %v3176_v24 = vand.u32 65535, %v6329_v40 }
 0x215   : > { %v2233_v7 = vpop.f32.mrf.mxu2  ;;  %v4331_v14 = vsel %vm6281_vm14, %v2926_v54, 0.0  ;;  %v3165_v62 = vadd.s32 %v3163_v1, %v3161_v43  ;;  %v3177_v34 = vshrl.u32 %v6329_v40, 16  ;;  %v7259_v63 = vrot.slane %v6166_v49, 3 }
 0x216   : > { %v2322_v61 = vadd.f32 %v2233_v7, %v1961_v39  ;;  %v1875_v5 = vpop.f32.mrf.mxu1  ;;  %v7260_v4 = vrot.slane %v6056_v2, 3  ;;  %v3140_v36 = vmul.u32 18, %v3139_v45  ;;  %v1790_v21 = vrot.slane %v6363_v41, 2 }
 0x217   : > { %v2151_v52 = vrot.slane %v6288_v55, 2  ;;  %v4190_v28 = vsel %vm6343_vm9, %v6335_v32, %v6300_v3  ;;  %v3166_v2 = vadd.s32 %v3165_v62, %v3155_v33  ;;  %v6373_v43 = vmul.u32 58254, %v3176_v24 }
 0x218   : > { %v6360_v8 = vsel %vm2732_vm7, %v7260_v4, %v7259_v63  ;;  %v2691_v54 = vadd.f32 %v6178_v58, %v2322_v61  ;;  %v2841_v39 = vpop.f32.mrf.mxu0  ;;  %v4481_v7 = vmul.f32 %v4331_v14, %v4331_v14  ;;  %v7261_v45 = vsel %vm6228_vm12, %v6224_v59, %v6200_v19  ;;  %v6426_v62 = vpop.f32.mrf.mxu3  ;;  %v6429_v63 = vld [vmem:[%s5310_s28 + $0x78] sm:$0xff] }
 0x219   : > { %vm6380_vm10 = vcmp.lt.s32.totalorder %v7261_v45, 16  ;;  %v6385_v58 = vsub.s32 %v6183_v42, %v3140_v36  ;;  %v2479_v3 = vsel %vm2363_vm5, %v6226_v20, %v6337_v12  ;;  %v6391_v33 = vadd.s32 56, %v5985_v56  ;;  %4911 = vmatmul.msk.bf16.gmra.mxu1 %vm498_vm2, %v6171_v50 }
 0x21a   : > { %v2927_v32 = vadd.f32 %v2838_v57, %v2691_v54  ;;  %4998 = vmatmul.msk.bf16.gmra.mxu2 %vm498_vm2, %v6242_v51  ;;  %v3167_v19 = vadd.s32 %v3166_v2, %v3157_v22  ;;  %v3179_v59 = vmul.u32 14564, %v3176_v24  ;;  %v6397_v27 = vmul.u32 14564, %v3177_v34 }
 0x21b   : > { %v1962_v42 = vadd.f32 %v1875_v5, %v5663_v18  ;;  %5036 = vmatmul.msk.bf16.gmra.mxu0 %vm498_vm2, %v6249_v6  ;;  %vm4047_vm11 = vcmp.ne.s32.totalorder %v6385_v58, 0  ;;  %v7264_v20 = vrot.slane %v6264_v53, 2  ;;  %v7265_v51 = vrot.slane %v6166_v49, 2 }
 0x21c   : > { %v4332_v18 = vsel %vm6320_vm15, %v2927_v32, 0.0  ;;  %vm4083_vm12 = vcmp.lt.s32.totalorder %v6385_v58, 0  ;;  %v3168_v6 = vshrl.u32 %v3167_v19, 4  ;;  %v3183_v53 = vshll.u32 %v6373_v43, 16 }
 0x21d   : > { %v6408_v50 = vsel %vm1766_vm6, %v7264_v20, %v1790_v21  ;;  %v6415_v57 = vsel %vm1766_vm6, %v7265_v51, %v2151_v52  ;;  %v5105_v26 = vpack.c.bf16 %v4332_v18, %v4331_v14  ;;  %v4439_v22 = vadd.f32 %v4332_v18, %v4331_v14  ;;  %v2236_v61 = vpop.f32.mrf.mxu2  ;;  %vm6438_vm13 = vmand %vm4083_vm12, %vm4047_vm11  ;;  %5019 = vmatmul.msk.bf16.gmra.mxu3 %vm498_vm2, %v2479_v3 }
 0x21e   : > { %v4482_v24 = vmul.f32 %v4332_v18, %v4332_v18  ;;  %v3182_v5 = vmul.u32 58254, %v3177_v34  ;;  %v2323_v4 = vadd.f32 %v2236_v61, %v1962_v42  ;;  %v4155_v36 = vadd.s32 18, %v6385_v58  ;;  %v1877_v45 = vpop.f32.mrf.mxu1  ;;  %v6519_v18 = vld [vmem:[%s5310_s28 + $0x80] sm:$0xff] }
 0x21f   : > { %v3169_v47 = vmul.u32 18, %v3168_v6  ;;  %v3185_v54 = vshll.u32 %v6397_v27, 16  ;;  %5106 = vst [vmem:[%s6420_s18] sm:$0xff] %v5105_v26   ;;  %v2756_v34 = vrot.slane %v6288_v55, 3  ;;  %vm3187_vm14 = vc.u32 %v3179_v59, %v3183_v53 }
 0x220   : > { %v4517_v2 = vadd.f32 %v4482_v24, %v4481_v7  ;;  %v3189_v32 = vadd.s32 %v3183_v53, %v3179_v59  ;;  %v2692_v19 = vadd.f32 %v6219_v13, %v2323_v4  ;;  %v2843_v42 = vpop.f32.mrf.mxu0  ;;  %v3184_v7 = vshrl.u32 %v6373_v43, 16 }
 0x221   : > { %v6445_v20 = vsub.s32 %v6204_v25, %v3169_v47  ;;  %v3188_v51 = vsel %vm3187_vm14, 1, %v7218_v15  ;;  %vm6449_vm0 = vcmp.lt.s32.totalorder %v4190_v28, 16  ;;  %v2481_v26 = vshrl.u32 %v6429_v63, 16 }
 0x222   : > { %v3190_v6 = vadd.s32 %v3188_v51, %v3182_v5  ;;  %vm3191_vm15 = vc.u32 %v3189_v32, %v3185_v54  ;;  %v2484_v59 = vshll.u32 %v6429_v63, 16  ;;  %v2928_v53 = vadd.f32 %v2841_v39, %v2692_v19 }
 0x223   : > { %v4191_v25 = vsel %vm6438_vm13, %v4155_v36, %v6385_v58  ;;  %vm4048_vm1 = vcmp.ne.s32.totalorder %v6445_v20, 0  ;;  %vm4084_vm3 = vcmp.lt.s32.totalorder %v6445_v20, 0  ;;  %v6462_v13 = vadd.s32 18, %v6445_v20 }
 0x224   : > { %v3186_v28 = vshrl.u32 %v6397_v27, 16  ;;  %v3192_v43 = vsel %vm3191_vm15, 1, %v7218_v15  ;;  %v3205_v24 = vand.u32 65535, %v6391_v33  ;;  %v4333_v39 = vsel %vm6380_vm10, %v2928_v53, 0.0  ;;  %vm6470_vm4 = vmand %vm4084_vm3, %vm4048_vm1  ;;  %v6475_v27 = vpop.f32.mrf.mxu3 }
 0x225   : > { %v1963_v58 = vadd.f32 %v1877_v45, %v5673_v30  ;;  %v3194_v61 = vadd.s32 %v3192_v43, %v3190_v6  ;;  %v3206_v5 = vshrl.u32 %v6391_v33, 16  ;;  %v4440_v4 = vadd.f32 %v4439_v22, %v4333_v39  ;;  %v2238_v47 = vpop.f32.mrf.mxu2 }
 0x226   : > { %v4483_v36 = vmul.f32 %v4333_v39, %v4333_v39  ;;  %v2483_v54 = vrot.slane %v2481_v26, 2  ;;  %v2486_v14 = vrot.slane %v2484_v59, 3  ;;  %v3208_v1 = vmul.u32 14564, %v3205_v24  ;;  %v1880_v30 = vpop.f32.mrf.mxu1 }
 0x227   : > { %v2324_v32 = vadd.f32 %v2238_v47, %v1963_v58  ;;  %v3195_v19 = vadd.s32 %v3194_v61, %v3184_v7  ;;  %v3209_v51 = vmul.u32 58254, %v3205_v24  ;;  %v4192_v45 = vsel %vm6470_vm4, %v6462_v13, %v6445_v20 }
 0x228   : > { %v4518_v53 = vadd.f32 %v4517_v2, %v4483_v36  ;;  %v7272_v22 = vrot.slane %v6166_v49, 3  ;;  %v3210_v26 = vmul.u32 14564, %v3206_v5  ;;  %v2846_v7 = vpop.f32.mrf.mxu0  ;;  %v3211_v2 = vmul.u32 58254, %v3206_v5 }
 0x229   : > { %v2693_v59 = vadd.f32 %v6294_v23, %v2324_v32  ;;  %v3196_v43 = vadd.s32 %v3195_v19, %v3186_v28  ;;  %v3212_v24 = vshll.u32 %v3209_v51, 16  ;;  %v1964_v58 = vadd.f32 %v1880_v30, %v5679_v60  ;;  %4912 = vmatmul.msk.bf16.gmra.mxu1 %vm498_vm2, %v6308_v48 }
 0x22a   : > { %v6486_v6 = vsel %vm2732_vm7, %v7272_v22, %v2756_v34  ;;  %vm6490_vm8 = vcmp.lt.s32.totalorder %v4191_v25, 16  ;;  %v6494_v20 = vor.u32 %v2486_v14, %v2483_v54  ;;  %v3213_v49 = vshrl.u32 %v3209_v51, 16  ;;  %4999 = vmatmul.msk.bf16.gmra.mxu2 %vm498_vm2, %v6315_v29  ;;  %v6504_v25 = vld [vmem:[%s5310_s28 + $0x70] sm:$0xff] }
 0x22b   : > { %v3214_v13 = vshll.u32 %v3210_v26, 16  ;;  %v2929_v61 = vadd.f32 %v2843_v42, %v2693_v59  ;;  %v3197_v23 = vshrl.u32 %v3196_v43, 4  ;;  %vm3216_vm9 = vc.u32 %v3208_v1, %v3212_v24  ;;  %5037 = vmatmul.msk.bf16.gmra.mxu0 %vm498_vm2, %v6360_v8 }
 0x22c   : > { %v3218_v28 = vadd.s32 %v3212_v24, %v3208_v1  ;;  %v3217_v60 = vsel %vm3216_vm9, 1, %v7218_v15  ;;  %v1792_v5 = vrot.slane %v6504_v25, 2  ;;  %v2153_v42 = vrot.slane %v6429_v63, 2 }
 0x22d   : > { %v2758_v48 = vrot.slane %v6429_v63, 3  ;;  %v4334_v29 = vsel %vm6449_vm0, %v2929_v61, 0.0  ;;  %v3198_v36 = vmul.u32 18, %v3197_v23  ;;  %v3219_v47 = vadd.s32 %v3217_v60, %v3211_v2  ;;  %v2241_v32 = vpop.f32.mrf.mxu2 }
 0x22e   : > { %vm3220_vm10 = vc.u32 %v3218_v28, %v3214_v13  ;;  %v5110_v54 = vpack.c.bf16 %v4334_v29, %v4333_v39  ;;  %v4441_v8 = vadd.f32 %v4440_v4, %v4334_v29  ;;  %v4484_v14 = vmul.f32 %v4334_v29, %v4334_v29  ;;  %v1882_v43 = vpop.f32.mrf.mxu1  ;;  %v6522_v39 = vpop.f32.mrf.mxu3 }
 0x22f   : > { %v3221_v19 = vsel %vm3220_vm10, 1, %v7218_v15  ;;  %v2325_v1 = vadd.f32 %v2241_v32, %v1964_v58  ;;  %v6513_v51 = vsub.s32 %v6329_v40, %v3198_v36  ;;  %v2488_v30 = vsel %vm2363_vm5, %v6337_v12, %v6494_v20 }
 0x230   : > { %v3223_v22 = vadd.s32 %v3221_v19, %v3219_v47  ;;  %5195 = vst [vmem:[%s6420_s18 + $0x8] sm:$0xff] %v5110_v54   ;;  %v4519_v59 = vadd.f32 %v4518_v53, %v4484_v14  ;;  %v3215_v4 = vshrl.u32 %v3210_v26, 16  ;;  %v6529_v40 = vsel %vm1766_vm6, %v1790_v21, %v1792_v5  ;;  %v2848_v24 = vpop.f32.mrf.mxu0  ;;  %5020 = vmatmul.msk.bf16.gmra.mxu3 %vm498_vm2, %v2488_v30 }
 0x231   : > { %v6532_v2 = vadd.s32 64, %v5985_v56  ;;  %v2694_v12 = vadd.f32 %v6347_v16, %v2325_v1  ;;  %vm4049_vm11 = vcmp.ne.s32.totalorder %v6513_v51, 0  ;;  %vm4085_vm12 = vcmp.lt.s32.totalorder %v6513_v51, 0 }
 0x232   : > { %v6542_v53 = vsel %vm1766_vm6, %v2151_v52, %v2153_v42  ;;  %vm6544_vm13 = vcmp.lt.s32.totalorder %v4192_v45, 16  ;;  %v3224_v21 = vadd.s32 %v3223_v22, %v3213_v49  ;;  %v6553_v16 = vsel %vm2732_vm7, %v2756_v34, %v2758_v48  ;;  %vm6563_vm14 = vmand %vm4085_vm12, %vm4049_vm11 }
 0x233   : > { %v3234_v26 = vand.u32 65535, %v6532_v2  ;;  %v3235_v58 = vshrl.u32 %v6532_v2, 16  ;;  %v2930_v13 = vadd.f32 %v2846_v7, %v2694_v12  ;;  %v1965_v52 = vadd.f32 %v1882_v43, %v5689_v37 }
 0x234   : > { %v6559_v45 = vadd.s32 18, %v6513_v51  ;;  %v2490_v49 = vshrl.u32 %v6519_v18, 16  ;;  %v3225_v55 = vadd.s32 %v3224_v21, %v3215_v4  ;;  %v2493_v28 = vshll.u32 %v6519_v18, 16 }
 0x235   : > { %v3237_v34 = vmul.u32 14564, %v3234_v26  ;;  %v3238_v23 = vmul.u32 58254, %v3234_v26  ;;  %v4335_v7 = vsel %vm6490_vm8, %v2930_v13, 0.0  ;;  %v3239_v37 = vmul.u32 14564, %v3235_v58  ;;  %v2243_v54 = vpop.f32.mrf.mxu2 }
 0x236   : > { %v3240_v60 = vmul.u32 58254, %v3235_v58  ;;  %v6571_v29 = vadd.s32 72, %v5985_v56  ;;  %v4442_v36 = vadd.f32 %v4441_v8, %v4335_v7  ;;  %v4485_v47 = vmul.f32 %v4335_v7, %v4335_v7  ;;  %v1885_v43 = vpop.f32.mrf.mxu1 }
 0x237   : > { %v3226_v14 = vshrl.u32 %v3225_v55, 4  ;;  %v3241_v32 = vshll.u32 %v3238_v23, 16  ;;  %v2326_v19 = vadd.f32 %v2243_v54, %v1965_v52  ;;  %v4193_v1 = vsel %vm6563_vm14, %v6559_v45, %v6513_v51  ;;  %v6580_v55 = vpop.f32.mrf.mxu3 }
 0x238   : > { %v3243_v30 = vshll.u32 %v3239_v37, 16  ;;  %v2492_v22 = vrot.slane %v2490_v49, 2  ;;  %v4520_v3 = vadd.f32 %v4519_v59, %v4485_v47  ;;  %v2851_v8 = vpop.f32.mrf.mxu0  ;;  %v3242_v26 = vshrl.u32 %v3238_v23, 16 }
 0x239   : > { %v3227_v4 = vmul.u32 18, %v3226_v14  ;;  %vm3245_vm0 = vc.u32 %v3237_v34, %v3241_v32  ;;  %v3247_v12 = vadd.s32 %v3241_v32, %v3237_v34  ;;  %v2695_v21 = vadd.f32 %v6426_v62, %v2326_v19  ;;  %4913 = vmatmul.msk.bf16.gmra.mxu1 %vm498_vm2, %v6408_v50 }
 0x23a   : > { %v3246_v58 = vsel %vm3245_vm0, 1, %v7218_v15  ;;  %v2495_v13 = vrot.slane %v2493_v28, 3  ;;  %v3263_v51 = vand.u32 65535, %v6571_v29  ;;  %5000 = vmatmul.msk.bf16.gmra.mxu2 %vm498_vm2, %v6415_v57  ;;  %v3264_v49 = vshrl.u32 %v6571_v29, 16 }
 0x23b   : > { %v3228_v52 = vsub.s32 %v6391_v33, %v3227_v4  ;;  %v3248_v61 = vadd.s32 %v3246_v58, %v3240_v60  ;;  %vm3249_vm15 = vc.u32 %v3247_v12, %v3243_v30  ;;  %v2931_v59 = vadd.f32 %v2848_v24, %v2695_v21  ;;  %5038 = vmatmul.msk.bf16.gmra.mxu0 %vm498_vm2, %v6486_v6 }
 0x23c   : > { %v3250_v62 = vsel %vm3249_vm15, 1, %v7218_v15  ;;  %v6588_v45 = vor.u32 %v2495_v13, %v2492_v22  ;;  %v1966_v34 = vadd.f32 %v1885_v43, %v5695_v10  ;;  %v3244_v23 = vshrl.u32 %v3239_v37, 16 }
 0x23d   : > { %vm4050_vm1 = vcmp.ne.s32.totalorder %v3228_v52, 0  ;;  %vm4086_vm3 = vcmp.lt.s32.totalorder %v3228_v52, 0  ;;  %v4158_v33 = vadd.s32 18, %v3228_v52  ;;  %v3252_v24 = vadd.s32 %v3250_v62, %v3248_v61  ;;  %v2246_v6 = vpop.f32.mrf.mxu2 }
 0x23e   : > { %v4336_v50 = vsel %vm6544_vm13, %v2931_v59, 0.0  ;;  %vm6596_vm4 = vmand %vm4086_vm3, %vm4050_vm1  ;;  %v3267_v28 = vmul.u32 58254, %v3263_v51  ;;  %v3266_v14 = vmul.u32 14564, %v3263_v51  ;;  %v2327_v32 = vadd.f32 %v2246_v6, %v1966_v34  ;;  %v1887_v22 = vpop.f32.mrf.mxu1  ;;  %v6623_v59 = vld [vmem:[%s5310_s28 + $0x88] sm:$0xff] }
 0x23f   : > { %v5115_v60 = vpack.c.bf16 %v4336_v50, %v4335_v7  ;;  %v4443_v47 = vadd.f32 %v4442_v36, %v4336_v50  ;;  %v4486_v54 = vmul.f32 %v4336_v50, %v4336_v50  ;;  %v4194_v19 = vsel %vm6596_vm4, %v4158_v33, %v3228_v52  ;;  %v6625_v62 = vpop.f32.mrf.mxu3 }
 0x240   : > { %v3253_v30 = vadd.s32 %v3252_v24, %v3242_v26  ;;  %v3268_v41 = vmul.u32 14564, %v3264_v49  ;;  %v2497_v37 = vsel %vm2363_vm5, %v6494_v20, %v6588_v45  ;;  %v3269_v43 = vmul.u32 58254, %v3264_v49  ;;  %v2853_v12 = vpop.f32.mrf.mxu0  ;;  %v6616_v20 = vld [vmem:[%s5310_s28 + $0x78] sm:$0xff] }
 0x241   : > { %5196 = vst [vmem:[%s6420_s18 + $0x10] sm:$0xff] %v5115_v60   ;;  %v4521_v10 = vadd.f32 %v4520_v3, %v4486_v54  ;;  %v3270_v7 = vshll.u32 %v3267_v28, 16  ;;  %v2696_v36 = vadd.f32 %v6475_v27, %v2327_v32  ;;  %vm6607_vm8 = vcmp.lt.s32.totalorder %v4193_v1, 16  ;;  %5021 = vmatmul.msk.bf16.gmra.mxu3 %vm498_vm2, %v2497_v37 }
 0x242   : > { %v3254_v21 = vadd.s32 %v3253_v30, %v3244_v23  ;;  %v3272_v26 = vshll.u32 %v3268_v41, 16  ;;  %vm6611_vm9 = vcmp.lt.s32.totalorder %v4194_v19, 16  ;;  %v3271_v3 = vshrl.u32 %v3267_v28, 16 }
 0x243   : > { %vm3274_vm10 = vc.u32 %v3266_v14, %v3270_v7  ;;  %v3276_v13 = vadd.s32 %v3270_v7, %v3266_v14  ;;  %v1794_v52 = vrot.slane %v6616_v20, 2  ;;  %v2932_v27 = vadd.f32 %v2851_v8, %v2696_v36 }
 0x244   : > { %v1967_v1 = vadd.f32 %v1887_v22, %v5705_v0  ;;  %v3255_v61 = vshrl.u32 %v3254_v21, 4  ;;  %v3275_v51 = vsel %vm3274_vm10, 1, %v7218_v15  ;;  %v3273_v49 = vshrl.u32 %v3268_v41, 16 }
 0x245   : > { %v3277_v33 = vadd.s32 %v3275_v51, %v3269_v43  ;;  %vm3278_vm11 = vc.u32 %v3276_v13, %v3272_v26  ;;  %v2155_v24 = vrot.slane %v6519_v18, 2  ;;  %v4337_v50 = vsel %vm6607_vm8, %v2932_v27, 0.0  ;;  %v2248_v28 = vpop.f32.mrf.mxu2 }
 0x246   : > { %v3256_v8 = vmul.u32 18, %v3255_v61  ;;  %v3279_v0 = vsel %vm3278_vm11, 1, %v7218_v15  ;;  %v6636_v34 = vsel %vm1766_vm6, %v1792_v5, %v1794_v52  ;;  %v4444_v57 = vadd.f32 %v4443_v47, %v4337_v50  ;;  %v1890_v41 = vpop.f32.mrf.mxu1 }
 0x247   : > { %v4487_v23 = vmul.f32 %v4337_v50, %v4337_v50  ;;  %v3281_v60 = vadd.s32 %v3279_v0, %v3277_v33  ;;  %v2760_v54 = vrot.slane %v6519_v18, 3  ;;  %v2328_v6 = vadd.f32 %v2248_v28, %v1967_v1 }
 0x248   : > { %v3257_v14 = vsub.s32 %v6532_v2, %v3256_v8  ;;  %v6641_v32 = vadd.s32 80, %v5985_v56  ;;  %v2499_v19 = vshrl.u32 %v6623_v59, 16  ;;  %v2502_v5 = vshll.u32 %v6623_v59, 16  ;;  %v2856_v37 = vpop.f32.mrf.mxu0  ;;  %v6678_v8 = vpop.f32.mrf.mxu3 }
 0x249   : > { %v4522_v30 = vadd.f32 %v4521_v10, %v4487_v23  ;;  %v3282_v25 = vadd.s32 %v3281_v60, %v3271_v3  ;;  %v6646_v47 = vadd.s32 88, %v5985_v56  ;;  %v2697_v22 = vadd.f32 %v6522_v39, %v2328_v6  ;;  %4914 = vmatmul.msk.bf16.gmra.mxu1 %vm498_vm2, %v6529_v40 }
 0x24a   : > { %vm4051_vm12 = vcmp.ne.s32.totalorder %v3257_v14, 0  ;;  %vm4087_vm13 = vcmp.lt.s32.totalorder %v3257_v14, 0  ;;  %v6654_v2 = vsel %vm1766_vm6, %v2153_v42, %v2155_v24  ;;  %v4159_v43 = vadd.s32 18, %v3257_v14  ;;  %5001 = vmatmul.msk.bf16.gmra.mxu2 %vm498_vm2, %v6542_v53 }
 0x24b   : > { %vm6656_vm14 = vmand %vm4087_vm13, %vm4051_vm12  ;;  %v3283_v7 = vadd.s32 %v3282_v25, %v3273_v49  ;;  %v3292_v36 = vand.u32 65535, %v6641_v32  ;;  %v3293_v39 = vshrl.u32 %v6641_v32, 16  ;;  %v2933_v4 = vadd.f32 %v2853_v12, %v2697_v22  ;;  %5039 = vmatmul.msk.bf16.gmra.mxu0 %vm498_vm2, %v6553_v16 }
 0x24c   : > { %v1968_v21 = vadd.f32 %v1890_v41, %v5711_v11  ;;  %v2501_v42 = vrot.slane %v2499_v19, 2  ;;  %v2504_v26 = vrot.slane %v2502_v5, 3  ;;  %v4195_v3 = vsel %vm6656_vm14, %v4159_v43, %v3257_v14 }
 0x24d   : > { %v3284_v13 = vshrl.u32 %v3283_v7, 4  ;;  %v3296_v27 = vmul.u32 58254, %v3292_v36  ;;  %v3321_v12 = vand.u32 65535, %v6646_v47  ;;  %v4338_v11 = vsel %vm6611_vm9, %v2933_v4, 0.0  ;;  %v2251_v49 = vpop.f32.mrf.mxu2 }
 0x24e   : > { %vm6674_vm0 = vcmp.lt.s32.totalorder %v4195_v3, 16  ;;  %v3295_v53 = vmul.u32 14564, %v3292_v36  ;;  %v3297_v1 = vmul.u32 14564, %v3293_v39  ;;  %v5120_v61 = vpack.c.bf16 %v4338_v11, %v4337_v50  ;;  %v1892_v6 = vpop.f32.mrf.mxu1 }
 0x24f   : > { %v4445_v51 = vadd.f32 %v4444_v57, %v4338_v11  ;;  %v4488_v16 = vmul.f32 %v4338_v11, %v4338_v11  ;;  %v3285_v33 = vmul.u32 18, %v3284_v13  ;;  %v2329_v0 = vadd.f32 %v2251_v49, %v1968_v21 }
 0x250   : > { %v3298_v23 = vmul.u32 58254, %v3293_v39  ;;  %v3299_v28 = vshll.u32 %v3296_v27, 16  ;;  %v3301_v60 = vshll.u32 %v3297_v1, 16  ;;  %5197 = vst [vmem:[%s6420_s18 + $0x18] sm:$0xff] %v5120_v61   ;;  %v3300_v19 = vshrl.u32 %v3296_v27, 16  ;;  %v2858_v57 = vpop.f32.mrf.mxu0 }
 0x251   : > { %v4523_v58 = vadd.f32 %v4522_v30, %v4488_v16  ;;  %v3286_v14 = vsub.s32 %v6571_v29, %v3285_v33  ;;  %v6682_v41 = vor.u32 %v2504_v26, %v2501_v42  ;;  %v2698_v50 = vadd.f32 %v6580_v55, %v2329_v0  ;;  %v6713_v33 = vld [vmem:[%s5310_s28 + $0x80] sm:$0xff] }
 0x252   : > { %v3302_v25 = vshrl.u32 %v3297_v1, 16  ;;  %vm3303_vm15 = vc.u32 %v3295_v53, %v3299_v28  ;;  %v3305_v5 = vadd.s32 %v3299_v28, %v3295_v53  ;;  %v1969_v7 = vadd.f32 %v1892_v6, %v5721_v17 }
 0x253   : > { %vm4052_vm1 = vcmp.ne.s32.totalorder %v3286_v14, 0  ;;  %vm4088_vm3 = vcmp.lt.s32.totalorder %v3286_v14, 0  ;;  %v4160_v22 = vadd.s32 18, %v3286_v14  ;;  %v3304_v10 = vsel %vm3303_vm15, 1, %v7218_v15 }
 0x254   : > { %v2934_v43 = vadd.f32 %v2856_v37, %v2698_v50  ;;  %vm6686_vm4 = vmand %vm4088_vm3, %vm4052_vm1  ;;  %v3306_v29 = vadd.s32 %v3304_v10, %v3298_v23  ;;  %vm3307_vm8 = vc.u32 %v3305_v5, %v3301_v60  ;;  %v2506_v55 = vsel %vm2363_vm5, %v6588_v45, %v6682_v41  ;;  %v6718_v60 = vld [vmem:[%s5310_s28 + $0x90] sm:$0xff] }
 0x255   : > { %v4196_v36 = vsel %vm6686_vm4, %v4160_v22, %v3286_v14  ;;  %v3308_v39 = vsel %vm3307_vm8, 1, %v7218_v15  ;;  %5022 = vmatmul.msk.bf16.gmra.mxu3 %vm498_vm2, %v2506_v55  ;;  %v3322_v37 = vshrl.u32 %v6646_v47, 16  ;;  %v3324_v42 = vmul.u32 14564, %v3321_v12  ;;  %v2253_v13 = vpop.f32.mrf.mxu2 }
 0x256   : > { %v4339_v4 = vsel %vm6674_vm0, %v2934_v43, 0.0  ;;  %v3310_v21 = vadd.s32 %v3308_v39, %v3306_v29  ;;  %v3325_v26 = vmul.u32 58254, %v3321_v12  ;;  %v2761_v17 = vsel %vm2732_vm7, %v2758_v48, %v2760_v54  ;;  %v1895_v12 = vpop.f32.mrf.mxu1 }
 0x257   : > { %v4446_v3 = vadd.f32 %v4445_v51, %v4339_v4  ;;  %v4489_v45 = vmul.f32 %v4339_v4, %v4339_v4  ;;  %v3326_v27 = vmul.u32 14564, %v3322_v37  ;;  %v2330_v11 = vadd.f32 %v2253_v13, %v1969_v7  ;;  %v6710_v51 = vpop.f32.mrf.mxu3 }
 0x258   : > { %v3311_v53 = vadd.s32 %v3310_v21, %v3300_v19  ;;  %v3327_v1 = vmul.u32 58254, %v3322_v37  ;;  %v3328_v40 = vshll.u32 %v3325_v26, 16  ;;  %vm6706_vm9 = vcmp.lt.s32.totalorder %v4196_v36, 16  ;;  %v2861_v0 = vpop.f32.mrf.mxu0 }
 0x259   : > { %v4524_v61 = vadd.f32 %v4523_v58, %v4489_v45  ;;  %v3330_v49 = vshll.u32 %v3326_v27, 16  ;;  %v1796_v63 = vrot.slane %v6713_v33, 2  ;;  %v2699_v48 = vadd.f32 %v6625_v62, %v2330_v11  ;;  %4915 = vmatmul.msk.bf16.gmra.mxu1 %vm498_vm2, %v6636_v34 }
 0x25a   : > { %v3312_v23 = vadd.s32 %v3311_v53, %v3302_v25  ;;  %v3329_v28 = vshrl.u32 %v3325_v26, 16  ;;  %vm3332_vm10 = vc.u32 %v3324_v42, %v3328_v40  ;;  %v1970_v58 = vadd.f32 %v1895_v12, %v5727_v38  ;;  %5002 = vmatmul.msk.bf16.gmra.mxu2 %vm498_vm2, %v6654_v2 }
 0x25b   : > { %v3331_v6 = vshrl.u32 %v3326_v27, 16  ;;  %v3333_v14 = vsel %vm3332_vm10, 1, %v7218_v15  ;;  %v3334_v19 = vadd.s32 %v3328_v40, %v3324_v42  ;;  %v2935_v50 = vadd.f32 %v2858_v57, %v2699_v48  ;;  %5040 = vmatmul.msk.bf16.gmra.mxu0 %vm498_vm2, %v2761_v17 }
 0x25c   : > { %v3313_v62 = vshrl.u32 %v3312_v23, 4  ;;  %v3335_v5 = vadd.s32 %v3333_v14, %v3327_v1  ;;  %v6731_v25 = vsel %vm1766_vm6, %v1794_v52, %v1796_v63  ;;  %v2157_v38 = vrot.slane %v6623_v59, 2 }
 0x25d   : > { %vm3336_vm11 = vc.u32 %v3334_v19, %v3330_v49  ;;  %v2762_v34 = vrot.slane %v6623_v59, 3  ;;  %v6737_v57 = vadd.s32 96, %v5985_v56  ;;  %v4340_v2 = vsel %vm6706_vm9, %v2935_v50, 0.0  ;;  %v2256_v29 = vpop.f32.mrf.mxu2 }
 0x25e   : > { %v3314_v22 = vmul.u32 18, %v3313_v62  ;;  %v3337_v20 = vsel %vm3336_vm11, 1, %v7218_v15  ;;  %v2508_v52 = vshrl.u32 %v6718_v60, 16  ;;  %v5125_v10 = vpack.c.bf16 %v4340_v2, %v4339_v4  ;;  %v1897_v42 = vpop.f32.mrf.mxu1 }
 0x25f   : > { %v4447_v43 = vadd.f32 %v4446_v3, %v4340_v2  ;;  %v4490_v30 = vmul.f32 %v4340_v2, %v4340_v2  ;;  %v3339_v55 = vadd.s32 %v3337_v20, %v3335_v5  ;;  %v2331_v7 = vadd.f32 %v2256_v29, %v1970_v58  ;;  %v6754_v27 = vpop.f32.mrf.mxu3 }
 0x260   : > { %v3315_v36 = vsub.s32 %v6641_v32, %v3314_v22  ;;  %v3350_v39 = vand.u32 65535, %v6737_v57  ;;  %v3351_v37 = vshrl.u32 %v6737_v57, 16  ;;  %5198 = vst [vmem:[%s6420_s18 + $0x20] sm:$0xff] %v5125_v10   ;;  %v2158_v4 = vsel %vm1766_vm6, %v2155_v24, %v2157_v38  ;;  %v2863_v13 = vpop.f32.mrf.mxu0 }
 0x261   : > { %v4525_v21 = vadd.f32 %v4524_v61, %v4490_v30  ;;  %v3340_v26 = vadd.s32 %v3339_v55, %v3329_v28  ;;  %v2511_v3 = vshll.u32 %v6718_v60, 16  ;;  %v2700_v45 = vadd.f32 %v6678_v8, %v2331_v7 }
 0x262   : > { %vm4053_vm12 = vcmp.ne.s32.totalorder %v3315_v36, 0  ;;  %vm4089_vm13 = vcmp.lt.s32.totalorder %v3315_v36, 0  ;;  %v4161_v32 = vadd.s32 18, %v3315_v36  ;;  %v2763_v11 = vsel %vm2732_vm7, %v2760_v54, %v2762_v34 }
 0x263   : > { %vm4125_vm14 = vmand %vm4089_vm13, %vm4053_vm12  ;;  %v3341_v17 = vadd.s32 %v3340_v26, %v3331_v6  ;;  %v3353_v53 = vmul.u32 14564, %v3350_v39  ;;  %v3354_v24 = vmul.u32 58254, %v3350_v39  ;;  %v2936_v1 = vadd.f32 %v2861_v0, %v2700_v45 }
 0x264   : > { %v4197_v40 = vsel %vm4125_vm14, %v4161_v32, %v3315_v36  ;;  %v3355_v61 = vmul.u32 14564, %v3351_v37  ;;  %v2510_v8 = vrot.slane %v2508_v52, 2  ;;  %v3356_v12 = vmul.u32 58254, %v3351_v37 }
 0x265   : > { %vm4233_vm0 = vcmp.lt.s32.totalorder %v4197_v40, 16  ;;  %v3342_v16 = vshrl.u32 %v3341_v17, 4  ;;  %v3357_v49 = vshll.u32 %v3354_v24, 16  ;;  %v1971_v23 = vadd.f32 %v1897_v42, %v5737_v31  ;;  %v2258_v18 = vpop.f32.mrf.mxu2  ;;  %v6785_v42 = vld [vmem:[%s5310_s28 + $0x88] sm:$0xff] }
 0x266   : > { %v4341_v48 = vsel %vm4233_vm0, %v2936_v1, 0.0  ;;  %v3359_v28 = vshll.u32 %v3355_v61, 16  ;;  %v2513_v58 = vrot.slane %v2511_v3, 3  ;;  %v1900_v22 = vpop.f32.mrf.mxu1  ;;  %v6767_v31 = vadd.s32 104, %v5985_v56 }
 0x267   : > { %v4448_v6 = vadd.f32 %v4447_v43, %v4341_v48  ;;  %v4491_v14 = vmul.f32 %v4341_v48, %v4341_v48  ;;  %v3343_v19 = vmul.u32 18, %v3342_v16  ;;  %vm3361_vm15 = vc.u32 %v3353_v53, %v3357_v49 }
 0x268   : > { %v2332_v54 = vadd.f32 %v2258_v18, %v1971_v23  ;;  %v3362_v0 = vsel %vm3361_vm15, 1, %v7218_v15  ;;  %v3363_v50 = vadd.s32 %v3357_v49, %v3353_v53  ;;  %v6763_v62 = vor.u32 %v2513_v58, %v2510_v8  ;;  %v2866_v10 = vpop.f32.mrf.mxu0  ;;  %v7293_v18 = vld [vmem:[#allocation10_spill] sm:$0xff] }
 0x269   : > { %v4526_v5 = vadd.f32 %v4525_v21, %v4491_v14  ;;  %v3344_v2 = vsub.s32 %v6646_v47, %v3343_v19  ;;  %v3364_v20 = vadd.s32 %v3362_v0, %v3356_v12  ;;  %v3358_v43 = vshrl.u32 %v3354_v24, 16  ;;  %4916 = vmatmul.msk.bf16.gmra.mxu1 %vm498_vm2, %v6731_v25  ;;  %v6782_v21 = vpop.f32.mrf.mxu3 }
 0x26a   : > { %v2701_v52 = vadd.f32 %v6710_v51, %v2332_v54  ;;  %vm3365_vm1 = vc.u32 %v3363_v50, %v3359_v28  ;;  %v2515_v30 = vsel %vm2363_vm5, %v6682_v41, %v6763_v62  ;;  %5003 = vmatmul.msk.bf16.gmra.mxu2 %vm498_vm2, %v2158_v4  ;;  %v3379_v7 = vand.u32 65535, %v6767_v31 }
 0x26b   : > { %vm4054_vm3 = vcmp.ne.s32.totalorder %v3344_v2, 0  ;;  %vm4090_vm4 = vcmp.lt.s32.totalorder %v3344_v2, 0  ;;  %v4162_v29 = vadd.s32 18, %v3344_v2  ;;  %v3366_v47 = vsel %vm3365_vm1, 1, %v7218_v15  ;;  %5023 = vmatmul.msk.bf16.gmra.mxu3 %vm498_vm2, %v2515_v30  ;;  %5041 = vmatmul.msk.bf16.gmra.mxu0 %vm498_vm2, %v2763_v11 }
 0x26c   : > { %v2937_v55 = vadd.f32 %v2863_v13, %v2701_v52  ;;  %vm4126_vm8 = vmand %vm4090_vm4, %vm4054_vm3  ;;  %v3368_v51 = vadd.s32 %v3366_v47, %v3364_v20  ;;  %v3380_v41 = vshrl.u32 %v6767_v31, 16  ;;  %v1972_v39 = vadd.f32 %v1900_v22, %v5746_v35 }
 0x26d   : > { %v4198_v36 = vsel %vm4126_vm8, %v4162_v29, %v3344_v2  ;;  %v3360_v37 = vshrl.u32 %v3355_v61, 16  ;;  %v1798_v26 = vrot.slane %v6785_v42, 2  ;;  %v3383_v4 = vmul.u32 58254, %v3379_v7  ;;  %v2261_v32 = vpop.f32.mrf.mxu2 }
 0x26e   : > { %vm4234_vm9 = vcmp.lt.s32.totalorder %v4198_v36, 16  ;;  %v3369_v25 = vadd.s32 %v3368_v51, %v3358_v43  ;;  %v2159_v3 = vrot.slane %v6718_v60, 2  ;;  %v3382_v13 = vmul.u32 14564, %v3379_v7  ;;  %v1902_v61 = vpop.f32.mrf.mxu1 }
 0x26f   : > { %v4342_v45 = vsel %vm4234_vm9, %v2937_v55, 0.0  ;;  %v3384_v17 = vmul.u32 14564, %v3380_v41  ;;  %v2764_v35 = vrot.slane %v6718_v60, 3  ;;  %v2333_v1 = vadd.f32 %v2261_v32, %v1972_v39 }
 0x270   : > { %v5130_v11 = vpack.c.bf16 %v4342_v45, %v4341_v48  ;;  %v6790_v53 = vadd.f32 %v4448_v6, %v4342_v45  ;;  %v4492_v24 = vmul.f32 %v4342_v45, %v4342_v45  ;;  %v3370_v40 = vadd.s32 %v3369_v25, %v3360_v37  ;;  %v6796_v28 = vpop.f32.mrf.mxu0  ;;  %v6804_v6 = vld [vmem:[%s5310_s28 + $0x98] sm:$0xff] }
 0x271   : > { %v3385_v8 = vmul.u32 58254, %v3380_v41  ;;  %v3386_v16 = vshll.u32 %v3383_v4, 16  ;;  %v3388_v12 = vshll.u32 %v3384_v17, 16  ;;  %v2702_v23 = vadd.f32 %v6754_v27, %v2333_v1 }
 0x272   : > { %5199 = vst [vmem:[%s6420_s18 + $0x28] sm:$0xff] %v5130_v11   ;;  %v6793_v49 = vadd.f32 %v4526_v5, %v4492_v24  ;;  %v3387_v58 = vshrl.u32 %v3383_v4, 16  ;;  %v1799_v48 = vsel %vm1766_vm6, %v1796_v63, %v1798_v26  ;;  %v3371_v14 = vshrl.u32 %v3370_v40, 4  ;;  %v7294_v24 = vld [vmem:[#allocation11_spill] sm:$0xff] }
 0x273   : > { %v1973_v19 = vadd.f32 %v1902_v61, %v7293_v18  ;;  %vm3390_vm10 = vc.u32 %v3382_v13, %v3386_v16  ;;  %v3392_v54 = vadd.s32 %v3386_v16, %v3382_v13  ;;  %v3389_v0 = vshrl.u32 %v3384_v17, 16 }
 0x274   : > { %v3391_v50 = vsel %vm3390_vm10, 1, %v7218_v15  ;;  %v2160_v27 = vsel %vm1766_vm6, %v2157_v38, %v2159_v3  ;;  %v6814_v33 = vadd.s32 112, %v5985_v56  ;;  %v2938_v63 = vadd.f32 %v2866_v10, %v2702_v23  ;;  %v2635_v38 = vpop.f32.mrf.mxu3 }
 0x275   : > { %v3372_v5 = vmul.u32 18, %v3371_v14  ;;  %v3393_v2 = vadd.s32 %v3391_v50, %v3385_v8  ;;  %vm3394_vm11 = vc.u32 %v3392_v54, %v3388_v12  ;;  %v2517_v43 = vshrl.u32 %v6804_v6, 16  ;;  %v2263_v29 = vpop.f32.mrf.mxu2 }
 0x276   : > { %v3395_v22 = vsel %vm3394_vm11, 1, %v7218_v15  ;;  %v3408_v20 = vand.u32 65535, %v6814_v33  ;;  %v3409_v52 = vshrl.u32 %v6814_v33, 16  ;;  %v2765_v10 = vsel %vm2732_vm7, %v2762_v34, %v2764_v35 }
 0x277   : > { %v3373_v30 = vsub.s32 %v6737_v57, %v3372_v5  ;;  %v3397_v47 = vadd.s32 %v3395_v22, %v3393_v2  ;;  %v2520_v55 = vshll.u32 %v6804_v6, 16  ;;  %v2334_v51 = vadd.f32 %v2263_v29, %v1973_v19  ;;  %v1905_v57 = vpop.f32.mrf.mxu1 }
 0x278   : > { %v3411_v7 = vmul.u32 14564, %v3408_v20  ;;  %v3412_v41 = vmul.u32 58254, %v3408_v20  ;;  %v3413_v36 = vmul.u32 14564, %v3409_v52  ;;  %v3414_v25 = vmul.u32 58254, %v3409_v52  ;;  %v6831_v17 = vpop.f32.mrf.mxu0 }
 0x279   : > { %vm4055_vm12 = vcmp.ne.s32.totalorder %v3373_v30, 0  ;;  %vm4091_vm13 = vcmp.lt.s32.totalorder %v3373_v30, 0  ;;  %v4163_v39 = vadd.s32 18, %v3373_v30  ;;  %v3398_v37 = vadd.s32 %v3397_v47, %v3387_v58  ;;  %4917 = vmatmul.msk.bf16.gmra.mxu1 %vm498_vm2, %v1799_v48 }
 0x27a   : > { %vm4127_vm14 = vmand %vm4091_vm13, %vm4055_vm12  ;;  %v3415_v4 = vshll.u32 %v3412_v41, 16  ;;  %v2519_v45 = vrot.slane %v2517_v43, 2  ;;  %v6828_v32 = vadd.s32 120, %v5985_v56  ;;  %v2703_v34 = vadd.f32 %v6782_v21, %v2334_v51  ;;  %5004 = vmatmul.msk.bf16.gmra.mxu2 %vm498_vm2, %v2160_v27 }
 0x27b   : > { %v4199_v59 = vsel %vm4127_vm14, %v4163_v39, %v3373_v30  ;;  %v3399_v13 = vadd.s32 %v3398_v37, %v3389_v0  ;;  %v3417_v11 = vshll.u32 %v3413_v36, 16  ;;  %v1974_v1 = vadd.f32 %v1905_v57, %v7294_v24  ;;  %5042 = vmatmul.msk.bf16.gmra.mxu0 %vm498_vm2, %v2765_v10  ;;  %v6855_v37 = vld [vmem:[%s5310_s28 + $0x90] sm:$0xff] }
 0x27c   : > { %vm4235_vm0 = vcmp.lt.s32.totalorder %v4199_v59, 16  ;;  %v3416_v40 = vshrl.u32 %v3412_v41, 16  ;;  %vm3419_vm15 = vc.u32 %v3411_v7, %v3415_v4  ;;  %v3421_v21 = vadd.s32 %v3415_v4, %v3411_v7  ;;  %v2637_v20 = vpop.f32.mrf.mxu3 }
 0x27d   : > { %v4343_v61 = vsel %vm4235_vm0, %v2938_v63, 0.0  ;;  %v3400_v8 = vshrl.u32 %v3399_v13, 4  ;;  %v3420_v16 = vsel %vm3419_vm15, 1, %v7218_v15  ;;  %v2522_v14 = vrot.slane %v2520_v55, 3  ;;  %v2266_v19 = vpop.f32.mrf.mxu2 }
 0x27e   : > { %v4450_v12 = vadd.f32 %v6790_v53, %v4343_v61  ;;  %v4493_v23 = vmul.f32 %v4343_v61, %v4343_v61  ;;  %v3422_v58 = vadd.s32 %v3420_v16, %v3414_v25  ;;  %vm3423_vm1 = vc.u32 %v3421_v21, %v3417_v11  ;;  %v2357_v16 = vld [vmem:[%s5310_s28 + $0xa0] sm:$0x7] }
 0x27f   : > { %v3401_v18 = vmul.u32 18, %v3400_v8  ;;  %v3437_v48 = vand.u32 65535, %v6828_v32  ;;  %v3438_v54 = vshrl.u32 %v6828_v32, 16  ;;  %v2335_v50 = vadd.f32 %v2266_v19, %v1974_v1  ;;  %v1907_v22 = vpop.f32.mrf.mxu1 }
 0x280   : > { %v4528_v0 = vadd.f32 %v6793_v49, %v4493_v23  ;;  %v3424_v27 = vsel %vm3423_vm1, 1, %v7218_v15  ;;  %v6843_v63 = vor.u32 %v2522_v14, %v2519_v45  ;;  %v3418_v53 = vshrl.u32 %v3413_v36, 16  ;;  %v6852_v41 = vpop.f32.mrf.mxu0 }
 0x281   : > { %v3402_v5 = vsub.s32 %v6767_v31, %v3401_v18  ;;  %v3426_v2 = vadd.s32 %v3424_v27, %v3422_v58  ;;  %v3441_v52 = vmul.u32 58254, %v3437_v48  ;;  %v2939_v43 = vadd.f32 %v6796_v28, %v2703_v34 }
 0x282   : > { %v2524_v30 = vsel %vm2363_vm5, %v6763_v62, %v6843_v63  ;;  %v3440_v29 = vmul.u32 14564, %v3437_v48  ;;  %v3442_v49 = vmul.u32 14564, %v3438_v54  ;;  %v2704_v31 = vadd.f32 %v2635_v38, %v2335_v50 }
 0x283   : > { %vm4056_vm3 = vcmp.ne.s32.totalorder %v3402_v5, 0  ;;  %vm4092_vm4 = vcmp.lt.s32.totalorder %v3402_v5, 0  ;;  %v4164_v47 = vadd.s32 18, %v3402_v5  ;;  %v3427_v10 = vadd.s32 %v3426_v2, %v3416_v40  ;;  %5024 = vmatmul.msk.bf16.gmra.mxu3 %vm498_vm2, %v2524_v30 }
 0x284   : > { %vm4128_vm8 = vmand %vm4092_vm4, %vm4056_vm3  ;;  %v1975_v55 = vadd.f32 %v1907_v22, %v5802_v44  ;;  %v3444_v51 = vshll.u32 %v3441_v52, 16  ;;  %v3443_v36 = vmul.u32 58254, %v3438_v54  ;;  %v3446_v62 = vshll.u32 %v3442_v49, 16  ;;  %v2640_v18 = vpop.f32.mrf.mxu3 }
 0x285   : > { %v4200_v7 = vsel %vm4128_vm8, %v4164_v47, %v3402_v5  ;;  %v3428_v28 = vadd.s32 %v3427_v10, %v3418_v53  ;;  %v1800_v57 = vrot.slane %v6855_v37, 2  ;;  %v2268_v4 = vpop.f32.mrf.mxu2  ;;  %v2161_v45 = vrot.slane %v6804_v6, 2 }
 0x286   : > { %vm4236_vm9 = vcmp.lt.s32.totalorder %v4200_v7, 16  ;;  %vm3448_vm10 = vc.u32 %v3440_v29, %v3444_v51  ;;  %v3450_v39 = vadd.s32 %v3444_v51, %v3440_v29  ;;  %v3445_v11 = vshrl.u32 %v3441_v52, 16 }
 0x287   : > { %v4344_v25 = vsel %vm4236_vm9, %v2939_v43, 0.0  ;;  %v3429_v38 = vshrl.u32 %v3428_v28, 4  ;;  %v3449_v44 = vsel %vm3448_vm10, 1, %v7218_v15  ;;  %v1910_v40 = vpop.f32.mrf.mxu1  ;;  %v1801_v8 = vsel %vm1766_vm6, %v1798_v26, %v1800_v57 }
 0x288   : > { %v5135_v59 = vpack.c.bf16 %v4344_v25, %v4343_v61  ;;  %v4451_v34 = vadd.f32 %v4450_v12, %v4344_v25  ;;  %v4494_v13 = vmul.f32 %v4344_v25, %v4344_v25  ;;  %v3451_v1 = vadd.s32 %v3449_v44, %v3443_v36  ;;  %v6889_v22 = vpop.f32.mrf.mxu0 }
 0x289   : > { %v3430_v24 = vmul.u32 18, %v3429_v38  ;;  %vm3452_vm11 = vc.u32 %v3450_v39, %v3446_v62  ;;  %v2336_v23 = vadd.f32 %v2268_v4, %v1975_v55  ;;  %v3447_v58 = vshrl.u32 %v3442_v49, 16  ;;  %4918 = vmatmul.msk.bf16.gmra.mxu1 %vm498_vm2, %v1801_v8 }
 0x28a   : > { %5200 = vst [vmem:[%s6420_s18 + $0x30] sm:$0xff] %v5135_v59   ;;  %v4529_v21 = vadd.f32 %v4528_v0, %v4494_v13  ;;  %v3453_v61 = vsel %vm3452_vm11, 1, %v7218_v15  ;;  %v2162_v19 = vsel %vm1766_vm6, %v2159_v3, %v2161_v45  ;;  %v2766_v42 = vrot.slane %v6804_v6, 3 }
 0x28b   : > { %v3431_v12 = vsub.s32 %v6814_v33, %v3430_v24  ;;  %v3455_v14 = vadd.s32 %v3453_v61, %v3451_v1  ;;  %v2940_v26 = vadd.f32 %v6831_v17, %v2704_v31  ;;  %5005 = vmatmul.msk.bf16.gmra.mxu2 %vm498_vm2, %v2162_v19  ;;  %v6879_v48 = vadd.s32 128, %v5985_v56 }
 0x28c   : > { %v2361_v33 = vunpack.c.l.b16 %v2357_v16  ;;  %v2705_v50 = vadd.f32 %v2637_v20, %v2336_v23  ;;  %v2767_v3 = vsel %vm2732_vm7, %v2764_v35, %v2766_v42  ;;  %v1976_v2 = vadd.f32 %v1910_v40, %v5816_v9 }
 0x28d   : > { %vm4057_vm12 = vcmp.ne.s32.totalorder %v3431_v12, 0  ;;  %vm4093_vm13 = vcmp.lt.s32.totalorder %v3431_v12, 0  ;;  %v4165_v54 = vadd.s32 18, %v3431_v12  ;;  %v3456_v0 = vadd.s32 %v3455_v14, %v3445_v11  ;;  %5043 = vmatmul.msk.bf16.gmra.mxu0 %vm498_vm2, %v2767_v3  ;;  %v2271_v52 = vpop.f32.mrf.mxu2 }
 0x28e   : > { %vm4129_vm14 = vmand %vm4093_vm13, %vm4057_vm12  ;;  %v3466_v17 = vand.u32 65535, %v6879_v48  ;;  %v3467_v27 = vshrl.u32 %v6879_v48, 16  ;;  %v6893_v20 = vadd.s32 136, %v5985_v56  ;;  %v6895_v35 = vpack.c.b16 %v2361_v33, %v2361_v33 }
 0x28f   : > { %v4201_v5 = vsel %vm4129_vm14, %v4165_v54, %v3431_v12  ;;  %v3457_v53 = vadd.s32 %v3456_v0, %v3447_v58  ;;  %v2337_v49 = vadd.f32 %v2271_v52, %v1976_v2  ;;  %v1912_v10 = vpop.f32.mrf.mxu1  ;;  %v2941_v7 = vadd.f32 %v6852_v41, %v2705_v50  ;;  %v2032_v52 = vld [vmem:[%s5310_s28 + $0xa0] sm:$0x3] }
 0x290   : > { %vm4237_vm0 = vcmp.lt.s32.totalorder %v4201_v5, 16  ;;  %v3469_v60 = vmul.u32 14564, %v3466_v17  ;;  %v3470_v43 = vmul.u32 58254, %v3466_v17  ;;  %v3471_v47 = vmul.u32 14564, %v3467_v27  ;;  %v6909_v61 = vpop.f32.mrf.mxu0 }
 0x291   : > { %v4345_v30 = vsel %vm4237_vm0, %v2940_v26, 0.0  ;;  %v3458_v29 = vshrl.u32 %v3457_v53, 4  ;;  %v3472_v55 = vmul.u32 58254, %v3467_v27  ;;  %v3495_v62 = vand.u32 65535, %v6893_v20 }
 0x292   : > { %v4452_v31 = vadd.f32 %v4451_v34, %v4345_v30  ;;  %v4495_v9 = vmul.f32 %v4345_v30, %v4345_v30  ;;  %v3473_v51 = vshll.u32 %v3470_v43, 16  ;;  %v3475_v36 = vshll.u32 %v3471_v47, 16  ;;  %v6904_v34 = vpop.f32.mrf.mxu3 }
 0x293   : > { %v3459_v28 = vmul.u32 18, %v3458_v29  ;;  %v3496_v38 = vshrl.u32 %v6893_v20, 16  ;;  %v6901_v44 = vadd.f32 %v2640_v18, %v2337_v49  ;;  %v2526_v13 = vshrl.u32 %v6895_v35, 16 }
 0x294   : > { %v4530_v39 = vadd.f32 %v4529_v21, %v4495_v9  ;;  %vm3477_vm15 = vc.u32 %v3469_v60, %v3473_v51  ;;  %v3479_v25 = vadd.s32 %v3473_v51, %v3469_v60  ;;  %v3474_v41 = vshrl.u32 %v3470_v43, 16 }
 0x295   : > { %v3460_v4 = vsub.s32 %v6828_v32, %v3459_v28  ;;  %v3478_v59 = vsel %vm3477_vm15, 1, %v7218_v15  ;;  %v2529_v24 = vshll.u32 %v6895_v35, 16  ;;  %v2273_v8 = vpop.f32.mrf.mxu2  ;;  %v3476_v32 = vshrl.u32 %v3471_v47, 16 }
 0x296   : > { %v3480_v11 = vadd.s32 %v3478_v59, %v3472_v55  ;;  %vm3481_vm1 = vc.u32 %v3479_v25, %v3475_v36  ;;  %v2528_v21 = vrot.slane %v2526_v13, 2  ;;  %v3498_v12 = vmul.u32 14564, %v3495_v62  ;;  %v7295_v55 = vld [vmem:[#allocation12_spill] sm:$0xff]  ;;  %v7296_v25 = vld [vmem:[#allocation13_spill] sm:$0xff] }
 0x297   : > { %vm4058_vm3 = vcmp.ne.s32.totalorder %v3460_v4, 0  ;;  %vm4094_vm4 = vcmp.lt.s32.totalorder %v3460_v4, 0  ;;  %v4166_v1 = vadd.s32 18, %v3460_v4  ;;  %v3482_v40 = vsel %vm3481_vm1, 1, %v7218_v15  ;;  %v1915_v19 = vpop.f32.mrf.mxu1 }
 0x298   : > { %vm4130_vm8 = vmand %vm4094_vm4, %vm4058_vm3  ;;  %v3484_v16 = vadd.s32 %v3482_v40, %v3480_v11  ;;  %v2531_v23 = vrot.slane %v2529_v24, 3  ;;  %v3499_v14 = vmul.u32 58254, %v3495_v62  ;;  %v3500_v18 = vmul.u32 14564, %v3496_v38  ;;  %v2881_v40 = vpop.f32.mrf.mxu0 }
 0x299   : > { %v4202_v58 = vsel %vm4130_vm8, %v4166_v1, %v3460_v4  ;;  %v1977_v33 = vadd.f32 %v1912_v10, %v5832_v46  ;;  %v3501_v50 = vmul.u32 58254, %v3496_v38  ;;  %v1802_v51 = vrot.slane %v7295_v55, 2 }
 0x29a   : > { %vm4238_vm9 = vcmp.lt.s32.totalorder %v4202_v58, 16  ;;  %v3485_v26 = vadd.s32 %v3484_v16, %v3474_v41  ;;  %v2532_v54 = vor.u32 %v2531_v23, %v2528_v21  ;;  %v3502_v3 = vshll.u32 %v3499_v14, 16  ;;  %v2645_v9 = vpop.f32.mrf.mxu3 }
 0x29b   : > { %v4346_v0 = vsel %vm4238_vm9, %v2941_v7, 0.0  ;;  %v3504_v17 = vshll.u32 %v3500_v18, 16  ;;  %v2338_v43 = vadd.f32 %v2273_v8, %v1977_v33  ;;  %v3503_v29 = vshrl.u32 %v3499_v14, 16 }
 0x29c   : > { %v5140_v27 = vpack.c.bf16 %v4346_v0, %v4345_v30  ;;  %v4453_v5 = vadd.f32 %v4452_v31, %v4346_v0  ;;  %v4496_v53 = vmul.f32 %v4346_v0, %v4346_v0  ;;  %v3486_v2 = vadd.s32 %v3485_v26, %v3476_v32 }
 0x29d   : > { %v2533_v60 = vsel %vm2363_vm5, %v6843_v63, %v2532_v54  ;;  %vm3506_vm10 = vc.u32 %v3498_v12, %v3502_v3  ;;  %v3508_v10 = vadd.s32 %v3502_v3, %v3498_v12  ;;  %v3505_v30 = vshrl.u32 %v3500_v18, 16  ;;  %v2276_v28 = vpop.f32.mrf.mxu2 }
 0x29e   : > { %5201 = vst [vmem:[%s6420_s18 + $0x38] sm:$0xff] %v5140_v27   ;;  %v6916_v49 = vadd.f32 %v4530_v39, %v4496_v53  ;;  %v3487_v46 = vshrl.u32 %v3486_v2, 4  ;;  %5025 = vmatmul.msk.bf16.gmra.mxu3 %vm498_vm2, %v2533_v60  ;;  %v3507_v47 = vsel %vm3506_vm10, 1, %v7218_v15  ;;  %v2108_v7 = vunpack.c.l.b16 %v2032_v52 }
 0x29f   : > { %v3509_v31 = vadd.s32 %v3507_v47, %v3501_v50  ;;  %vm3510_vm5 = vc.u32 %v3508_v10, %v3504_v17  ;;  %v2768_v36 = vrot.slane %v6895_v35, 3  ;;  %v6923_v62 = vadd.s32 144, %v5985_v56  ;;  %v1917_v13 = vpop.f32.mrf.mxu1  ;;  %v7297_v47 = vld [vmem:[#allocation14_spill] sm:$0xff] }
 0x2a0   : > { %v3488_v63 = vmul.u32 18, %v3487_v46  ;;  %v3511_v39 = vsel %vm3510_vm5, 1, %v7218_v15  ;;  %v1978_v38 = vadd.f32 %v1915_v19, %v7296_v25  ;;  %v1803_v4 = vsel %vm1766_vm6, %v1800_v57, %v1802_v51 }
 0x2a1   : > { %v2127_v59 = vpack.c.b16 %v2108_v7, %v2108_v7  ;;  %v3513_v11 = vadd.s32 %v3511_v39, %v3509_v31  ;;  %4919 = vmatmul.msk.bf16.gmra.mxu1 %vm498_vm2, %v1803_v4  ;;  %v2769_v35 = vsel %vm2732_vm7, %v2766_v42, %v2768_v36  ;;  %v3524_v24 = vand.u32 65535, %v6923_v62  ;;  %v6955_v31 = vpop.f32.mrf.mxu0 }
 0x2a2   : > { %v3489_v41 = vsub.s32 %v6879_v48, %v3488_v63  ;;  %v2942_v1 = vadd.f32 %v6889_v22, %v6901_v44  ;;  %5044 = vmatmul.msk.bf16.gmra.mxu0 %vm498_vm2, %v2769_v35  ;;  %v2339_v57 = vadd.f32 %v2276_v28, %v1978_v38  ;;  %v3525_v8 = vshrl.u32 %v6923_v62, 16 }
 0x2a3   : > { %v2163_v37 = vrot.slane %v2127_v59, 2  ;;  %v3514_v32 = vadd.s32 %v3513_v11, %v3503_v29  ;;  %v3527_v16 = vmul.u32 14564, %v3524_v24  ;;  %v3528_v21 = vmul.u32 58254, %v3524_v24 }
 0x2a4   : > { %vm4059_vm11 = vcmp.ne.s32.totalorder %v3489_v41, 0  ;;  %vm4095_vm12 = vcmp.lt.s32.totalorder %v3489_v41, 0  ;;  %v4167_v48 = vadd.s32 18, %v3489_v41  ;;  %v2707_v22 = vadd.f32 %v6904_v34, %v2338_v43  ;;  %v2647_v34 = vpop.f32.mrf.mxu3 }
 0x2a5   : > { %vm4131_vm13 = vmand %vm4095_vm12, %vm4059_vm11  ;;  %v2164_v42 = vsel %vm1766_vm6, %v2161_v45, %v2163_v37  ;;  %v3515_v44 = vadd.s32 %v3514_v32, %v3505_v30  ;;  %v3529_v58 = vmul.u32 14564, %v3525_v8  ;;  %v3530_v12 = vmul.u32 58254, %v3525_v8  ;;  %v2278_v18 = vpop.f32.mrf.mxu2 }
 0x2a6   : > { %v4203_v23 = vsel %vm4131_vm13, %v4167_v48, %v3489_v41  ;;  %5006 = vmatmul.msk.bf16.gmra.mxu2 %vm498_vm2, %v2164_v42  ;;  %v3531_v14 = vshll.u32 %v3528_v21, 16  ;;  %v6946_v19 = vadd.s32 152, %v5985_v56  ;;  %v2708_v33 = vadd.f32 %v2645_v9, %v2339_v57 }
 0x2a7   : > { %vm4239_vm7 = vcmp.lt.s32.totalorder %v4203_v23, 16  ;;  %v3516_v6 = vshrl.u32 %v3515_v44, 4  ;;  %v3533_v45 = vshll.u32 %v3529_v58, 16  ;;  %v1920_v3 = vpop.f32.mrf.mxu1  ;;  %v3532_v27 = vshrl.u32 %v3528_v21, 16  ;;  %v7298_v44 = vld [vmem:[#allocation15_spill] sm:$0xff] }
 0x2a8   : > { %v4347_v26 = vsel %vm4239_vm7, %v2942_v1, 0.0  ;;  %vm3535_vm6 = vc.u32 %v3527_v16, %v3531_v14  ;;  %v3537_v50 = vadd.s32 %v3531_v14, %v3527_v16  ;;  %v3553_v2 = vand.u32 65535, %v6946_v19 }
 0x2a9   : > { %v4454_v54 = vadd.f32 %v4453_v5, %v4347_v26  ;;  %v4497_v0 = vmul.f32 %v4347_v26, %v4347_v26  ;;  %v3517_v17 = vmul.u32 18, %v3516_v6  ;;  %v3536_v53 = vsel %vm3535_vm6, 1, %v7218_v15 }
 0x2aa   : > { %v3538_v60 = vadd.s32 %v3536_v53, %v3530_v12  ;;  %vm3539_vm2 = vc.u32 %v3537_v50, %v3533_v45  ;;  %v3554_v43 = vshrl.u32 %v6946_v19, 16  ;;  %v3534_v5 = vshrl.u32 %v3529_v58, 16  ;;  %v6970_v45 = vpop.f32.mrf.mxu0 }
 0x2ab   : > { %v4532_v52 = vadd.f32 %v6916_v49, %v4497_v0  ;;  %v3518_v29 = vsub.s32 %v6893_v20, %v3517_v17  ;;  %v3540_v46 = vsel %vm3539_vm2, 1, %v7218_v15  ;;  %v1979_v10 = vadd.f32 %v1917_v13, %v7297_v47 }
 0x2ac   : > { %v3542_v30 = vadd.s32 %v3540_v46, %v3538_v60  ;;  %v3556_v9 = vmul.u32 14564, %v3553_v2  ;;  %v3557_v55 = vmul.u32 58254, %v3553_v2  ;;  %v3558_v51 = vmul.u32 14564, %v3554_v43  ;;  %v2650_v48 = vpop.f32.mrf.mxu3 }
 0x2ad   : > { %v2943_v7 = vadd.f32 %v6909_v61, %v2707_v22  ;;  %vm4060_vm14 = vcmp.ne.s32.totalorder %v3518_v29, 0  ;;  %vm4096_vm0 = vcmp.lt.s32.totalorder %v3518_v29, 0  ;;  %v4168_v49 = vadd.s32 18, %v3518_v29  ;;  %v2281_v39 = vpop.f32.mrf.mxu2 }
 0x2ae   : > { %vm4132_vm15 = vmand %vm4096_vm0, %vm4060_vm14  ;;  %v6958_v28 = vadd.f32 %v2881_v40, %v2708_v33  ;;  %v3543_v20 = vadd.s32 %v3542_v30, %v3532_v27  ;;  %v2340_v63 = vadd.f32 %v2278_v18, %v1979_v10  ;;  %v3560_v36 = vshll.u32 %v3557_v55, 16 }
 0x2af   : > { %v4204_v25 = vsel %vm4132_vm15, %v4168_v49, %v3518_v29  ;;  %v3559_v38 = vmul.u32 58254, %v3554_v43  ;;  %v3562_v4 = vshll.u32 %v3558_v51, 16  ;;  %v6961_v59 = vadd.s32 160, %v5985_v56  ;;  %v1922_v41 = vpop.f32.mrf.mxu1 }
 0x2b0   : > { %vm4240_vm1 = vcmp.lt.s32.totalorder %v4204_v25, 16  ;;  %v3544_v13 = vadd.s32 %v3543_v20, %v3534_v5  ;;  %vm3564_vm3 = vc.u32 %v3556_v9, %v3560_v36  ;;  %v3566_v61 = vadd.s32 %v3560_v36, %v3556_v9 }
 0x2b1   : > { %v4348_v11 = vsel %vm4240_vm1, %v2943_v7, 0.0  ;;  %v3561_v35 = vshrl.u32 %v3557_v55, 16  ;;  %v3565_v24 = vsel %vm3564_vm3, 1, %v7218_v15  ;;  %v3582_v1 = vand.u32 65535, %v6961_v59 }
 0x2b2   : > { %v5145_v40 = vpack.c.bf16 %v4348_v11, %v4347_v26  ;;  %v4455_v37 = vadd.f32 %v4454_v54, %v4348_v11  ;;  %v4498_v57 = vmul.f32 %v4348_v11, %v4348_v11  ;;  %v3545_v8 = vshrl.u32 %v3544_v13, 4 }
 0x2b3   : > { %v3563_v32 = vshrl.u32 %v3558_v51, 16  ;;  %v3567_v42 = vadd.s32 %v3565_v24, %v3559_v38  ;;  %vm3568_vm4 = vc.u32 %v3566_v61, %v3562_v4  ;;  %v3583_v16 = vshrl.u32 %v6961_v59, 16 }
 0x2b4   : > { %5202 = vst [vmem:[%s6420_s18 + $0x40] sm:$0xff] %v5145_v40   ;;  %v4533_v21 = vadd.f32 %v4532_v52, %v4498_v57  ;;  %v3546_v23 = vmul.u32 18, %v3545_v8  ;;  %v3569_v22 = vsel %vm3568_vm4, 1, %v7218_v15  ;;  %v1980_v58 = vadd.f32 %v1920_v3, %v7298_v44  ;;  %v7299_v52 = vld [vmem:[#allocation16_spill] sm:$0xff]  ;;  %v2652_v49 = vpop.f32.mrf.mxu3 }
 0x2b5   : > { %v3571_v12 = vadd.s32 %v3569_v22, %v3567_v42  ;;  %v3585_v14 = vmul.u32 14564, %v3582_v1  ;;  %v3586_v18 = vmul.u32 58254, %v3582_v1  ;;  %v3587_v26 = vmul.u32 14564, %v3583_v16  ;;  %v2283_v0 = vpop.f32.mrf.mxu2  ;;  %v2888_v1 = vpop.f32.mrf.mxu0 }
 0x2b6   : > { %v3547_v6 = vsub.s32 %v6923_v62, %v3546_v23  ;;  %v2709_v33 = vadd.f32 %v2647_v34, %v2340_v63  ;;  %v2341_v54 = vadd.f32 %v2281_v39, %v1980_v58  ;;  %v6973_v50 = vadd.s32 168, %v5985_v56  ;;  %v7300_v23 = vld [vmem:[#allocation17_spill] sm:$0xff] }
 0x2b7   : > { %v3572_v17 = vadd.s32 %v3571_v12, %v3561_v35  ;;  %v3588_v27 = vmul.u32 58254, %v3583_v16  ;;  %v3589_v53 = vshll.u32 %v3586_v18, 16  ;;  %v3591_v2 = vshll.u32 %v3587_v26, 16  ;;  %v1925_v43 = vpop.f32.mrf.mxu1 }
 0x2b8   : > { %vm4061_vm8 = vcmp.ne.s32.totalorder %v3547_v6, 0  ;;  %vm4097_vm9 = vcmp.lt.s32.totalorder %v3547_v6, 0  ;;  %v4169_v3 = vadd.s32 18, %v3547_v6  ;;  %v1981_v60 = vadd.f32 %v1922_v41, %v7299_v52 }
 0x2b9   : > { %vm4133_vm10 = vmand %vm4097_vm9, %vm4061_vm8  ;;  %v3573_v62 = vadd.s32 %v3572_v17, %v3563_v32  ;;  %v3590_v34 = vshrl.u32 %v3586_v18, 16  ;;  %vm3593_vm5 = vc.u32 %v3585_v14, %v3589_v53  ;;  %v3595_v29 = vadd.s32 %v3589_v53, %v3585_v14 }
 0x2ba   : > { %v4205_v5 = vsel %vm4133_vm10, %v4169_v3, %v3547_v6  ;;  %v3594_v46 = vsel %vm3593_vm5, 1, %v7218_v15  ;;  %v3611_v47 = vand.u32 65535, %v6973_v50  ;;  %v3612_v10 = vshrl.u32 %v6973_v50, 16 }
 0x2bb   : > { %vm4241_vm11 = vcmp.lt.s32.totalorder %v4205_v5, 16  ;;  %v3574_v30 = vshrl.u32 %v3573_v62, 4  ;;  %v3596_v9 = vadd.s32 %v3594_v46, %v3588_v27  ;;  %vm3597_vm12 = vc.u32 %v3595_v29, %v3591_v2 }
 0x2bc   : > { %v4349_v55 = vsel %vm4241_vm11, %v6958_v28, 0.0  ;;  %v3592_v51 = vshrl.u32 %v3587_v26, 16  ;;  %v3598_v7 = vsel %vm3597_vm12, 1, %v7218_v15  ;;  %v2342_v20 = vadd.f32 %v2283_v0, %v1981_v60  ;;  %v2655_v53 = vpop.f32.mrf.mxu3 }
 0x2bd   : > { %v4456_v63 = vadd.f32 %v4455_v37, %v4349_v55  ;;  %v4499_v36 = vmul.f32 %v4349_v55, %v4349_v55  ;;  %v3575_v39 = vmul.u32 18, %v3574_v30  ;;  %v3600_v25 = vadd.s32 %v3598_v7, %v3596_v9  ;;  %v2286_v28 = vpop.f32.mrf.mxu2  ;;  %v2891_v9 = vpop.f32.mrf.mxu0 }
 0x2be   : > { %v2945_v38 = vadd.f32 %v6955_v31, %v2709_v33  ;;  %v3614_v4 = vmul.u32 14564, %v3611_v47  ;;  %v3615_v13 = vmul.u32 58254, %v3611_v47  ;;  %v3616_v61 = vmul.u32 14564, %v3612_v10 }
 0x2bf   : > { %v4534_v41 = vadd.f32 %v4533_v21, %v4499_v36  ;;  %v3576_v11 = vsub.s32 %v6946_v19, %v3575_v39  ;;  %v2710_v35 = vadd.f32 %v2650_v48, %v2341_v54  ;;  %v3601_v24 = vadd.s32 %v3600_v25, %v3590_v34  ;;  %v1927_v37 = vpop.f32.mrf.mxu1 }
 0x2c0   : > { %v2711_v40 = vadd.f32 %v2652_v49, %v2342_v20  ;;  %v3617_v57 = vmul.u32 58254, %v3612_v10  ;;  %v3618_v8 = vshll.u32 %v3615_v13, 16  ;;  %v3620_v32 = vshll.u32 %v3616_v61, 16  ;;  %v7301_v20 = vld [vmem:[#allocation18_spill] sm:$0xff] }
 0x2c1   : > { %vm4062_vm13 = vcmp.ne.s32.totalorder %v3576_v11, 0  ;;  %vm4098_vm7 = vcmp.lt.s32.totalorder %v3576_v11, 0  ;;  %v4170_v42 = vadd.s32 18, %v3576_v11  ;;  %v3602_v16 = vadd.s32 %v3601_v24, %v3592_v51 }
 0x2c2   : > { %vm4134_vm6 = vmand %vm4098_vm7, %vm4062_vm13  ;;  %vm3622_vm2 = vc.u32 %v3614_v4, %v3618_v8  ;;  %v3624_v31 = vadd.s32 %v3618_v8, %v3614_v4  ;;  %v1982_v21 = vadd.f32 %v1925_v43, %v7300_v23  ;;  %v6985_v19 = vadd.s32 176, %v5985_v56 }
 0x2c3   : > { %v4206_v48 = vsel %vm4134_vm6, %v4170_v42, %v3576_v11  ;;  %v3603_v22 = vshrl.u32 %v3602_v16, 4  ;;  %v3619_v44 = vshrl.u32 %v3615_v13, 16  ;;  %v3623_v58 = vsel %vm3622_vm2, 1, %v7218_v15 }
 0x2c4   : > { %vm4242_vm14 = vcmp.lt.s32.totalorder %v4206_v48, 16  ;;  %v3621_v12 = vshrl.u32 %v3616_v61, 16  ;;  %v3625_v14 = vadd.s32 %v3623_v58, %v3617_v57  ;;  %vm3626_vm0 = vc.u32 %v3624_v31, %v3620_v32  ;;  %v2657_v32 = vpop.f32.mrf.mxu3 }
 0x2c5   : > { %v4350_v18 = vsel %vm4242_vm14, %v2945_v38, 0.0  ;;  %v3604_v26 = vmul.u32 18, %v3603_v22  ;;  %v3627_v6 = vsel %vm3626_vm0, 1, %v7218_v15  ;;  %v3640_v33 = vand.u32 65535, %v6985_v19  ;;  %v2288_v47 = vpop.f32.mrf.mxu2 }
 0x2c6   : > { %v5150_v54 = vpack.c.bf16 %v4350_v18, %v4349_v55  ;;  %v4457_v0 = vadd.f32 %v4456_v63, %v4350_v18  ;;  %v4500_v17 = vmul.f32 %v4350_v18, %v4350_v18  ;;  %v3629_v27 = vadd.s32 %v3627_v6, %v3625_v14  ;;  %v2893_v14 = vpop.f32.mrf.mxu0 }
 0x2c7   : > { %v2946_v2 = vadd.f32 %v6970_v45, %v2710_v35  ;;  %v3605_v3 = vsub.s32 %v6961_v59, %v3604_v26  ;;  %v2343_v52 = vadd.f32 %v2286_v28, %v1982_v21  ;;  %v3641_v60 = vshrl.u32 %v6985_v19, 16  ;;  %v6994_v59 = vpop.f32.mrf.mxu1 }
 0x2c8   : > { %5203 = vst [vmem:[%s6420_s18 + $0x48] sm:$0xff] %v5150_v54   ;;  %v4535_v43 = vadd.f32 %v4534_v41, %v4500_v17  ;;  %v3630_v62 = vadd.s32 %v3629_v27, %v3619_v44  ;;  %v3643_v34 = vmul.u32 14564, %v3640_v33  ;;  %v3644_v29 = vmul.u32 58254, %v3640_v33 }
 0x2c9   : > { %vm4063_vm15 = vcmp.ne.s32.totalorder %v3605_v3, 0  ;;  %vm4099_vm1 = vcmp.lt.s32.totalorder %v3605_v3, 0  ;;  %v4171_v5 = vadd.s32 18, %v3605_v3  ;;  %v3645_v46 = vmul.u32 14564, %v3641_v60 }
 0x2ca   : > { %vm4135_vm3 = vmand %vm4099_vm1, %vm4063_vm15  ;;  %v2947_v10 = vadd.f32 %v2888_v1, %v2711_v40  ;;  %v3631_v30 = vadd.s32 %v3630_v62, %v3621_v12  ;;  %v3646_v45 = vmul.u32 58254, %v3641_v60  ;;  %v3647_v55 = vshll.u32 %v3644_v29, 16 }
 0x2cb   : > { %v4207_v51 = vsel %vm4135_vm3, %v4171_v5, %v3605_v3  ;;  %v2712_v7 = vadd.f32 %v2655_v53, %v2343_v52  ;;  %v3649_v49 = vshll.u32 %v3645_v46, 16  ;;  %v1983_v63 = vadd.f32 %v1927_v37, %v7301_v20 }
 0x2cc   : > { %vm4243_vm4 = vcmp.lt.s32.totalorder %v4207_v51, 16  ;;  %v3632_v36 = vshrl.u32 %v3631_v30, 4  ;;  %vm3651_vm8 = vc.u32 %v3643_v34, %v3647_v55  ;;  %v3653_v39 = vadd.s32 %v3647_v55, %v3643_v34  ;;  %v2660_v51 = vpop.f32.mrf.mxu3 }
 0x2cd   : > { %v4351_v25 = vsel %vm4243_vm4, %v2946_v2, 0.0  ;;  %v3648_v38 = vshrl.u32 %v3644_v29, 16  ;;  %v3652_v4 = vsel %vm3651_vm8, 1, %v7218_v15  ;;  %v6999_v13 = vadd.s32 184, %v5985_v56 }
 0x2ce   : > { %v4458_v61 = vadd.f32 %v4457_v0, %v4351_v25  ;;  %v4501_v41 = vmul.f32 %v4351_v25, %v4351_v25  ;;  %v3633_v11 = vmul.u32 18, %v3632_v36  ;;  %v3654_v35 = vadd.s32 %v3652_v4, %v3646_v45  ;;  %v7302_v45 = vld [vmem:[#allocation19_spill] sm:$0xff] }
 0x2cf   : > { %v3650_v24 = vshrl.u32 %v3645_v46, 16  ;;  %vm3655_vm9 = vc.u32 %v3653_v39, %v3649_v49  ;;  %v3669_v28 = vand.u32 65535, %v6999_v13  ;;  %v3670_v1 = vshrl.u32 %v6999_v13, 16  ;;  %v7011_v33 = vpop.f32.mrf.mxu1 }
 0x2d0   : > { %v4536_v40 = vadd.f32 %v4535_v43, %v4501_v41  ;;  %v3634_v57 = vsub.s32 %v6973_v50, %v3633_v11  ;;  %v3656_v8 = vsel %vm3655_vm9, 1, %v7218_v15  ;;  %v7006_v37 = vadd.s32 192, %v5985_v56  ;;  %v2291_v50 = vpop.f32.mrf.mxu2  ;;  %v7025_v11 = vpop.f32.mrf.mxu0 }
 0x2d1   : > { %v3658_v42 = vadd.s32 %v3656_v8, %v3654_v35  ;;  %v3672_v16 = vmul.u32 14564, %v3669_v28  ;;  %v3673_v31 = vmul.u32 58254, %v3669_v28  ;;  %v3674_v23 = vmul.u32 14564, %v3670_v1 }
 0x2d2   : > { %vm4064_vm10 = vcmp.ne.s32.totalorder %v3634_v57, 0  ;;  %vm4100_vm5 = vcmp.lt.s32.totalorder %v3634_v57, 0  ;;  %v4172_v21 = vadd.s32 18, %v3634_v57  ;;  %v2344_v48 = vadd.f32 %v2288_v47, %v1983_v63 }
 0x2d3   : > { %vm4136_vm11 = vmand %vm4100_vm5, %vm4064_vm10  ;;  %v7008_v22 = vadd.f32 %v2891_v9, %v2712_v7  ;;  %v3659_v44 = vadd.s32 %v3658_v42, %v3648_v38  ;;  %v3676_v58 = vshll.u32 %v3673_v31, 16  ;;  %v3675_v18 = vmul.u32 58254, %v3670_v1 }
 0x2d4   : > { %v4208_v12 = vsel %vm4136_vm11, %v4172_v21, %v3634_v57  ;;  %v3678_v26 = vshll.u32 %v3674_v23, 16  ;;  %v3698_v6 = vand.u32 65535, %v7006_v37  ;;  %v2713_v27 = vadd.f32 %v2657_v32, %v2344_v48 }
 0x2d5   : > { %vm4244_vm12 = vcmp.lt.s32.totalorder %v4208_v12, 16  ;;  %v3660_v54 = vadd.s32 %v3659_v44, %v3650_v24  ;;  %vm3680_vm13 = vc.u32 %v3672_v16, %v3676_v58  ;;  %v3682_v0 = vadd.s32 %v3676_v58, %v3672_v16 }
 0x2d6   : > { %v4352_v17 = vsel %vm4244_vm12, %v2947_v10, 0.0  ;;  %v3681_v53 = vsel %vm3680_vm13, 1, %v7218_v15  ;;  %v3699_v2 = vshrl.u32 %v7006_v37, 16  ;;  %v3677_v62 = vshrl.u32 %v3673_v31, 16 }
 0x2d7   : > { %v5155_v3 = vpack.c.bf16 %v4352_v17, %v4351_v25  ;;  %v4459_v52 = vadd.f32 %v4458_v61, %v4352_v17  ;;  %v4502_v60 = vmul.f32 %v4352_v17, %v4352_v17  ;;  %v3661_v43 = vshrl.u32 %v3660_v54, 4  ;;  %v1935_v28 = vpop.f32.mrf.mxu1 }
 0x2d8   : > { %v3683_v34 = vadd.s32 %v3681_v53, %v3675_v18  ;;  %vm3684_vm7 = vc.u32 %v3682_v0, %v3678_v26  ;;  %v3701_v29 = vmul.u32 14564, %v3698_v6  ;;  %v3702_v30 = vmul.u32 58254, %v3698_v6  ;;  %v2293_v41 = vpop.f32.mrf.mxu2 }
 0x2d9   : > { %5204 = vst [vmem:[%s6420_s18 + $0x50] sm:$0xff] %v5155_v3   ;;  %v4537_v5 = vadd.f32 %v4536_v40, %v4502_v60  ;;  %v3662_v46 = vmul.u32 18, %v3661_v43  ;;  %v3685_v47 = vsel %vm3684_vm7, 1, %v7218_v15  ;;  %v3679_v10 = vshrl.u32 %v3674_v23, 16 }
 0x2da   : > { %v3687_v9 = vadd.s32 %v3685_v47, %v3683_v34  ;;  %v1984_v55 = vadd.f32 %v6994_v59, %v7302_v45  ;;  %v3703_v7 = vmul.u32 14564, %v3699_v2  ;;  %v3704_v20 = vmul.u32 58254, %v3699_v2 }
 0x2db   : > { %v3663_v49 = vsub.s32 %v6985_v19, %v3662_v46  ;;  %v3705_v63 = vshll.u32 %v3702_v30, 16  ;;  %v7021_v36 = vadd.s32 200, %v5985_v56  ;;  %v7023_v39 = vadd.f32 %v2893_v14, %v2713_v27  ;;  %v7303_v14 = vld [vmem:[#allocation20_spill] sm:$0xff]  ;;  %v2662_v27 = vpop.f32.mrf.mxu3 }
 0x2dc   : > { %v3688_v25 = vadd.s32 %v3687_v9, %v3677_v62  ;;  %v2345_v38 = vadd.f32 %v2291_v50, %v1984_v55  ;;  %v3707_v4 = vshll.u32 %v3703_v7, 16  ;;  %v3706_v19 = vshrl.u32 %v3702_v30, 16 }
 0x2dd   : > { %vm4065_vm6 = vcmp.ne.s32.totalorder %v3663_v49, 0  ;;  %vm4101_vm2 = vcmp.lt.s32.totalorder %v3663_v49, 0  ;;  %v4173_v61 = vadd.s32 18, %v3663_v49  ;;  %vm3709_vm14 = vc.u32 %v3701_v29, %v3705_v63 }
 0x2de   : > { %vm4137_vm0 = vmand %vm4101_vm2, %vm4065_vm6  ;;  %v3689_v59 = vadd.s32 %v3688_v25, %v3679_v10  ;;  %v3710_v35 = vsel %vm3709_vm14, 1, %v7218_v15  ;;  %v3711_v24 = vadd.s32 %v3705_v63, %v3701_v29  ;;  %v3727_v57 = vand.u32 65535, %v7021_v36  ;;  %v7304_v10 = vld [vmem:[#allocation21_spill] sm:$0xff] }
 0x2df   : > { %v4209_v1 = vsel %vm4137_vm0, %v4173_v61, %v3663_v49  ;;  %v3712_v40 = vadd.s32 %v3710_v35, %v3704_v20  ;;  %v3728_v8 = vshrl.u32 %v7021_v36, 16  ;;  %v3708_v42 = vshrl.u32 %v3703_v7, 16  ;;  %v1937_v30 = vpop.f32.mrf.mxu1 }
 0x2e0   : > { %vm4245_vm15 = vcmp.lt.s32.totalorder %v4209_v1, 16  ;;  %v3690_v32 = vshrl.u32 %v3689_v59, 4  ;;  %vm3713_vm1 = vc.u32 %v3711_v24, %v3707_v4  ;;  %v3730_v23 = vmul.u32 14564, %v3727_v57  ;;  %v2296_v62 = vpop.f32.mrf.mxu2 }
 0x2e1   : > { %v4353_v16 = vsel %vm4245_vm15, %v7008_v22, 0.0  ;;  %v3714_v31 = vsel %vm3713_vm1, 1, %v7218_v15  ;;  %v3731_v21 = vmul.u32 58254, %v3727_v57  ;;  %v2714_v12 = vadd.f32 %v2660_v51, %v2345_v38 }
 0x2e2   : > { %v4460_v48 = vadd.f32 %v4459_v52, %v4353_v16  ;;  %v4503_v44 = vmul.f32 %v4353_v16, %v4353_v16  ;;  %v3691_v58 = vmul.u32 18, %v3690_v32  ;;  %v3716_v50 = vadd.s32 %v3714_v31, %v3712_v40 }
 0x2e3   : > { %v1985_v18 = vadd.f32 %v7011_v33, %v7303_v14  ;;  %v3732_v26 = vmul.u32 14564, %v3728_v8  ;;  %v3734_v6 = vshll.u32 %v3731_v21, 16  ;;  %v3733_v22 = vmul.u32 58254, %v3728_v8  ;;  %v2665_v57 = vpop.f32.mrf.mxu3 }
 0x2e4   : > { %v4538_v54 = vadd.f32 %v4537_v5, %v4503_v44  ;;  %v3692_v0 = vsub.s32 %v6999_v13, %v3691_v58  ;;  %v3717_v17 = vadd.s32 %v3716_v50, %v3706_v19  ;;  %v3735_v43 = vshrl.u32 %v3731_v21, 16  ;;  %v2898_v5 = vpop.f32.mrf.mxu0 }
 0x2e5   : > { %v2346_v53 = vadd.f32 %v2293_v41, %v1985_v18  ;;  %v3736_v2 = vshll.u32 %v3732_v26, 16  ;;  %vm3738_vm3 = vc.u32 %v3730_v23, %v3734_v6  ;;  %v3740_v3 = vadd.s32 %v3734_v6, %v3730_v23 }
 0x2e6   : > { %vm4066_vm4 = vcmp.ne.s32.totalorder %v3692_v0, 0  ;;  %vm4102_vm8 = vcmp.lt.s32.totalorder %v3692_v0, 0  ;;  %v4174_v52 = vadd.s32 18, %v3692_v0  ;;  %v3718_v60 = vadd.s32 %v3717_v17, %v3708_v42 }
 0x2e7   : > { %vm4138_vm9 = vmand %vm4102_vm8, %vm4066_vm4  ;;  %v3739_v33 = vsel %vm3738_vm3, 1, %v7218_v15  ;;  %vm3742_vm10 = vc.u32 %v3740_v3, %v3736_v2  ;;  %v7037_v34 = vadd.s32 208, %v5985_v56  ;;  %v1986_v9 = vadd.f32 %v1935_v28, %v7304_v10  ;;  %v1940_v6 = vpop.f32.mrf.mxu1  ;;  %v7306_v10 = vld [vmem:[#allocation8_spill] sm:$0xff] }
 0x2e8   : > { %v4210_v13 = vsel %vm4138_vm9, %v4174_v52, %v3692_v0  ;;  %v3719_v29 = vshrl.u32 %v3718_v60, 4  ;;  %v3741_v46 = vadd.s32 %v3739_v33, %v3733_v22  ;;  %v3743_v47 = vsel %vm3742_vm10, 1, %v7218_v15  ;;  %v2298_v58 = vpop.f32.mrf.mxu2 }
 0x2e9   : > { %vm4246_vm5 = vcmp.lt.s32.totalorder %v4210_v13, 16  ;;  %v3756_v45 = vand.u32 65535, %v7037_v34  ;;  %v3757_v55 = vshrl.u32 %v7037_v34, 16  ;;  %v3737_v49 = vshrl.u32 %v3732_v26, 16 }
 0x2ea   : > { %v4354_v51 = vsel %vm4246_vm5, %v7023_v39, 0.0  ;;  %v3720_v7 = vmul.u32 18, %v3719_v29  ;;  %v3745_v20 = vadd.s32 %v3743_v47, %v3741_v46  ;;  %v2715_v4 = vadd.f32 %v2662_v27, %v2346_v53 }
 0x2eb   : > { %v5160_v63 = vpack.c.bf16 %v4354_v51, %v4353_v16  ;;  %v4461_v25 = vadd.f32 %v4460_v48, %v4354_v51  ;;  %v4504_v38 = vmul.f32 %v4354_v51, %v4354_v51  ;;  %v2347_v59 = vadd.f32 %v2296_v62, %v1986_v9  ;;  %v7305_v48 = vld [vmem:[#allocation22_spill] sm:$0xff]  ;;  %v2667_v47 = vpop.f32.mrf.mxu3 }
 0x2ec   : > { %v3721_v61 = vsub.s32 %v7006_v37, %v3720_v7  ;;  %v3746_v41 = vadd.s32 %v3745_v20, %v3735_v43  ;;  %v3760_v19 = vmul.u32 58254, %v3756_v45  ;;  %v2950_v24 = vadd.f32 %v7025_v11, %v2714_v12  ;;  %v2901_v14 = vpop.f32.mrf.mxu0 }
 0x2ed   : > { %5205 = vst [vmem:[%s6420_s18 + $0x58] sm:$0xff] %v5160_v63   ;;  %v4539_v35 = vadd.f32 %v4538_v54, %v4504_v38  ;;  %v3759_v28 = vmul.u32 14564, %v3756_v45  ;;  %v3761_v1 = vmul.u32 14564, %v3757_v55  ;;  %v2951_v8 = vadd.f32 %v2898_v5, %v2715_v4 }
 0x2ee   : > { %vm4067_vm11 = vcmp.ne.s32.totalorder %v3721_v61, 0  ;;  %vm4103_vm12 = vcmp.lt.s32.totalorder %v3721_v61, 0  ;;  %v4175_v39 = vadd.s32 18, %v3721_v61  ;;  %v3747_v40 = vadd.s32 %v3746_v41, %v3737_v49 }
 0x2ef   : > { %vm4139_vm13 = vmand %vm4103_vm12, %vm4067_vm11  ;;  %v3762_v32 = vmul.u32 58254, %v3757_v55  ;;  %v3763_v42 = vshll.u32 %v3760_v19, 16  ;;  %v3765_v16 = vshll.u32 %v3761_v1, 16  ;;  %v2716_v23 = vadd.f32 %v2665_v57, %v2347_v59 }
 0x2f0   : > { %v4211_v37 = vsel %vm4139_vm13, %v4175_v39, %v3721_v61  ;;  %v3748_v31 = vshrl.u32 %v3747_v40, 4  ;;  %v7048_v21 = vadd.s32 216, %v5985_v56  ;;  %v1987_v44 = vadd.f32 %v1937_v30, %v7305_v48  ;;  %v2301_v59 = vpop.f32.mrf.mxu2 }
 0x2f1   : > { %vm4247_vm7 = vcmp.lt.s32.totalorder %v4211_v37, 16  ;;  %vm3767_vm6 = vc.u32 %v3759_v28, %v3763_v42  ;;  %v3769_v11 = vadd.s32 %v3763_v42, %v3759_v28  ;;  %v3764_v18 = vshrl.u32 %v3760_v19, 16 }
 0x2f2   : > { %v4355_v50 = vsel %vm4247_vm7, %v2950_v24, 0.0  ;;  %v3749_v12 = vmul.u32 18, %v3748_v31  ;;  %v3768_v26 = vsel %vm3767_vm6, 1, %v7218_v15  ;;  %v3785_v53 = vand.u32 65535, %v7048_v21 }
 0x2f3   : > { %v4462_v54 = vadd.f32 %v4461_v25, %v4355_v50  ;;  %v4505_v0 = vmul.f32 %v4355_v50, %v4355_v50  ;;  %v3770_v17 = vadd.s32 %v3768_v26, %v3762_v32  ;;  %vm3771_vm2 = vc.u32 %v3769_v11, %v3765_v16 }
 0x2f4   : > { %v3750_v27 = vsub.s32 %v7021_v36, %v3749_v12  ;;  %v3772_v22 = vsel %vm3771_vm2, 1, %v7218_v15  ;;  %v3786_v2 = vshrl.u32 %v7048_v21, 16  ;;  %v3766_v52 = vshrl.u32 %v3761_v1, 16  ;;  %v2903_v19 = vpop.f32.mrf.mxu0  ;;  %v1942_v1 = vpop.f32.mrf.mxu1 }
 0x2f5   : > { %v4540_v3 = vadd.f32 %v4539_v35, %v4505_v0  ;;  %v3774_v60 = vadd.s32 %v3772_v22, %v3770_v17  ;;  %v7057_v43 = vadd.s32 224, %v5985_v56  ;;  %v7059_v62 = vadd.f32 %v2901_v14, %v2716_v23 }
 0x2f6   : > { %vm4068_vm14 = vcmp.ne.s32.totalorder %v3750_v27, 0  ;;  %vm4104_vm0 = vcmp.lt.s32.totalorder %v3750_v27, 0  ;;  %v4176_v33 = vadd.s32 18, %v3750_v27  ;;  %v2348_v36 = vadd.f32 %v2298_v58, %v1987_v44 }
 0x2f7   : > { %vm4140_vm15 = vmand %vm4104_vm0, %vm4068_vm14  ;;  %v3775_v13 = vadd.s32 %v3774_v60, %v3764_v18  ;;  %v3789_v29 = vmul.u32 58254, %v3785_v53  ;;  %v3790_v5 = vmul.u32 14564, %v3786_v2  ;;  %v3788_v30 = vmul.u32 14564, %v3785_v53  ;;  %v2670_v18 = vpop.f32.mrf.mxu3 }
 0x2f8   : > { %v4212_v46 = vsel %vm4140_vm15, %v4176_v33, %v3750_v27  ;;  %v1988_v9 = vadd.f32 %v1940_v6, %v7306_v10  ;;  %v3814_v45 = vand.u32 65535, %v7057_v43  ;;  %v3815_v7 = vshrl.u32 %v7057_v43, 16 }
 0x2f9   : > { %vm4248_vm1 = vcmp.lt.s32.totalorder %v4212_v46, 16  ;;  %v3776_v55 = vadd.s32 %v3775_v13, %v3766_v52  ;;  %v3792_v51 = vshll.u32 %v3789_v29, 16  ;;  %v3791_v20 = vmul.u32 58254, %v3786_v2  ;;  %v2303_v52 = vpop.f32.mrf.mxu2 }
 0x2fa   : > { %v4356_v49 = vsel %vm4248_vm1, %v2951_v8, 0.0  ;;  %v3793_v63 = vshrl.u32 %v3789_v29, 16  ;;  %v3794_v25 = vshll.u32 %v3790_v5, 16  ;;  %v3817_v24 = vmul.u32 14564, %v3814_v45 }
 0x2fb   : > { %v5165_v38 = vpack.c.bf16 %v4356_v49, %v4355_v50  ;;  %v4463_v4 = vadd.f32 %v4462_v54, %v4356_v49  ;;  %v4506_v61 = vmul.f32 %v4356_v49, %v4356_v49  ;;  %v3777_v41 = vshrl.u32 %v3776_v55, 4 }
 0x2fc   : > { %vm3796_vm3 = vc.u32 %v3788_v30, %v3792_v51  ;;  %v3798_v35 = vadd.s32 %v3792_v51, %v3788_v30  ;;  %v3818_v28 = vmul.u32 58254, %v3814_v45  ;;  %v3819_v8 = vmul.u32 14564, %v3815_v7 }
 0x2fd   : > { %5206 = vst [vmem:[%s6420_s18 + $0x60] sm:$0xff] %v5165_v38   ;;  %v4541_v39 = vadd.f32 %v4540_v3, %v4506_v61  ;;  %v3778_v40 = vmul.u32 18, %v3777_v41  ;;  %v3797_v57 = vsel %vm3796_vm3, 1, %v7218_v15  ;;  %v3820_v42 = vmul.u32 58254, %v3815_v7  ;;  %v7307_v7 = vld [vmem:[#allocation9_spill] sm:$0xff]  ;;  %v7308_v38 = vld [vmem:[#allocation2_spill] sm:$0xff] }
 0x2fe   : > { %v3799_v32 = vadd.s32 %v3797_v57, %v3791_v20  ;;  %vm3800_vm4 = vc.u32 %v3798_v35, %v3794_v25  ;;  %v3821_v16 = vshll.u32 %v3818_v28, 16  ;;  %v2349_v23 = vadd.f32 %v2301_v59, %v1988_v9 }
 0x2ff   : > { %v3779_v37 = vsub.s32 %v7037_v34, %v3778_v40  ;;  %v3801_v31 = vsel %vm3800_vm4, 1, %v7218_v15  ;;  %v3823_v11 = vshll.u32 %v3819_v8, 16  ;;  %v3795_v48 = vshrl.u32 %v3790_v5, 16  ;;  %v2906_v5 = vpop.f32.mrf.mxu0  ;;  %v2672_v40 = vpop.f32.mrf.mxu3 }
 0x300   : > { %v3803_v44 = vadd.s32 %v3801_v31, %v3799_v32  ;;  %vm3825_vm8 = vc.u32 %v3817_v24, %v3821_v16  ;;  %v3827_v58 = vadd.s32 %v3821_v16, %v3817_v24  ;;  %v3822_v26 = vshrl.u32 %v3818_v28, 16 }
 0x301   : > { %vm4069_vm9 = vcmp.ne.s32.totalorder %v3779_v37, 0  ;;  %vm4105_vm10 = vcmp.lt.s32.totalorder %v3779_v37, 0  ;;  %v4177_v50 = vadd.s32 18, %v3779_v37  ;;  %v3826_v12 = vsel %vm3825_vm8, 1, %v7218_v15  ;;  %v2306_v31 = vpop.f32.mrf.mxu2 }
 0x302   : > { %vm4141_vm5 = vmand %vm4105_vm10, %vm4069_vm9  ;;  %v3804_v14 = vadd.s32 %v3803_v44, %v3793_v63  ;;  %v3828_v6 = vadd.s32 %v3826_v12, %v3820_v42  ;;  %vm3829_vm11 = vc.u32 %v3827_v58, %v3823_v11  ;;  %v2717_v54 = vadd.f32 %v2667_v47, %v2348_v36  ;;  %v1945_v47 = vpop.f32.mrf.mxu1 }
 0x303   : > { %v4213_v34 = vsel %vm4141_vm5, %v4177_v50, %v3779_v37  ;;  %v3830_v0 = vsel %vm3829_vm11, 1, %v7218_v15  ;;  %v7071_v17 = vadd.s32 232, %v5985_v56  ;;  %v3824_v22 = vshrl.u32 %v3819_v8, 16 }
 0x304   : > { %vm4249_vm12 = vcmp.lt.s32.totalorder %v4213_v34, 16  ;;  %v3805_v27 = vadd.s32 %v3804_v14, %v3795_v48  ;;  %v3832_v53 = vadd.s32 %v3830_v0, %v3828_v6  ;;  %v2718_v3 = vadd.f32 %v2670_v18, %v2349_v23 }
 0x305   : > { %v7074_v2 = vsel %vm4249_vm12, %v7059_v62, 0.0  ;;  %v3843_v60 = vand.u32 65535, %v7071_v17  ;;  %v3844_v33 = vshrl.u32 %v7071_v17, 16  ;;  %v2953_v30 = vadd.f32 %v2903_v19, %v2717_v54 }
 0x306   : > { %v4464_v13 = vadd.f32 %v4463_v4, %v7074_v2  ;;  %v4507_v36 = vmul.f32 %v7074_v2, %v7074_v2  ;;  %v3806_v29 = vshrl.u32 %v3805_v27, 4  ;;  %v3833_v46 = vadd.s32 %v3832_v53, %v3822_v26 }
 0x307   : > { %v3846_v10 = vmul.u32 14564, %v3843_v60  ;;  %v3847_v9 = vmul.u32 58254, %v3843_v60  ;;  %v3848_v62 = vmul.u32 14564, %v3844_v33  ;;  %v1989_v49 = vadd.f32 %v1942_v1, %v7307_v7  ;;  %v2908_v50 = vpop.f32.mrf.mxu0 }
 0x308   : > { %v4542_v45 = vadd.f32 %v4541_v39, %v4507_v36  ;;  %v3807_v55 = vmul.u32 18, %v3806_v29  ;;  %v3834_v51 = vadd.s32 %v3833_v46, %v3824_v22  ;;  %v2954_v20 = vadd.f32 %v2906_v5, %v2718_v3  ;;  %v2675_v36 = vpop.f32.mrf.mxu3 }
 0x309   : > { %v3850_v63 = vshll.u32 %v3847_v9, 16  ;;  %v3852_v25 = vshll.u32 %v3848_v62, 16  ;;  %v1990_v4 = vadd.f32 %v1945_v47, %v7308_v38  ;;  %v2350_v59 = vadd.f32 %v2303_v52, %v1989_v49  ;;  %v2308_v38 = vpop.f32.mrf.mxu2 }
 0x30a   : > { %v3808_v61 = vsub.s32 %v7048_v21, %v3807_v55  ;;  %v3835_v41 = vshrl.u32 %v3834_v51, 4  ;;  %v3849_v35 = vmul.u32 58254, %v3844_v33  ;;  %v3851_v24 = vshrl.u32 %v3847_v9, 16  ;;  %v1947_v46 = vpop.f32.mrf.mxu1 }
 0x30b   : > { %vm3854_vm13 = vc.u32 %v3846_v10, %v3850_v63  ;;  %v3856_v19 = vadd.s32 %v3850_v63, %v3846_v10  ;;  %v7085_v28 = vadd.s32 240, %v5985_v56  ;;  %v3853_v57 = vshrl.u32 %v3848_v62, 16  ;;  %v7309_v63 = vld [vmem:[#allocation4_spill] sm:$0xff] }
 0x30c   : > { %vm4070_vm7 = vcmp.ne.s32.totalorder %v3808_v61, 0  ;;  %vm4106_vm6 = vcmp.lt.s32.totalorder %v3808_v61, 0  ;;  %v4178_v39 = vadd.s32 18, %v3808_v61  ;;  %v3836_v1 = vmul.u32 18, %v3835_v41 }
 0x30d   : > { %vm4142_vm2 = vmand %vm4106_vm6, %vm4070_vm7  ;;  %v3855_v8 = vsel %vm3854_vm13, 1, %v7218_v15  ;;  %vm3858_vm14 = vc.u32 %v3856_v19, %v3852_v25  ;;  %v3872_v21 = vand.u32 65535, %v7085_v28  ;;  %v3873_v23 = vshrl.u32 %v7085_v28, 16 }
 0x30e   : > { %v4214_v32 = vsel %vm4142_vm2, %v4178_v39, %v3808_v61  ;;  %v3837_v42 = vsub.s32 %v7057_v43, %v3836_v1  ;;  %v3857_v16 = vadd.s32 %v3855_v8, %v3849_v35  ;;  %v3859_v37 = vsel %vm3858_vm14, 1, %v7218_v15 }
 0x30f   : > { %vm4250_vm0 = vcmp.lt.s32.totalorder %v4214_v32, 16  ;;  %v3875_v11 = vmul.u32 14564, %v3872_v21  ;;  %v3876_v48 = vmul.u32 58254, %v3872_v21  ;;  %v3877_v6 = vmul.u32 14564, %v3873_v23 }
 0x310   : > { %v4358_v44 = vsel %vm4250_vm0, %v2953_v30, 0.0  ;;  %vm4071_vm15 = vcmp.ne.s32.totalorder %v3837_v42, 0  ;;  %vm4107_vm1 = vcmp.lt.s32.totalorder %v3837_v42, 0  ;;  %v4179_v58 = vadd.s32 18, %v3837_v42 }
 0x311   : > { %v5170_v12 = vpack.c.bf16 %v4358_v44, %v7074_v2  ;;  %v4465_v14 = vadd.f32 %v4464_v13, %v4358_v44  ;;  %v4508_v18 = vmul.f32 %v4358_v44, %v4358_v44  ;;  %vm4143_vm3 = vmand %vm4107_vm1, %vm4071_vm15  ;;  %v3861_v43 = vadd.s32 %v3859_v37, %v3857_v16 }
 0x312   : > { %v4215_v26 = vsel %vm4143_vm3, %v4179_v58, %v3837_v42  ;;  %v3878_v34 = vmul.u32 58254, %v3873_v23  ;;  %v3879_v54 = vshll.u32 %v3876_v48, 16  ;;  %v2351_v22 = vadd.f32 %v2306_v31, %v1990_v4  ;;  %v2911_v4 = vpop.f32.mrf.mxu0 }
 0x313   : > { %5207 = vst [vmem:[%s6420_s18 + $0x68] sm:$0xff] %v5170_v12   ;;  %v4543_v0 = vadd.f32 %v4542_v45, %v4508_v18  ;;  %vm4251_vm4 = vcmp.lt.s32.totalorder %v4215_v26, 16  ;;  %v3862_v27 = vadd.s32 %v3861_v43, %v3851_v24  ;;  %v2719_v3 = vadd.f32 %v2672_v40, %v2350_v59 }
 0x314   : > { %v7094_v53 = vsel %vm4251_vm4, %v2954_v20, 0.0  ;;  %v3881_v52 = vshll.u32 %v3877_v6, 16  ;;  %vm3883_vm8 = vc.u32 %v3875_v11, %v3879_v54  ;;  %v3885_v29 = vadd.s32 %v3879_v54, %v3875_v11 }
 0x315   : > { %v4466_v2 = vadd.f32 %v4465_v14, %v7094_v53  ;;  %v4509_v60 = vmul.f32 %v7094_v53, %v7094_v53  ;;  %v3863_v33 = vadd.s32 %v3862_v27, %v3853_v57  ;;  %v3884_v13 = vsel %vm3883_vm8, 1, %v7218_v15  ;;  %v1950_v14 = vpop.f32.mrf.mxu1 }
 0x316   : > { %v3886_v5 = vadd.s32 %v3884_v13, %v3878_v34  ;;  %v7101_v47 = vadd.s32 248, %v5985_v56  ;;  %v2720_v9 = vadd.f32 %v2675_v36, %v2351_v22  ;;  %v7104_v62 = vadd.s32 256, %v5985_v56  ;;  %v7310_v36 = vld [vmem:[#allocation6_spill] sm:$0xff] }
 0x317   : > { %v4544_v30 = vadd.f32 %v4543_v0, %v4509_v60  ;;  %v3864_v10 = vshrl.u32 %v3863_v33, 4  ;;  %v3880_v45 = vshrl.u32 %v3876_v48, 16  ;;  %vm3887_vm9 = vc.u32 %v3885_v29, %v3881_v52  ;;  %v2677_v0 = vpop.f32.mrf.mxu3 }
 0x318   : > { %v3901_v55 = vand.u32 65535, %v7101_v47  ;;  %v3902_v51 = vshrl.u32 %v7101_v47, 16  ;;  %v2955_v7 = vadd.f32 %v2908_v50, %v2719_v3  ;;  %v3888_v20 = vsel %vm3887_vm9, 1, %v7218_v15  ;;  %v2311_v3 = vpop.f32.mrf.mxu2 }
 0x319   : > { %v3865_v49 = vmul.u32 18, %v3864_v10  ;;  %v1991_v25 = vadd.f32 %v1947_v46, %v7309_v63  ;;  %v3882_v61 = vshrl.u32 %v3877_v6, 16  ;;  %v3890_v41 = vadd.s32 %v3888_v20, %v3886_v5 }
 0x31a   : > { %v3904_v59 = vmul.u32 14564, %v3901_v55  ;;  %v3905_v35 = vmul.u32 58254, %v3901_v55  ;;  %v7111_v19 = vadd.f32 %v2911_v4, %v2720_v9  ;;  %v3906_v39 = vmul.u32 14564, %v3902_v51  ;;  %v2913_v9 = vpop.f32.mrf.mxu0 }
 0x31b   : > { %v3866_v24 = vsub.s32 %v7071_v17, %v3865_v49  ;;  %v3930_v1 = vand.u32 65535, %v7104_v62  ;;  %v3891_v40 = vadd.s32 %v3890_v41, %v3880_v45  ;;  %v3907_v57 = vmul.u32 58254, %v3902_v51 }
 0x31c   : > { %v3908_v8 = vshll.u32 %v3905_v35, 16  ;;  %v3931_v21 = vshrl.u32 %v7104_v62, 16  ;;  %v3910_v42 = vshll.u32 %v3906_v39, 16  ;;  %v2352_v37 = vadd.f32 %v2308_v38, %v1991_v25 }
 0x31d   : > { %vm4072_vm10 = vcmp.ne.s32.totalorder %v3866_v24, 0  ;;  %vm4108_vm5 = vcmp.lt.s32.totalorder %v3866_v24, 0  ;;  %v4180_v32 = vadd.s32 18, %v3866_v24  ;;  %v3892_v16 = vadd.s32 %v3891_v40, %v3882_v61  ;;  %v1952_v40 = vpop.f32.mrf.mxu1 }
 0x31e   : > { %vm4144_vm11 = vmand %vm4108_vm5, %vm4072_vm10  ;;  %vm3912_vm12 = vc.u32 %v3904_v59, %v3908_v8  ;;  %v3914_v31 = vadd.s32 %v3908_v8, %v3904_v59  ;;  %v3909_v23 = vshrl.u32 %v3905_v35, 16  ;;  %v3933_v48 = vmul.u32 14564, %v3930_v1  ;;  %v7311_v8 = vld [vmem:[#allocation5_spill] sm:$0xff] }
 0x31f   : > { %v4216_v17 = vsel %vm4144_vm11, %v4180_v32, %v3866_v24  ;;  %v3913_v11 = vsel %vm3912_vm12, 1, %v7218_v15  ;;  %v3893_v44 = vshrl.u32 %v3892_v16, 4  ;;  %v3934_v18 = vmul.u32 58254, %v3930_v1 }
 0x320   : > { %vm4252_vm13 = vcmp.lt.s32.totalorder %v4216_v17, 16  ;;  %v3915_v58 = vadd.s32 %v3913_v11, %v3907_v57  ;;  %vm3916_vm7 = vc.u32 %v3914_v31, %v3910_v42  ;;  %v3935_v43 = vmul.u32 14564, %v3931_v21  ;;  %v2680_v57 = vpop.f32.mrf.mxu3  ;;  %v2313_v11 = vpop.f32.mrf.mxu2 }
 0x321   : > { %v4360_v50 = vsel %vm4252_vm13, %v2955_v7, 0.0  ;;  %v3917_v12 = vsel %vm3916_vm7, 1, %v7218_v15  ;;  %v3894_v54 = vmul.u32 18, %v3893_v44  ;;  %v3911_v27 = vshrl.u32 %v3906_v39, 16 }
 0x322   : > { %v5175_v26 = vpack.c.bf16 %v4360_v50, %v7094_v53  ;;  %v4467_v6 = vadd.f32 %v4466_v2, %v4360_v50  ;;  %v4510_v34 = vmul.f32 %v4360_v50, %v4360_v50  ;;  %v3919_v22 = vadd.s32 %v3917_v12, %v3915_v58 }
 0x323   : > { %v3936_v52 = vmul.u32 58254, %v3931_v21  ;;  %v3937_v60 = vshll.u32 %v3934_v18, 16  ;;  %v3895_v13 = vsub.s32 %v7085_v28, %v3894_v54  ;;  %v1992_v29 = vadd.f32 %v1950_v14, %v7310_v36  ;;  %v7312_v21 = vld [vmem:[#allocation3_spill] sm:$0xff] }
 0x324   : > { %5208 = vst [vmem:[%s6420_s18 + $0x70] sm:$0xff] %v5175_v26   ;;  %v4545_v33 = vadd.f32 %v4544_v30, %v4510_v34  ;;  %v3939_v5 = vshll.u32 %v3935_v43, 16  ;;  %v2721_v46 = vadd.f32 %v2677_v0, %v2352_v37  ;;  %v3920_v10 = vadd.s32 %v3919_v22, %v3909_v23 }
 0x325   : > { %vm3941_vm6 = vc.u32 %v3933_v48, %v3937_v60  ;;  %v3943_v53 = vadd.s32 %v3937_v60, %v3933_v48  ;;  %vm4073_vm2 = vcmp.ne.s32.totalorder %v3895_v13, 0  ;;  %vm4109_vm14 = vcmp.lt.s32.totalorder %v3895_v13, 0 }
 0x326   : > { %v4181_v2 = vadd.s32 18, %v3895_v13  ;;  %v3942_v45 = vsel %vm3941_vm6, 1, %v7218_v15  ;;  %vm4145_vm0 = vmand %vm4109_vm14, %vm4073_vm2  ;;  %v3921_v55 = vadd.s32 %v3920_v10, %v3911_v27  ;;  %v3938_v51 = vshrl.u32 %v3934_v18, 16  ;;  %v2916_v18 = vpop.f32.mrf.mxu0 }
 0x327   : > { %v3944_v7 = vadd.s32 %v3942_v45, %v3936_v52  ;;  %vm3945_vm15 = vc.u32 %v3943_v53, %v3939_v5  ;;  %v2353_v28 = vadd.f32 %v2311_v3, %v1992_v29  ;;  %v7124_v20 = vadd.s32 264, %v5985_v56 }
 0x328   : > { %v4217_v30 = vsel %vm4145_vm0, %v4181_v2, %v3895_v13  ;;  %v3946_v49 = vsel %vm3945_vm15, 1, %v7218_v15  ;;  %v3922_v63 = vshrl.u32 %v3921_v55, 4  ;;  %v3940_v25 = vshrl.u32 %v3935_v43, 16  ;;  %v2682_v2 = vpop.f32.mrf.mxu3 }
 0x329   : > { %vm4253_vm1 = vcmp.lt.s32.totalorder %v4217_v30, 16  ;;  %v3948_v38 = vadd.s32 %v3946_v49, %v3944_v7  ;;  %v2957_v61 = vadd.f32 %v2913_v9, %v2721_v46  ;;  %v3959_v41 = vand.u32 65535, %v7124_v20 }
 0x32a   : > { %v4361_v4 = vsel %vm4253_vm1, %v7111_v19, 0.0  ;;  %v3960_v59 = vshrl.u32 %v7124_v20, 16  ;;  %v3923_v39 = vmul.u32 18, %v3922_v63  ;;  %v1757_v32 = vadd.f32 %v7312_v21, %v7311_v8 }
 0x32b   : > { %v4468_v35 = vadd.f32 %v4467_v6, %v4361_v4  ;;  %v4511_v24 = vmul.f32 %v4361_v4, %v4361_v4  ;;  %v3949_v1 = vadd.s32 %v3948_v38, %v3938_v51  ;;  %v3962_v42 = vmul.u32 14564, %v3959_v41  ;;  %v7313_v38 = vld [vmem:[#allocation24_spill] sm:$0xff] }
 0x32c   : > { %v3963_v16 = vmul.u32 58254, %v3959_v41  ;;  %v3964_v37 = vmul.u32 14564, %v3960_v59  ;;  %v3924_v19 = vsub.s32 %v7101_v47, %v3923_v39  ;;  %v2722_v17 = vadd.f32 %v2680_v57, %v2353_v28  ;;  %v1955_v28 = vpop.f32.mrf.mxu1 }
 0x32d   : > { %v4546_v31 = vadd.f32 %v4545_v33, %v4511_v24  ;;  %v3950_v23 = vadd.s32 %v3949_v1, %v3940_v25  ;;  %v1993_v48 = vadd.f32 %v1952_v40, %v1757_v32  ;;  %v3965_v44 = vmul.u32 58254, %v3960_v59 }
 0x32e   : > { %v3966_v58 = vshll.u32 %v3963_v16, 16  ;;  %v3968_v50 = vshll.u32 %v3964_v37, 16  ;;  %vm4074_vm3 = vcmp.ne.s32.totalorder %v3924_v19, 0  ;;  %vm4110_vm4 = vcmp.lt.s32.totalorder %v3924_v19, 0  ;;  %v2918_v39 = vpop.f32.mrf.mxu0 }
 0x32f   : > { %v4182_v12 = vadd.s32 18, %v3924_v19  ;;  %v3951_v14 = vshrl.u32 %v3950_v23, 4  ;;  %vm4146_vm8 = vmand %vm4110_vm4, %vm4074_vm3  ;;  %v2354_v43 = vadd.f32 %v2313_v11, %v1993_v48  ;;  %v3967_v26 = vshrl.u32 %v3963_v16, 16 }
 0x330   : > { %vm3970_vm9 = vc.u32 %v3962_v42, %v3966_v58  ;;  %v3972_v6 = vadd.s32 %v3966_v58, %v3962_v42  ;;  %v7134_v0 = vadd.s32 272, %v5985_v56  ;;  %v3969_v27 = vshrl.u32 %v3964_v37, 16  ;;  %v2316_v37 = vpop.f32.mrf.mxu2 }
 0x331   : > { %v4218_v34 = vsel %vm4146_vm8, %v4182_v12, %v3924_v19  ;;  %v3952_v54 = vmul.u32 18, %v3951_v14  ;;  %v3971_v47 = vsel %vm3970_vm9, 1, %v7218_v15  ;;  %v2958_v46 = vadd.f32 %v2916_v18, %v2722_v17 }
 0x332   : > { %vm4254_vm10 = vcmp.lt.s32.totalorder %v4218_v34, 16  ;;  %v3973_v22 = vadd.s32 %v3971_v47, %v3965_v44  ;;  %vm3974_vm5 = vc.u32 %v3972_v6, %v3968_v50  ;;  %v3988_v33 = vand.u32 65535, %v7134_v0 }
 0x333   : > { %v4362_v3 = vsel %vm4254_vm10, %v2957_v61, 0.0  ;;  %v3953_v52 = vsub.s32 %v7104_v62, %v3952_v54  ;;  %v3975_v60 = vsel %vm3974_vm5, 1, %v7218_v15  ;;  %v3989_v45 = vshrl.u32 %v7134_v0, 16 }
 0x334   : > { %v5180_v13 = vpack.c.bf16 %v4362_v3, %v4361_v4  ;;  %v4469_v36 = vadd.f32 %v4468_v35, %v4362_v3  ;;  %v4512_v29 = vmul.f32 %v4362_v3, %v4362_v3  ;;  %v3977_v5 = vadd.s32 %v3975_v60, %v3973_v22  ;;  %v7314_v4 = vld [vmem:[#allocation23_spill] sm:$0xff]  ;;  %v2685_v3 = vpop.f32.mrf.mxu3 }
 0x335   : > { %vm4075_vm11 = vcmp.ne.s32.totalorder %v3953_v52, 0  ;;  %vm4111_vm12 = vcmp.lt.s32.totalorder %v3953_v52, 0  ;;  %v4183_v10 = vadd.s32 18, %v3953_v52  ;;  %v2723_v55 = vadd.f32 %v2682_v2, %v2354_v43 }
 0x336   : > { %5209 = vst [vmem:[%s6420_s18 + $0x78] sm:$0xff] %v5180_v13   ;;  %v4547_v53 = vadd.f32 %v4546_v31, %v4512_v29  ;;  %vm4147_vm13 = vmand %vm4111_vm12, %vm4075_vm11  ;;  %v3978_v9 = vadd.s32 %v3977_v5, %v3967_v26  ;;  %v3991_v51 = vmul.u32 14564, %v3988_v33  ;;  %v3992_v7 = vmul.u32 58254, %v3988_v33  ;;  %v1957_v5 = vpop.f32.mrf.mxu1 }
 0x337   : > { %v4219_v62 = vsel %vm4147_vm13, %v4183_v10, %v3953_v52  ;;  %v3993_v49 = vmul.u32 14564, %v3989_v45  ;;  %v7142_v63 = vadd.s32 280, %v5985_v56  ;;  %v1758_v61 = vadd.f32 %v7314_v4, %v7313_v38  ;;  %v7315_v10 = vld [vmem:[#allocation7_spill] sm:$0xff] }
 0x338   : > { %vm4255_vm7 = vcmp.lt.s32.totalorder %v4219_v62, 16  ;;  %v3979_v30 = vadd.s32 %v3978_v9, %v3969_v27  ;;  %v3994_v41 = vmul.u32 58254, %v3989_v45  ;;  %v3995_v59 = vshll.u32 %v3992_v7, 16 }
 0x339   : > { %v4363_v25 = vsel %vm4255_vm7, %v2958_v46, 0.0  ;;  %v3997_v40 = vshll.u32 %v3993_v49, 16  ;;  %v2959_v57 = vadd.f32 %v2918_v39, %v2723_v55  ;;  %v1994_v8 = vadd.f32 %v1955_v28, %v1758_v61  ;;  %v2318_v55 = vpop.f32.mrf.mxu2 }
 0x33a   : > { %v4470_v35 = vadd.f32 %v4469_v36, %v4363_v25  ;;  %v4513_v24 = vmul.f32 %v4363_v25, %v4363_v25  ;;  %v3980_v1 = vshrl.u32 %v3979_v30, 4  ;;  %vm3999_vm6 = vc.u32 %v3991_v51, %v3995_v59  ;;  %v2921_v30 = vpop.f32.mrf.mxu0 }
 0x33b   : > { %v4001_v21 = vadd.s32 %v3995_v59, %v3991_v51  ;;  %v4000_v56 = vsel %vm3999_vm6, 1, %v7218_v15  ;;  %v4017_v16 = vand.u32 65535, %v7142_v63  ;;  %v3996_v31 = vshrl.u32 %v3992_v7, 16 }
 0x33c   : > { %v4548_v32 = vadd.f32 %v4547_v53, %v4513_v24  ;;  %v3981_v42 = vmul.u32 18, %v3980_v1  ;;  %v4002_v19 = vadd.s32 %v4000_v56, %v3994_v41  ;;  %v4018_v17 = vshrl.u32 %v7142_v63, 16  ;;  %v7316_v53 = vld [vmem:[#allocation25_spill] sm:$0xff] }
 0x33d   : > { %vm4003_vm2 = vc.u32 %v4001_v21, %v3997_v40  ;;  %v4020_v48 = vmul.u32 14564, %v4017_v16  ;;  %v4021_v44 = vmul.u32 58254, %v4017_v16  ;;  %v3998_v58 = vshrl.u32 %v3993_v49, 16 }
 0x33e   : > { %v3982_v23 = vsub.s32 %v7124_v20, %v3981_v42  ;;  %v4004_v11 = vsel %vm4003_vm2, 1, %v7218_v15  ;;  %v4022_v12 = vmul.u32 14564, %v4018_v17  ;;  %v4023_v14 = vmul.u32 58254, %v4018_v17 }
 0x33f   : > { %v4006_v50 = vadd.s32 %v4004_v11, %v4002_v19  ;;  %v4024_v43 = vshll.u32 %v4021_v44, 16  ;;  %v2355_v54 = vadd.f32 %v2316_v37, %v1994_v8  ;;  %v4025_v52 = vshrl.u32 %v4021_v44, 16 }
 0x340   : > { %vm4076_vm14 = vcmp.ne.s32.totalorder %v3982_v23, 0  ;;  %vm4112_vm0 = vcmp.lt.s32.totalorder %v3982_v23, 0  ;;  %v4184_v18 = vadd.s32 18, %v3982_v23  ;;  %v4026_v6 = vshll.u32 %v4022_v12, 16 }
 0x341   : > { %vm4148_vm15 = vmand %vm4112_vm0, %vm4076_vm14  ;;  %v4007_v26 = vadd.s32 %v4006_v50, %v3996_v31  ;;  %vm4028_vm1 = vc.u32 %v4020_v48, %v4024_v43  ;;  %v4030_v47 = vadd.s32 %v4024_v43, %v4020_v48  ;;  %v2724_v46 = vadd.f32 %v2685_v3, %v2355_v54 }
 0x342   : > { %v4220_v34 = vsel %vm4148_vm15, %v4184_v18, %v3982_v23  ;;  %v4029_v27 = vsel %vm4028_vm1, 1, %v7218_v15  ;;  %v1759_v2 = vadd.f32 %v7316_v53, %v7315_v10  ;;  %v4027_v51 = vshrl.u32 %v4022_v12, 16  ;;  %v2923_v21 = vpop.f32.mrf.mxu0 }
 0x343   : > { %vm4256_vm3 = vcmp.lt.s32.totalorder %v4220_v34, 16  ;;  %v4008_v20 = vadd.s32 %v4007_v26, %v3998_v58  ;;  %v4031_v60 = vadd.s32 %v4029_v27, %v4023_v14  ;;  %vm4032_vm4 = vc.u32 %v4030_v47, %v4026_v6 }
 0x344   : > { %v4364_v22 = vsel %vm4256_vm3, %v2959_v57, 0.0  ;;  %v4033_v9 = vsel %vm4032_vm4, 1, %v7218_v15  ;;  %v1995_v28 = vadd.f32 %v1957_v5, %v1759_v2  ;;  %v2960_v38 = vadd.f32 %v2921_v30, %v2724_v46 }
 0x345   : > { %v5185_v33 = vpack.c.bf16 %v4364_v22, %v4363_v25  ;;  %v4471_v13 = vadd.f32 %v4470_v35, %v4364_v22  ;;  %v4514_v36 = vmul.f32 %v4364_v22, %v4364_v22  ;;  %v4009_v29 = vshrl.u32 %v4008_v20, 4  ;;  %v2687_v35 = vpop.f32.mrf.mxu3 }
 0x346   : > { %v4035_v7 = vadd.s32 %v4033_v9, %v4031_v60  ;;  %v2356_v4 = vadd.f32 %v2318_v55, %v1995_v28 }
 0x347   : > { %5210 = vst [vmem:[%s6420_s18 + $0x80] sm:$0xff] %v5185_v33   ;;  %v4549_v45 = vadd.f32 %v4548_v32, %v4514_v36  ;;  %v4010_v62 = vmul.u32 18, %v4009_v29 }
 0x348   : > { %v4036_v25 = vadd.s32 %v4035_v7, %v4025_v52  ;;  %v2725_v39 = vadd.f32 %v2687_v35, %v2356_v4 }
 0x349   : > { %v4011_v49 = vsub.s32 %v7134_v0, %v4010_v62 }
 0x34a   : > { %v4037_v41 = vadd.s32 %v4036_v25, %v4027_v51  ;;  %v2961_v32 = vadd.f32 %v2923_v21, %v2725_v39 }
 0x34b   : > { %vm4077_vm8 = vcmp.ne.s32.totalorder %v4011_v49, 0  ;;  %vm4113_vm9 = vcmp.lt.s32.totalorder %v4011_v49, 0  ;;  %v4185_v61 = vadd.s32 18, %v4011_v49 }
 0x34c   : > { %vm4149_vm10 = vmand %vm4113_vm9, %vm4077_vm8  ;;  %v4038_v15 = vshrl.u32 %v4037_v41, 4 }
 0x34d   : > { %v4221_v59 = vsel %vm4149_vm10, %v4185_v61, %v4011_v49 }
 0x34e   : > { %vm4257_vm5 = vcmp.lt.s32.totalorder %v4221_v59, 16  ;;  %v4039_v1 = vmul.u32 18, %v4038_v15 }
 0x34f   : > { %v4365_v24 = vsel %vm4257_vm5, %v2960_v38, 0.0 }
 0x350   : > { %v4472_v40 = vadd.f32 %v4471_v13, %v4365_v24  ;;  %v4515_v57 = vmul.f32 %v4365_v24, %v4365_v24  ;;  %v4040_v0 = vsub.s32 %v7142_v63, %v4039_v1 }
 0x352   : > { %v4550_v8 = vadd.f32 %v4549_v45, %v4515_v57  ;;  %vm4078_vm11 = vcmp.ne.s32.totalorder %v4040_v0, 0  ;;  %vm4114_vm12 = vcmp.lt.s32.totalorder %v4040_v0, 0  ;;  %v4186_v42 = vadd.s32 18, %v4040_v0 }
 0x353   : > { %vm4150_vm13 = vmand %vm4114_vm12, %vm4078_vm11 }
 0x354   : > { %v4222_v56 = vsel %vm4150_vm13, %v4186_v42, %v4040_v0 }
 0x355   : > { %vm4258_vm7 = vcmp.lt.s32.totalorder %v4222_v56, 16 }
 0x356   : > { %v4366_v16 = vsel %vm4258_vm7, %v2961_v32, 0.0 }
 0x357   : > { %v5190_v37 = vpack.c.bf16 %v4366_v16, %v4365_v24  ;;  %v4473_v31 = vadd.f32 %v4472_v40, %v4366_v16  ;;  %v4516_v19 = vmul.f32 %v4366_v16, %v4366_v16 }
 0x359   : > { %5211 = vst [vmem:[%s6420_s18 + $0x88] sm:$0xff] %v5190_v37   ;;  %v4474_v17 = vrot.slane %v4473_v31, 4  ;;  %v4551_v23 = vadd.f32 %v4550_v8, %v4516_v19 }
 0x35b   : > { %v4475_v11 = vadd.f32 %v4474_v17, %v4473_v31  ;;  %v4552_v63 = vrot.slane %v4551_v23, 4 }
 0x35d   : > { %v4476_v48 = vrot.slane %v4475_v11, 2  ;;  %v4553_v44 = vadd.f32 %v4552_v63, %v4551_v23 }
 0x35f   : > { %v4477_v58 = vadd.f32 %v4476_v48, %v4475_v11  ;;  %v4554_v50 = vrot.slane %v4553_v44, 2 }
 0x361   : > { %v4478_v12 = vrot.slane %v4477_v58, 1  ;;  %v4555_v14 = vadd.f32 %v4554_v50, %v4553_v44 }
 0x363   : > { %v4479_v18 = vadd.f32 %v4478_v12, %v4477_v58  ;;  %v4556_v43 = vrot.slane %v4555_v14, 1 }
 0x365   : > { %4480 = vst [vmem:[%s211_s21] sm:$0x1] %v4479_v18  ;;  %v4557_v26 = vadd.f32 %v4556_v43, %v4555_v14 }
 0x367   : > { %4558 = vst [vmem:[%s214_s24] sm:$0x1] %v4557_v26 }
 0x368 PF: > { %s15_s15 = sadd.s32 1, %s5252_s15  }
 0x369   : > { %p12_p4 = scmp.ge.s32.totalorder %s15_s15, 4  }
 0x36b   :  { %14 = sbr.rel (!%p12_p4) target bundleno = 1 (0x1), region = 90 }

</bundles_post_ra>
